<compile_context>
chip_gen: v5e
topology: v5e:2x2
jax: 0.10.0
libtpu: 0.0.40
codegen_flags: <defaults>
</compile_context>

<pallas_src>
import jax
import jax.numpy as jnp
from jax import lax
from jax.experimental import pallas as pl
from jax.experimental.pallas import tpu as pltpu

N_EDGE_TYPES = 25
EDGE_FEATURES = 2
LANES = 128          # lane-dense padding for every feature axis


def _round_up(x, m):
    return (x + m - 1) // m * m


# --------------------------------------------------------------------------
# Fused kernel: 3x NNConv(EdgeNN, aggr='mean', root, bias) + ReLU each,
# followed by scatter_mean(h, gate*(batch+1)) pooling (segments 1..B).
# --------------------------------------------------------------------------
def _make_cellnet_kernel(n_edges, cins, n_graphs):
    def kernel(src_ref, dst_ref,                         # SMEM int32 [E]
               x_ref, etype_ref, efeat_ref,              # VMEM
               inv_deg_ref, pool_ids_ref,                # VMEM
               emb1, wh1, bh1, wg1, bg1, root1, bias1,   # layer 1 (lane-padded)
               emb2, wh2, bh2, wg2, bg2, root2, bias2,   # layer 2
               emb3, wh3, bh3, wg3, bg3, root3, bias3,   # layer 3
               out_ref,                                  # [B, 128]
               h_ref, acc_ref, xj_ref, msg_ref):         # VMEM scratch
        # ---- shared edge-side precompute (hoisted out of the 3 layers) ----
        etype_oh = (etype_ref[...] ==
                    lax.broadcasted_iota(jnp.int32, (1, N_EDGE_TYPES), 1)
                    ).astype(jnp.float32)                          # [Ep, 25]
        ef = efeat_ref[...]                                        # [Ep, 2]
        e0 = ef[:, 0:1]
        e1 = ef[:, 1:2]
        inv_deg = inv_deg_ref[...]                                 # [Np, 1]

        h_ref[...] = x_ref[...]                 # resident node features
        xj_ref[...] = jnp.zeros_like(xj_ref)    # zero pad rows once

        def layer(cin, emb_r, wh_r, bh_r, wg_r, bg_r, root_r, bias_r):
            # EdgeNN: theta = relu(emb[etype] * (ef@Wh + bh) + (ef@Wg + bg))
            # K=2 linears stay on the VPU; the 25-way embedding lookup is a
            # tiny in-kernel one-hot matmul (no one-hot traffic from HBM).
            emb_e = jnp.dot(etype_oh, emb_r[...],
                            preferred_element_type=jnp.float32)    # [Ep, cin*128]
            hh = e0 * wh_r[0:1, :] + e1 * wh_r[1:2, :] + bh_r[...]
            gg = e0 * wg_r[0:1, :] + e1 * wg_r[1:2, :] + bg_r[...]
            theta = jnp.maximum(emb_e * hh + gg, 0.0)              # [Ep, cin*128]

            # gather: xj[e] = h[src[e]]   (index-based, no [E,N] one-hot)
            def gather_body(e, carry):
                s = src_ref[e]
                xj_ref[pl.ds(e, 1), :] = h_ref[pl.ds(s, 1), :]
                return carry
            lax.fori_loop(0, n_edges, gather_body, 0)

            # per-edge vec-mat with lane-aligned (128-wide) theta slices
            xj = xj_ref[...]
            msg = xj[:, 0:1] * theta[:, 0:LANES]
            for i in range(1, cin):                                 # static, cin<=10
                msg = msg + xj[:, i:i + 1] * theta[:, i * LANES:(i + 1) * LANES]
            msg_ref[...] = msg

            # scatter-mean: accumulate into resident [Np,128] scratch, * 1/deg
            acc_ref[...] = jnp.zeros_like(acc_ref)

            def scatter_body(e, carry):
                d = dst_ref[e]
                acc_ref[pl.ds(d, 1), :] = (acc_ref[pl.ds(d, 1), :]
                                           + msg_ref[pl.ds(e, 1), :])
                return carry
            lax.fori_loop(0, n_edges, scatter_body, 0)

            # root weight + bias + trailing F.relu of CellNet.forward
            h_prev = h_ref[...]
            out = (acc_ref[...] * inv_deg
                   + jnp.dot(h_prev, root_r[...],
                             preferred_element_type=jnp.float32)
                   + bias_r[...])
            h_ref[...] = jnp.maximum(out, 0.0)

        layer(cins[0], emb1, wh1, bh1, wg1, bg1, root1, bias1)
        # TODO(synk): F.dropout is identity at inference time; not implemented.
        layer(cins[1], emb2, wh2, bh2, wg2, bg2, root2, bias2)
        layer(cins[2], emb3, wh3, bh3, wg3, bg3, root3, bias3)

        # ---- scatter_mean(h, gate*(batch+1))[1 : B+1] pooling ----
        h3 = h_ref[...]                                            # [Np, 128]
        pids = pool_ids_ref[...]                                   # [Np, 1] int32
        for b in range(1, n_graphs + 1):                           # static, B small
            m = (pids == b).astype(jnp.float32)                    # [Np, 1]
            seg = jnp.sum(m * h3, axis=0, keepdims=True)           # [1, 128]
            cnt = jnp.sum(m)
            out_ref[pl.ds(b - 1, 1), :] = seg / jnp.maximum(cnt, 1.0)

    return kernel


# --------------------------------------------------------------------------
# Weight repacking: lane-pad cout -> 128 so theta slices are 128-aligned.
# --------------------------------------------------------------------------
def _prep_conv(p, cin, cout):
    def pad_theta(w):                       # [rows, cin*cout] -> [rows, cin*128]
        rows = w.shape[0]
        w3 = w.reshape(rows, cin, cout)
        out = jnp.zeros((rows, cin, LANES), jnp.float32).at[:, :, :cout].set(w3)
        return out.reshape(rows, cin * LANES)

    emb = pad_theta(p["emb"])
    wh = pad_theta(p["wh"])
    bh = pad_theta(p["bh"])
    wg = pad_theta(p["wg"])
    bg = pad_theta(p["bg"])
    root = jnp.zeros((LANES, LANES), jnp.float32).at[:cin, :cout].set(p["root"])
    bias = jnp.zeros((1, LANES), jnp.float32).at[:, :cout].set(p["bias"])
    return [emb, wh, bh, wg, bg, root, bias]


# --------------------------------------------------------------------------
# Deterministic parameter init (shapes from CellNet.__init__)
# --------------------------------------------------------------------------
def _init_linear(key, fan_in, fan_out):
    kw, kb = jax.random.split(key)
    w = jax.random.normal(kw, (fan_in, fan_out), jnp.float32) / jnp.sqrt(float(fan_in))
    b = jax.random.normal(kb, (1, fan_out), jnp.float32) * 0.01
    return w, b


def _init_conv(key, cin, cout):
    ks = jax.random.split(key, 4)
    emb = jax.random.normal(ks[0], (N_EDGE_TYPES, cin * cout), jnp.float32) * 0.1
    wh, bh = _init_linear(ks[1], EDGE_FEATURES, cin * cout)
    wg, bg = _init_linear(ks[2], EDGE_FEATURES, cin * cout)
    kr, kb = jax.random.split(ks[3])
    root = jax.random.normal(kr, (cin, cout), jnp.float32) / jnp.sqrt(float(cin))
    bias = jax.random.normal(kb, (1, cout), jnp.float32) * 0.01
    return dict(emb=emb, wh=wh, bh=bh, wg=wg, bg=bg, root=root, bias=bias)


def init_cellnet_params(key, in_channels, out_channels):
    k1, k2, k3 = jax.random.split(key, 3)
    return {
        "conv1": _init_conv(k1, in_channels, 10),
        "conv2": _init_conv(k2, 10, 10),
        "conv3": _init_conv(k3, 10, out_channels),
    }


# --------------------------------------------------------------------------
# CellNet forward (inference)
# --------------------------------------------------------------------------
def cellnet_forward(params, x, edge_index, edge_attr, cell_type, batch, batch_size):
    n, cin = x.shape
    e = edge_index.shape[1]
    cout = params["conv3"]["root"].shape[1]
    n_pad = _round_up(max(n, 8), 8)
    e_pad = _round_up(max(e, 8), 8)

    x_pad = jnp.zeros((n_pad, LANES), jnp.float32).at[:n, :cin].set(
        x.astype(jnp.float32))
    src = edge_index[0].astype(jnp.int32)
    dst = edge_index[1].astype(jnp.int32)
    etype = jnp.zeros((e_pad, 1), jnp.int32).at[:e, 0].set(
        edge_attr[:, 0].astype(jnp.int32))
    efeat = jnp.zeros((e_pad, EDGE_FEATURES), jnp.float32).at[:e].set(
        edge_attr[:, 1:1 + EDGE_FEATURES].astype(jnp.float32))

    # target-node degree is identical for all 3 layers -> precompute 1/deg once
    deg = jnp.zeros((n_pad,), jnp.float32).at[dst].add(1.0)
    inv_deg = (1.0 / jnp.maximum(deg, 1.0)).reshape(n_pad, 1)

    gate = (cell_type == 1).astype(jnp.int32)
    pool_ids = jnp.zeros((n_pad, 1), jnp.int32).at[:n, 0].set(
        gate * (batch.astype(jnp.int32) + 1))        # pad rows -> segment 0 (dropped)

    weights = (_prep_conv(params["conv1"], cin, 10)
               + _prep_conv(params["conv2"], 10, 10)
               + _prep_conv(params["conv3"], 10, cout))

    kernel = _make_cellnet_kernel(e, (cin, 10, 10), batch_size)

    smem = pl.BlockSpec(memory_space=pltpu.MemorySpace.SMEM)
    vmem = pl.BlockSpec(memory_space=pltpu.MemorySpace.VMEM)
    n_inputs = 7 + len(weights)

    flops = int(3 * (2 * e_pad * N_EDGE_TYPES * 10 * LANES   # type-embedding matmuls
                     + 2 * n_pad * LANES * LANES             # root matmuls
                     + 2 * 10 * e_pad * LANES))              # per-edge vec-mat
    bytes_accessed = int(4 * (x_pad.size + etype.size + efeat.size + inv_deg.size
                              + pool_ids.size + src.size + dst.size
                              + sum(int(w.size) for w in weights)
                              + batch_size * LANES))

    pooled = pl.pallas_call(
        kernel,
        out_shape=jax.ShapeDtypeStruct((batch_size, LANES), jnp.float32),
        in_specs=[smem, smem] + [vmem] * (n_inputs - 2),
        out_specs=vmem,
        scratch_shapes=[
            pltpu.VMEM((n_pad, LANES), jnp.float32),   # h   (resident node feats)
            pltpu.VMEM((n_pad, LANES), jnp.float32),   # acc (scatter accumulator)
            pltpu.VMEM((e_pad, LANES), jnp.float32),   # xj  (gathered src feats)
            pltpu.VMEM((e_pad, LANES), jnp.float32),   # msg (per-edge messages)
        ],
        compiler_params=pltpu.CompilerParams(vmem_limit_bytes=32 * 1024 * 1024),
        cost_estimate=pl.CostEstimate(flops=flops, transcendentals=0,
                                      bytes_accessed=bytes_accessed),
    )(src, dst, x_pad, etype, efeat, inv_deg, pool_ids, *weights)

    return pooled[:, :cout]                           # drop lane padding


if __name__ == "__main__":
    key = jax.random.PRNGKey(0)
    N, E, B = 12, 20, 2          # nodes, edges, graphs in batch
    CIN, COUT = 4, 3             # node in-features, final out-features

    ks = jax.random.split(key, 6)
    x = jax.random.normal(ks[0], (N, CIN), jnp.float32)
    src = jax.random.randint(ks[1], (E,), 0, N)
    dst = jax.random.randint(ks[2], (E,), 0, N)
    edge_index = jnp.stack([src, dst], axis=0)
    etype = jax.random.randint(ks[3], (E,), 0, N_EDGE_TYPES).astype(jnp.float32)
    efeat = jax.random.normal(ks[4], (E, EDGE_FEATURES), jnp.float32)
    edge_attr = jnp.concatenate([etype[:, None], efeat], axis=1)   # [E, 1+F]
    cell_type = jax.random.randint(ks[5], (N,), 0, 3)
    batch = jnp.concatenate([jnp.zeros(N // 2, jnp.int32),
                             jnp.ones(N - N // 2, jnp.int32)])

    params = init_cellnet_params(jax.random.PRNGKey(42), CIN, COUT)

    out = cellnet_forward(params, x, edge_index, edge_attr, cell_type, batch, B)
    jax.block_until_ready(out)
    assert out.shape == (B, COUT)
    print("KERNEL_OK")
</pallas_src>

<mosaic_0001>
module attributes {stable_mosaic.version = 11 : i64} {
  func.func @kernel(%arg0: memref<20xi32, #tpu.memory_space<smem>>, %arg1: memref<20xi32, #tpu.memory_space<smem>>, %arg2: memref<16x128xf32, #tpu.memory_space<vmem>>, %arg3: memref<24x1xi32, #tpu.memory_space<vmem>>, %arg4: memref<24x2xf32, #tpu.memory_space<vmem>>, %arg5: memref<16x1xf32, #tpu.memory_space<vmem>>, %arg6: memref<16x1xi32, #tpu.memory_space<vmem>>, %arg7: memref<25x512xf32, #tpu.memory_space<vmem>>, %arg8: memref<2x512xf32, #tpu.memory_space<vmem>>, %arg9: memref<1x512xf32, #tpu.memory_space<vmem>>, %arg10: memref<2x512xf32, #tpu.memory_space<vmem>>, %arg11: memref<1x512xf32, #tpu.memory_space<vmem>>, %arg12: memref<128x128xf32, #tpu.memory_space<vmem>>, %arg13: memref<1x128xf32, #tpu.memory_space<vmem>>, %arg14: memref<25x1280xf32, #tpu.memory_space<vmem>>, %arg15: memref<2x1280xf32, #tpu.memory_space<vmem>>, %arg16: memref<1x1280xf32, #tpu.memory_space<vmem>>, %arg17: memref<2x1280xf32, #tpu.memory_space<vmem>>, %arg18: memref<1x1280xf32, #tpu.memory_space<vmem>>, %arg19: memref<128x128xf32, #tpu.memory_space<vmem>>, %arg20: memref<1x128xf32, #tpu.memory_space<vmem>>, %arg21: memref<25x1280xf32, #tpu.memory_space<vmem>>, %arg22: memref<2x1280xf32, #tpu.memory_space<vmem>>, %arg23: memref<1x1280xf32, #tpu.memory_space<vmem>>, %arg24: memref<2x1280xf32, #tpu.memory_space<vmem>>, %arg25: memref<1x1280xf32, #tpu.memory_space<vmem>>, %arg26: memref<128x128xf32, #tpu.memory_space<vmem>>, %arg27: memref<1x128xf32, #tpu.memory_space<vmem>>, %arg28: memref<2x128xf32, #tpu.memory_space<vmem>>, %arg29: memref<16x128xf32, #tpu.memory_space<vmem>>, %arg30: memref<16x128xf32, #tpu.memory_space<vmem>>, %arg31: memref<24x128xf32, #tpu.memory_space<vmem>>, %arg32: memref<24x128xf32, #tpu.memory_space<vmem>>) attributes {dimension_semantics = [], scalar_prefetch = 0 : i64, scratch_operands = 4 : i64, tpu.core_type = #tpu.core_type<tc>} {
    %c0 = arith.constant 0 : index
    %c0_0 = arith.constant 0 : index
    %0 = vector.load %arg3[%c0, %c0_0] : memref<24x1xi32, #tpu.memory_space<vmem>>, vector<24x1xi32>
    %1 = tpu.iota {dimensions = array<i32: 1>} : vector<1x25xi32>
    %2 = vector.broadcast %0 : vector<24x1xi32> to vector<24x25xi32>
    %3 = vector.broadcast %1 : vector<1x25xi32> to vector<24x25xi32>
    %4 = arith.cmpi eq, %2, %3 : vector<24x25xi32>
    %5 = arith.extui %4 : vector<24x25xi1> to vector<24x25xi32>
    %6 = arith.sitofp %5 : vector<24x25xi32> to vector<24x25xf32>
    %c0_1 = arith.constant 0 : index
    %c0_2 = arith.constant 0 : index
    %7 = vector.load %arg4[%c0_1, %c0_2] : memref<24x2xf32, #tpu.memory_space<vmem>>, vector<24x2xf32>
    %8 = vector.extract_strided_slice %7 {offsets = [0, 0], sizes = [24, 1], strides = [1, 1]} : vector<24x2xf32> to vector<24x1xf32>
    %9 = vector.extract_strided_slice %7 {offsets = [0, 1], sizes = [24, 1], strides = [1, 1]} : vector<24x2xf32> to vector<24x1xf32>
    %c0_3 = arith.constant 0 : index
    %c0_4 = arith.constant 0 : index
    %10 = vector.load %arg5[%c0_3, %c0_4] : memref<16x1xf32, #tpu.memory_space<vmem>>, vector<16x1xf32>
    %c0_5 = arith.constant 0 : index
    %c0_6 = arith.constant 0 : index
    %11 = vector.load %arg2[%c0_5, %c0_6] : memref<16x128xf32, #tpu.memory_space<vmem>>, vector<16x128xf32>
    %c0_7 = arith.constant 0 : index
    %c0_8 = arith.constant 0 : index
    %12 = vector.load %arg29[%c0_7, %c0_8] : memref<16x128xf32, #tpu.memory_space<vmem>>, vector<16x128xf32>
    tpu.vector_store %arg29[%c0_7, %c0_8], %11 {strides = array<i32>} : memref<16x128xf32, #tpu.memory_space<vmem>>, vector<16x128xf32>,
    %cst = arith.constant 0.000000e+00 : f32
    %13 = vector.broadcast %cst : f32 to vector<24x128xf32>
    %c0_9 = arith.constant 0 : index
    %c0_10 = arith.constant 0 : index
    %14 = vector.load %arg31[%c0_9, %c0_10] : memref<24x128xf32, #tpu.memory_space<vmem>>, vector<24x128xf32>
    tpu.vector_store %arg31[%c0_9, %c0_10], %13 {strides = array<i32>} : memref<24x128xf32, #tpu.memory_space<vmem>>, vector<24x128xf32>,
    %c0_11 = arith.constant 0 : index
    %c0_12 = arith.constant 0 : index
    %15 = vector.load %arg7[%c0_11, %c0_12] : memref<25x512xf32, #tpu.memory_space<vmem>>, vector<25x512xf32>
    %cst_13 = arith.constant dense<0.000000e+00> : vector<24x512xf32>
    %16 = tpu.matmul %6, %15, %cst_13 {dimension_numbers = #tpu.dot_dimension_numbers<[1], [0], [0], [1], [0, 0, 1, 1], [], []>} : vector<24x25xf32>, vector<25x512xf32>, vector<24x512xf32> -> vector<24x512xf32>
    %c0_14 = arith.constant 0 : index
    %c0_15 = arith.constant 0 : index
    %17 = vector.load %arg8[%c0_14, %c0_15] : memref<2x512xf32, #tpu.memory_space<vmem>>, vector<1x512xf32>
    %18 = vector.broadcast %8 : vector<24x1xf32> to vector<24x512xf32>
    %19 = vector.broadcast %17 : vector<1x512xf32> to vector<24x512xf32>
    %20 = arith.mulf %18, %19 : vector<24x512xf32>
    %c1 = arith.constant 1 : index
    %c0_16 = arith.constant 0 : index
    %21 = vector.load %arg8[%c1, %c0_16] : memref<2x512xf32, #tpu.memory_space<vmem>>, vector<1x512xf32>
    %22 = vector.broadcast %9 : vector<24x1xf32> to vector<24x512xf32>
    %23 = vector.broadcast %21 : vector<1x512xf32> to vector<24x512xf32>
    %24 = arith.mulf %22, %23 : vector<24x512xf32>
    %25 = arith.addf %20, %24 : vector<24x512xf32>
    %c0_17 = arith.constant 0 : index
    %c0_18 = arith.constant 0 : index
    %26 = vector.load %arg9[%c0_17, %c0_18] : memref<1x512xf32, #tpu.memory_space<vmem>>, vector<1x512xf32>
    %27 = vector.broadcast %26 : vector<1x512xf32> to vector<24x512xf32>
    %28 = arith.addf %25, %27 : vector<24x512xf32>
    %c0_19 = arith.constant 0 : index
    %c0_20 = arith.constant 0 : index
    %29 = vector.load %arg10[%c0_19, %c0_20] : memref<2x512xf32, #tpu.memory_space<vmem>>, vector<1x512xf32>
    %30 = vector.broadcast %8 : vector<24x1xf32> to vector<24x512xf32>
    %31 = vector.broadcast %29 : vector<1x512xf32> to vector<24x512xf32>
    %32 = arith.mulf %30, %31 : vector<24x512xf32>
    %c1_21 = arith.constant 1 : index
    %c0_22 = arith.constant 0 : index
    %33 = vector.load %arg10[%c1_21, %c0_22] : memref<2x512xf32, #tpu.memory_space<vmem>>, vector<1x512xf32>
    %34 = vector.broadcast %9 : vector<24x1xf32> to vector<24x512xf32>
    %35 = vector.broadcast %33 : vector<1x512xf32> to vector<24x512xf32>
    %36 = arith.mulf %34, %35 : vector<24x512xf32>
    %37 = arith.addf %32, %36 : vector<24x512xf32>
    %c0_23 = arith.constant 0 : index
    %c0_24 = arith.constant 0 : index
    %38 = vector.load %arg11[%c0_23, %c0_24] : memref<1x512xf32, #tpu.memory_space<vmem>>, vector<1x512xf32>
    %39 = vector.broadcast %38 : vector<1x512xf32> to vector<24x512xf32>
    %40 = arith.addf %37, %39 : vector<24x512xf32>
    %41 = arith.mulf %16, %28 : vector<24x512xf32>
    %42 = arith.addf %41, %40 : vector<24x512xf32>
    %cst_25 = arith.constant 0.000000e+00 : f32
    %43 = vector.broadcast %cst_25 : f32 to vector<24x512xf32>
    %44 = arith.maximumf %42, %43 : vector<24x512xf32>
    %c0_i32 = arith.constant 0 : i32
    %c20_i32 = arith.constant 20 : i32
    %45 = arith.addi %c0_i32, %c20_i32 : i32
    %c1_i32 = arith.constant 1 : i32
    scf.for %arg33 = %c0_i32 to %45 step %c1_i32  : i32 {
      %313 = arith.index_cast %arg33 : i32 to index
      %314 = memref.load %arg0[%313] : memref<20xi32, #tpu.memory_space<smem>>
      %315 = arith.index_cast %314 : i32 to index
      %c0_151 = arith.constant 0 : index
      %316 = vector.load %arg29[%315, %c0_151] : memref<16x128xf32, #tpu.memory_space<vmem>>, vector<1x128xf32>
      %317 = arith.index_cast %arg33 : i32 to index
      %c0_152 = arith.constant 0 : index
      %318 = vector.load %arg31[%317, %c0_152] : memref<24x128xf32, #tpu.memory_space<vmem>>, vector<1x128xf32>
      tpu.vector_store %arg31[%317, %c0_152], %316 {strides = array<i32>} : memref<24x128xf32, #tpu.memory_space<vmem>>, vector<1x128xf32>,
    }
    %c20_i32_26 = arith.constant 20 : i32
    %c0_27 = arith.constant 0 : index
    %c0_28 = arith.constant 0 : index
    %46 = vector.load %arg31[%c0_27, %c0_28] : memref<24x128xf32, #tpu.memory_space<vmem>>, vector<24x128xf32>
    %47 = vector.extract_strided_slice %46 {offsets = [0, 0], sizes = [24, 1], strides = [1, 1]} : vector<24x128xf32> to vector<24x1xf32>
    %48 = vector.extract_strided_slice %44 {offsets = [0, 0], sizes = [24, 128], strides = [1, 1]} : vector<24x512xf32> to vector<24x128xf32>
    %49 = vector.broadcast %47 : vector<24x1xf32> to vector<24x128xf32>
    %50 = arith.mulf %49, %48 : vector<24x128xf32>
    %51 = vector.extract_strided_slice %46 {offsets = [0, 1], sizes = [24, 1], strides = [1, 1]} : vector<24x128xf32> to vector<24x1xf32>
    %52 = vector.extract_strided_slice %44 {offsets = [0, 128], sizes = [24, 128], strides = [1, 1]} : vector<24x512xf32> to vector<24x128xf32>
    %53 = vector.broadcast %51 : vector<24x1xf32> to vector<24x128xf32>
    %54 = arith.mulf %53, %52 : vector<24x128xf32>
    %55 = arith.addf %50, %54 : vector<24x128xf32>
    %56 = vector.extract_strided_slice %46 {offsets = [0, 2], sizes = [24, 1], strides = [1, 1]} : vector<24x128xf32> to vector<24x1xf32>
    %57 = vector.extract_strided_slice %44 {offsets = [0, 256], sizes = [24, 128], strides = [1, 1]} : vector<24x512xf32> to vector<24x128xf32>
    %58 = vector.broadcast %56 : vector<24x1xf32> to vector<24x128xf32>
    %59 = arith.mulf %58, %57 : vector<24x128xf32>
    %60 = arith.addf %55, %59 : vector<24x128xf32>
    %61 = vector.extract_strided_slice %46 {offsets = [0, 3], sizes = [24, 1], strides = [1, 1]} : vector<24x128xf32> to vector<24x1xf32>
    %62 = vector.extract_strided_slice %44 {offsets = [0, 384], sizes = [24, 128], strides = [1, 1]} : vector<24x512xf32> to vector<24x128xf32>
    %63 = vector.broadcast %61 : vector<24x1xf32> to vector<24x128xf32>
    %64 = arith.mulf %63, %62 : vector<24x128xf32>
    %65 = arith.addf %60, %64 : vector<24x128xf32>
    %c0_29 = arith.constant 0 : index
    %c0_30 = arith.constant 0 : index
    %66 = vector.load %arg32[%c0_29, %c0_30] : memref<24x128xf32, #tpu.memory_space<vmem>>, vector<24x128xf32>
    tpu.vector_store %arg32[%c0_29, %c0_30], %65 {strides = array<i32>} : memref<24x128xf32, #tpu.memory_space<vmem>>, vector<24x128xf32>,
    %cst_31 = arith.constant 0.000000e+00 : f32
    %67 = vector.broadcast %cst_31 : f32 to vector<16x128xf32>
    %c0_32 = arith.constant 0 : index
    %c0_33 = arith.constant 0 : index
    %68 = vector.load %arg30[%c0_32, %c0_33] : memref<16x128xf32, #tpu.memory_space<vmem>>, vector<16x128xf32>
    tpu.vector_store %arg30[%c0_32, %c0_33], %67 {strides = array<i32>} : memref<16x128xf32, #tpu.memory_space<vmem>>, vector<16x128xf32>,
    %c0_i32_34 = arith.constant 0 : i32
    %c20_i32_35 = arith.constant 20 : i32
    %69 = arith.addi %c0_i32_34, %c20_i32_35 : i32
    %c1_i32_36 = arith.constant 1 : i32
    scf.for %arg33 = %c0_i32_34 to %69 step %c1_i32_36  : i32 {
      %313 = arith.index_cast %arg33 : i32 to index
      %314 = memref.load %arg1[%313] : memref<20xi32, #tpu.memory_space<smem>>
      %315 = arith.index_cast %314 : i32 to index
      %c0_151 = arith.constant 0 : index
      %316 = vector.load %arg30[%315, %c0_151] : memref<16x128xf32, #tpu.memory_space<vmem>>, vector<1x128xf32>
      %317 = arith.index_cast %arg33 : i32 to index
      %c0_152 = arith.constant 0 : index
      %318 = vector.load %arg32[%317, %c0_152] : memref<24x128xf32, #tpu.memory_space<vmem>>, vector<1x128xf32>
      %319 = arith.addf %316, %318 : vector<1x128xf32>
      %320 = arith.index_cast %314 : i32 to index
      %c0_153 = arith.constant 0 : index
      %321 = vector.load %arg30[%320, %c0_153] : memref<16x128xf32, #tpu.memory_space<vmem>>, vector<1x128xf32>
      tpu.vector_store %arg30[%320, %c0_153], %319 {strides = array<i32>} : memref<16x128xf32, #tpu.memory_space<vmem>>, vector<1x128xf32>,
    }
    %c20_i32_37 = arith.constant 20 : i32
    %c0_38 = arith.constant 0 : index
    %c0_39 = arith.constant 0 : index
    %70 = vector.load %arg29[%c0_38, %c0_39] : memref<16x128xf32, #tpu.memory_space<vmem>>, vector<16x128xf32>
    %c0_40 = arith.constant 0 : index
    %c0_41 = arith.constant 0 : index
    %71 = vector.load %arg30[%c0_40, %c0_41] : memref<16x128xf32, #tpu.memory_space<vmem>>, vector<16x128xf32>
    %72 = vector.broadcast %10 : vector<16x1xf32> to vector<16x128xf32>
    %73 = arith.mulf %71, %72 : vector<16x128xf32>
    %c0_42 = arith.constant 0 : index
    %c0_43 = arith.constant 0 : index
    %74 = vector.load %arg12[%c0_42, %c0_43] : memref<128x128xf32, #tpu.memory_space<vmem>>, vector<128x128xf32>
    %cst_44 = arith.constant dense<0.000000e+00> : vector<16x128xf32>
    %75 = tpu.matmul %70, %74, %cst_44 {dimension_numbers = #tpu.dot_dimension_numbers<[1], [0], [0], [1], [0, 0, 1, 1], [], []>} : vector<16x128xf32>, vector<128x128xf32>, vector<16x128xf32> -> vector<16x128xf32>
    %76 = arith.addf %73, %75 : vector<16x128xf32>
    %c0_45 = arith.constant 0 : index
    %c0_46 = arith.constant 0 : index
    %77 = vector.load %arg13[%c0_45, %c0_46] : memref<1x128xf32, #tpu.memory_space<vmem>>, vector<1x128xf32>
    %78 = vector.broadcast %77 : vector<1x128xf32> to vector<16x128xf32>
    %79 = arith.addf %76, %78 : vector<16x128xf32>
    %cst_47 = arith.constant 0.000000e+00 : f32
    %80 = vector.broadcast %cst_47 : f32 to vector<16x128xf32>
    %81 = arith.maximumf %79, %80 : vector<16x128xf32>
    %c0_48 = arith.constant 0 : index
    %c0_49 = arith.constant 0 : index
    %82 = vector.load %arg29[%c0_48, %c0_49] : memref<16x128xf32, #tpu.memory_space<vmem>>, vector<16x128xf32>
    tpu.vector_store %arg29[%c0_48, %c0_49], %81 {strides = array<i32>} : memref<16x128xf32, #tpu.memory_space<vmem>>, vector<16x128xf32>,
    %c0_50 = arith.constant 0 : index
    %c0_51 = arith.constant 0 : index
    %83 = vector.load %arg14[%c0_50, %c0_51] : memref<25x1280xf32, #tpu.memory_space<vmem>>, vector<25x1280xf32>
    %cst_52 = arith.constant dense<0.000000e+00> : vector<24x1280xf32>
    %84 = tpu.matmul %6, %83, %cst_52 {dimension_numbers = #tpu.dot_dimension_numbers<[1], [0], [0], [1], [0, 0, 1, 1], [], []>} : vector<24x25xf32>, vector<25x1280xf32>, vector<24x1280xf32> -> vector<24x1280xf32>
    %c0_53 = arith.constant 0 : index
    %c0_54 = arith.constant 0 : index
    %85 = vector.load %arg15[%c0_53, %c0_54] : memref<2x1280xf32, #tpu.memory_space<vmem>>, vector<1x1280xf32>
    %86 = vector.broadcast %8 : vector<24x1xf32> to vector<24x1280xf32>
    %87 = vector.broadcast %85 : vector<1x1280xf32> to vector<24x1280xf32>
    %88 = arith.mulf %86, %87 : vector<24x1280xf32>
    %c1_55 = arith.constant 1 : index
    %c0_56 = arith.constant 0 : index
    %89 = vector.load %arg15[%c1_55, %c0_56] : memref<2x1280xf32, #tpu.memory_space<vmem>>, vector<1x1280xf32>
    %90 = vector.broadcast %9 : vector<24x1xf32> to vector<24x1280xf32>
    %91 = vector.broadcast %89 : vector<1x1280xf32> to vector<24x1280xf32>
    %92 = arith.mulf %90, %91 : vector<24x1280xf32>
    %93 = arith.addf %88, %92 : vector<24x1280xf32>
    %c0_57 = arith.constant 0 : index
    %c0_58 = arith.constant 0 : index
    %94 = vector.load %arg16[%c0_57, %c0_58] : memref<1x1280xf32, #tpu.memory_space<vmem>>, vector<1x1280xf32>
    %95 = vector.broadcast %94 : vector<1x1280xf32> to vector<24x1280xf32>
    %96 = arith.addf %93, %95 : vector<24x1280xf32>
    %c0_59 = arith.constant 0 : index
    %c0_60 = arith.constant 0 : index
    %97 = vector.load %arg17[%c0_59, %c0_60] : memref<2x1280xf32, #tpu.memory_space<vmem>>, vector<1x1280xf32>
    %98 = vector.broadcast %8 : vector<24x1xf32> to vector<24x1280xf32>
    %99 = vector.broadcast %97 : vector<1x1280xf32> to vector<24x1280xf32>
    %100 = arith.mulf %98, %99 : vector<24x1280xf32>
    %c1_61 = arith.constant 1 : index
    %c0_62 = arith.constant 0 : index
    %101 = vector.load %arg17[%c1_61, %c0_62] : memref<2x1280xf32, #tpu.memory_space<vmem>>, vector<1x1280xf32>
    %102 = vector.broadcast %9 : vector<24x1xf32> to vector<24x1280xf32>
    %103 = vector.broadcast %101 : vector<1x1280xf32> to vector<24x1280xf32>
    %104 = arith.mulf %102, %103 : vector<24x1280xf32>
    %105 = arith.addf %100, %104 : vector<24x1280xf32>
    %c0_63 = arith.constant 0 : index
    %c0_64 = arith.constant 0 : index
    %106 = vector.load %arg18[%c0_63, %c0_64] : memref<1x1280xf32, #tpu.memory_space<vmem>>, vector<1x1280xf32>
    %107 = vector.broadcast %106 : vector<1x1280xf32> to vector<24x1280xf32>
    %108 = arith.addf %105, %107 : vector<24x1280xf32>
    %109 = arith.mulf %84, %96 : vector<24x1280xf32>
    %110 = arith.addf %109, %108 : vector<24x1280xf32>
    %cst_65 = arith.constant 0.000000e+00 : f32
    %111 = vector.broadcast %cst_65 : f32 to vector<24x1280xf32>
    %112 = arith.maximumf %110, %111 : vector<24x1280xf32>
    %c0_i32_66 = arith.constant 0 : i32
    %c20_i32_67 = arith.constant 20 : i32
    %113 = arith.addi %c0_i32_66, %c20_i32_67 : i32
    %c1_i32_68 = arith.constant 1 : i32
    scf.for %arg33 = %c0_i32_66 to %113 step %c1_i32_68  : i32 {
      %313 = arith.index_cast %arg33 : i32 to index
      %314 = memref.load %arg0[%313] : memref<20xi32, #tpu.memory_space<smem>>
      %315 = arith.index_cast %314 : i32 to index
      %c0_151 = arith.constant 0 : index
      %316 = vector.load %arg29[%315, %c0_151] : memref<16x128xf32, #tpu.memory_space<vmem>>, vector<1x128xf32>
      %317 = arith.index_cast %arg33 : i32 to index
      %c0_152 = arith.constant 0 : index
      %318 = vector.load %arg31[%317, %c0_152] : memref<24x128xf32, #tpu.memory_space<vmem>>, vector<1x128xf32>
      tpu.vector_store %arg31[%317, %c0_152], %316 {strides = array<i32>} : memref<24x128xf32, #tpu.memory_space<vmem>>, vector<1x128xf32>,
    }
    %c20_i32_69 = arith.constant 20 : i32
    %c0_70 = arith.constant 0 : index
    %c0_71 = arith.constant 0 : index
    %114 = vector.load %arg31[%c0_70, %c0_71] : memref<24x128xf32, #tpu.memory_space<vmem>>, vector<24x128xf32>
    %115 = vector.extract_strided_slice %114 {offsets = [0, 0], sizes = [24, 1], strides = [1, 1]} : vector<24x128xf32> to vector<24x1xf32>
    %116 = vector.extract_strided_slice %112 {offsets = [0, 0], sizes = [24, 128], strides = [1, 1]} : vector<24x1280xf32> to vector<24x128xf32>
    %117 = vector.broadcast %115 : vector<24x1xf32> to vector<24x128xf32>
    %118 = arith.mulf %117, %116 : vector<24x128xf32>
    %119 = vector.extract_strided_slice %114 {offsets = [0, 1], sizes = [24, 1], strides = [1, 1]} : vector<24x128xf32> to vector<24x1xf32>
    %120 = vector.extract_strided_slice %112 {offsets = [0, 128], sizes = [24, 128], strides = [1, 1]} : vector<24x1280xf32> to vector<24x128xf32>
    %121 = vector.broadcast %119 : vector<24x1xf32> to vector<24x128xf32>
    %122 = arith.mulf %121, %120 : vector<24x128xf32>
    %123 = arith.addf %118, %122 : vector<24x128xf32>
    %124 = vector.extract_strided_slice %114 {offsets = [0, 2], sizes = [24, 1], strides = [1, 1]} : vector<24x128xf32> to vector<24x1xf32>
    %125 = vector.extract_strided_slice %112 {offsets = [0, 256], sizes = [24, 128], strides = [1, 1]} : vector<24x1280xf32> to vector<24x128xf32>
    %126 = vector.broadcast %124 : vector<24x1xf32> to vector<24x128xf32>
    %127 = arith.mulf %126, %125 : vector<24x128xf32>
    %128 = arith.addf %123, %127 : vector<24x128xf32>
    %129 = vector.extract_strided_slice %114 {offsets = [0, 3], sizes = [24, 1], strides = [1, 1]} : vector<24x128xf32> to vector<24x1xf32>
    %130 = vector.extract_strided_slice %112 {offsets = [0, 384], sizes = [24, 128], strides = [1, 1]} : vector<24x1280xf32> to vector<24x128xf32>
    %131 = vector.broadcast %129 : vector<24x1xf32> to vector<24x128xf32>
    %132 = arith.mulf %131, %130 : vector<24x128xf32>
    %133 = arith.addf %128, %132 : vector<24x128xf32>
    %134 = vector.extract_strided_slice %114 {offsets = [0, 4], sizes = [24, 1], strides = [1, 1]} : vector<24x128xf32> to vector<24x1xf32>
    %135 = vector.extract_strided_slice %112 {offsets = [0, 512], sizes = [24, 128], strides = [1, 1]} : vector<24x1280xf32> to vector<24x128xf32>
    %136 = vector.broadcast %134 : vector<24x1xf32> to vector<24x128xf32>
    %137 = arith.mulf %136, %135 : vector<24x128xf32>
    %138 = arith.addf %133, %137 : vector<24x128xf32>
    %139 = vector.extract_strided_slice %114 {offsets = [0, 5], sizes = [24, 1], strides = [1, 1]} : vector<24x128xf32> to vector<24x1xf32>
    %140 = vector.extract_strided_slice %112 {offsets = [0, 640], sizes = [24, 128], strides = [1, 1]} : vector<24x1280xf32> to vector<24x128xf32>
    %141 = vector.broadcast %139 : vector<24x1xf32> to vector<24x128xf32>
    %142 = arith.mulf %141, %140 : vector<24x128xf32>
    %143 = arith.addf %138, %142 : vector<24x128xf32>
    %144 = vector.extract_strided_slice %114 {offsets = [0, 6], sizes = [24, 1], strides = [1, 1]} : vector<24x128xf32> to vector<24x1xf32>
    %145 = vector.extract_strided_slice %112 {offsets = [0, 768], sizes = [24, 128], strides = [1, 1]} : vector<24x1280xf32> to vector<24x128xf32>
    %146 = vector.broadcast %144 : vector<24x1xf32> to vector<24x128xf32>
    %147 = arith.mulf %146, %145 : vector<24x128xf32>
    %148 = arith.addf %143, %147 : vector<24x128xf32>
    %149 = vector.extract_strided_slice %114 {offsets = [0, 7], sizes = [24, 1], strides = [1, 1]} : vector<24x128xf32> to vector<24x1xf32>
    %150 = vector.extract_strided_slice %112 {offsets = [0, 896], sizes = [24, 128], strides = [1, 1]} : vector<24x1280xf32> to vector<24x128xf32>
    %151 = vector.broadcast %149 : vector<24x1xf32> to vector<24x128xf32>
    %152 = arith.mulf %151, %150 : vector<24x128xf32>
    %153 = arith.addf %148, %152 : vector<24x128xf32>
    %154 = vector.extract_strided_slice %114 {offsets = [0, 8], sizes = [24, 1], strides = [1, 1]} : vector<24x128xf32> to vector<24x1xf32>
    %155 = vector.extract_strided_slice %112 {offsets = [0, 1024], sizes = [24, 128], strides = [1, 1]} : vector<24x1280xf32> to vector<24x128xf32>
    %156 = vector.broadcast %154 : vector<24x1xf32> to vector<24x128xf32>
    %157 = arith.mulf %156, %155 : vector<24x128xf32>
    %158 = arith.addf %153, %157 : vector<24x128xf32>
    %159 = vector.extract_strided_slice %114 {offsets = [0, 9], sizes = [24, 1], strides = [1, 1]} : vector<24x128xf32> to vector<24x1xf32>
    %160 = vector.extract_strided_slice %112 {offsets = [0, 1152], sizes = [24, 128], strides = [1, 1]} : vector<24x1280xf32> to vector<24x128xf32>
    %161 = vector.broadcast %159 : vector<24x1xf32> to vector<24x128xf32>
    %162 = arith.mulf %161, %160 : vector<24x128xf32>
    %163 = arith.addf %158, %162 : vector<24x128xf32>
    %c0_72 = arith.constant 0 : index
    %c0_73 = arith.constant 0 : index
    %164 = vector.load %arg32[%c0_72, %c0_73] : memref<24x128xf32, #tpu.memory_space<vmem>>, vector<24x128xf32>
    tpu.vector_store %arg32[%c0_72, %c0_73], %163 {strides = array<i32>} : memref<24x128xf32, #tpu.memory_space<vmem>>, vector<24x128xf32>,
    %cst_74 = arith.constant 0.000000e+00 : f32
    %165 = vector.broadcast %cst_74 : f32 to vector<16x128xf32>
    %c0_75 = arith.constant 0 : index
    %c0_76 = arith.constant 0 : index
    %166 = vector.load %arg30[%c0_75, %c0_76] : memref<16x128xf32, #tpu.memory_space<vmem>>, vector<16x128xf32>
    tpu.vector_store %arg30[%c0_75, %c0_76], %165 {strides = array<i32>} : memref<16x128xf32, #tpu.memory_space<vmem>>, vector<16x128xf32>,
    %c0_i32_77 = arith.constant 0 : i32
    %c20_i32_78 = arith.constant 20 : i32
    %167 = arith.addi %c0_i32_77, %c20_i32_78 : i32
    %c1_i32_79 = arith.constant 1 : i32
    scf.for %arg33 = %c0_i32_77 to %167 step %c1_i32_79  : i32 {
      %313 = arith.index_cast %arg33 : i32 to index
      %314 = memref.load %arg1[%313] : memref<20xi32, #tpu.memory_space<smem>>
      %315 = arith.index_cast %314 : i32 to index
      %c0_151 = arith.constant 0 : index
      %316 = vector.load %arg30[%315, %c0_151] : memref<16x128xf32, #tpu.memory_space<vmem>>, vector<1x128xf32>
      %317 = arith.index_cast %arg33 : i32 to index
      %c0_152 = arith.constant 0 : index
      %318 = vector.load %arg32[%317, %c0_152] : memref<24x128xf32, #tpu.memory_space<vmem>>, vector<1x128xf32>
      %319 = arith.addf %316, %318 : vector<1x128xf32>
      %320 = arith.index_cast %314 : i32 to index
      %c0_153 = arith.constant 0 : index
      %321 = vector.load %arg30[%320, %c0_153] : memref<16x128xf32, #tpu.memory_space<vmem>>, vector<1x128xf32>
      tpu.vector_store %arg30[%320, %c0_153], %319 {strides = array<i32>} : memref<16x128xf32, #tpu.memory_space<vmem>>, vector<1x128xf32>,
    }
    %c20_i32_80 = arith.constant 20 : i32
    %c0_81 = arith.constant 0 : index
    %c0_82 = arith.constant 0 : index
    %168 = vector.load %arg29[%c0_81, %c0_82] : memref<16x128xf32, #tpu.memory_space<vmem>>, vector<16x128xf32>
    %c0_83 = arith.constant 0 : index
    %c0_84 = arith.constant 0 : index
    %169 = vector.load %arg30[%c0_83, %c0_84] : memref<16x128xf32, #tpu.memory_space<vmem>>, vector<16x128xf32>
    %170 = vector.broadcast %10 : vector<16x1xf32> to vector<16x128xf32>
    %171 = arith.mulf %169, %170 : vector<16x128xf32>
    %c0_85 = arith.constant 0 : index
    %c0_86 = arith.constant 0 : index
    %172 = vector.load %arg19[%c0_85, %c0_86] : memref<128x128xf32, #tpu.memory_space<vmem>>, vector<128x128xf32>
    %cst_87 = arith.constant dense<0.000000e+00> : vector<16x128xf32>
    %173 = tpu.matmul %168, %172, %cst_87 {dimension_numbers = #tpu.dot_dimension_numbers<[1], [0], [0], [1], [0, 0, 1, 1], [], []>} : vector<16x128xf32>, vector<128x128xf32>, vector<16x128xf32> -> vector<16x128xf32>
    %174 = arith.addf %171, %173 : vector<16x128xf32>
    %c0_88 = arith.constant 0 : index
    %c0_89 = arith.constant 0 : index
    %175 = vector.load %arg20[%c0_88, %c0_89] : memref<1x128xf32, #tpu.memory_space<vmem>>, vector<1x128xf32>
    %176 = vector.broadcast %175 : vector<1x128xf32> to vector<16x128xf32>
    %177 = arith.addf %174, %176 : vector<16x128xf32>
    %cst_90 = arith.constant 0.000000e+00 : f32
    %178 = vector.broadcast %cst_90 : f32 to vector<16x128xf32>
    %179 = arith.maximumf %177, %178 : vector<16x128xf32>
    %c0_91 = arith.constant 0 : index
    %c0_92 = arith.constant 0 : index
    %180 = vector.load %arg29[%c0_91, %c0_92] : memref<16x128xf32, #tpu.memory_space<vmem>>, vector<16x128xf32>
    tpu.vector_store %arg29[%c0_91, %c0_92], %179 {strides = array<i32>} : memref<16x128xf32, #tpu.memory_space<vmem>>, vector<16x128xf32>,
    %c0_93 = arith.constant 0 : index
    %c0_94 = arith.constant 0 : index
    %181 = vector.load %arg21[%c0_93, %c0_94] : memref<25x1280xf32, #tpu.memory_space<vmem>>, vector<25x1280xf32>
    %cst_95 = arith.constant dense<0.000000e+00> : vector<24x1280xf32>
    %182 = tpu.matmul %6, %181, %cst_95 {dimension_numbers = #tpu.dot_dimension_numbers<[1], [0], [0], [1], [0, 0, 1, 1], [], []>} : vector<24x25xf32>, vector<25x1280xf32>, vector<24x1280xf32> -> vector<24x1280xf32>
    %c0_96 = arith.constant 0 : index
    %c0_97 = arith.constant 0 : index
    %183 = vector.load %arg22[%c0_96, %c0_97] : memref<2x1280xf32, #tpu.memory_space<vmem>>, vector<1x1280xf32>
    %184 = vector.broadcast %8 : vector<24x1xf32> to vector<24x1280xf32>
    %185 = vector.broadcast %183 : vector<1x1280xf32> to vector<24x1280xf32>
    %186 = arith.mulf %184, %185 : vector<24x1280xf32>
    %c1_98 = arith.constant 1 : index
    %c0_99 = arith.constant 0 : index
    %187 = vector.load %arg22[%c1_98, %c0_99] : memref<2x1280xf32, #tpu.memory_space<vmem>>, vector<1x1280xf32>
    %188 = vector.broadcast %9 : vector<24x1xf32> to vector<24x1280xf32>
    %189 = vector.broadcast %187 : vector<1x1280xf32> to vector<24x1280xf32>
    %190 = arith.mulf %188, %189 : vector<24x1280xf32>
    %191 = arith.addf %186, %190 : vector<24x1280xf32>
    %c0_100 = arith.constant 0 : index
    %c0_101 = arith.constant 0 : index
    %192 = vector.load %arg23[%c0_100, %c0_101] : memref<1x1280xf32, #tpu.memory_space<vmem>>, vector<1x1280xf32>
    %193 = vector.broadcast %192 : vector<1x1280xf32> to vector<24x1280xf32>
    %194 = arith.addf %191, %193 : vector<24x1280xf32>
    %c0_102 = arith.constant 0 : index
    %c0_103 = arith.constant 0 : index
    %195 = vector.load %arg24[%c0_102, %c0_103] : memref<2x1280xf32, #tpu.memory_space<vmem>>, vector<1x1280xf32>
    %196 = vector.broadcast %8 : vector<24x1xf32> to vector<24x1280xf32>
    %197 = vector.broadcast %195 : vector<1x1280xf32> to vector<24x1280xf32>
    %198 = arith.mulf %196, %197 : vector<24x1280xf32>
    %c1_104 = arith.constant 1 : index
    %c0_105 = arith.constant 0 : index
    %199 = vector.load %arg24[%c1_104, %c0_105] : memref<2x1280xf32, #tpu.memory_space<vmem>>, vector<1x1280xf32>
    %200 = vector.broadcast %9 : vector<24x1xf32> to vector<24x1280xf32>
    %201 = vector.broadcast %199 : vector<1x1280xf32> to vector<24x1280xf32>
    %202 = arith.mulf %200, %201 : vector<24x1280xf32>
    %203 = arith.addf %198, %202 : vector<24x1280xf32>
    %c0_106 = arith.constant 0 : index
    %c0_107 = arith.constant 0 : index
    %204 = vector.load %arg25[%c0_106, %c0_107] : memref<1x1280xf32, #tpu.memory_space<vmem>>, vector<1x1280xf32>
    %205 = vector.broadcast %204 : vector<1x1280xf32> to vector<24x1280xf32>
    %206 = arith.addf %203, %205 : vector<24x1280xf32>
    %207 = arith.mulf %182, %194 : vector<24x1280xf32>
    %208 = arith.addf %207, %206 : vector<24x1280xf32>
    %cst_108 = arith.constant 0.000000e+00 : f32
    %209 = vector.broadcast %cst_108 : f32 to vector<24x1280xf32>
    %210 = arith.maximumf %208, %209 : vector<24x1280xf32>
    %c0_i32_109 = arith.constant 0 : i32
    %c20_i32_110 = arith.constant 20 : i32
    %211 = arith.addi %c0_i32_109, %c20_i32_110 : i32
    %c1_i32_111 = arith.constant 1 : i32
    scf.for %arg33 = %c0_i32_109 to %211 step %c1_i32_111  : i32 {
      %313 = arith.index_cast %arg33 : i32 to index
      %314 = memref.load %arg0[%313] : memref<20xi32, #tpu.memory_space<smem>>
      %315 = arith.index_cast %314 : i32 to index
      %c0_151 = arith.constant 0 : index
      %316 = vector.load %arg29[%315, %c0_151] : memref<16x128xf32, #tpu.memory_space<vmem>>, vector<1x128xf32>
      %317 = arith.index_cast %arg33 : i32 to index
      %c0_152 = arith.constant 0 : index
      %318 = vector.load %arg31[%317, %c0_152] : memref<24x128xf32, #tpu.memory_space<vmem>>, vector<1x128xf32>
      tpu.vector_store %arg31[%317, %c0_152], %316 {strides = array<i32>} : memref<24x128xf32, #tpu.memory_space<vmem>>, vector<1x128xf32>,
    }
    %c20_i32_112 = arith.constant 20 : i32
    %c0_113 = arith.constant 0 : index
    %c0_114 = arith.constant 0 : index
    %212 = vector.load %arg31[%c0_113, %c0_114] : memref<24x128xf32, #tpu.memory_space<vmem>>, vector<24x128xf32>
    %213 = vector.extract_strided_slice %212 {offsets = [0, 0], sizes = [24, 1], strides = [1, 1]} : vector<24x128xf32> to vector<24x1xf32>
    %214 = vector.extract_strided_slice %210 {offsets = [0, 0], sizes = [24, 128], strides = [1, 1]} : vector<24x1280xf32> to vector<24x128xf32>
    %215 = vector.broadcast %213 : vector<24x1xf32> to vector<24x128xf32>
    %216 = arith.mulf %215, %214 : vector<24x128xf32>
    %217 = vector.extract_strided_slice %212 {offsets = [0, 1], sizes = [24, 1], strides = [1, 1]} : vector<24x128xf32> to vector<24x1xf32>
    %218 = vector.extract_strided_slice %210 {offsets = [0, 128], sizes = [24, 128], strides = [1, 1]} : vector<24x1280xf32> to vector<24x128xf32>
    %219 = vector.broadcast %217 : vector<24x1xf32> to vector<24x128xf32>
    %220 = arith.mulf %219, %218 : vector<24x128xf32>
    %221 = arith.addf %216, %220 : vector<24x128xf32>
    %222 = vector.extract_strided_slice %212 {offsets = [0, 2], sizes = [24, 1], strides = [1, 1]} : vector<24x128xf32> to vector<24x1xf32>
    %223 = vector.extract_strided_slice %210 {offsets = [0, 256], sizes = [24, 128], strides = [1, 1]} : vector<24x1280xf32> to vector<24x128xf32>
    %224 = vector.broadcast %222 : vector<24x1xf32> to vector<24x128xf32>
    %225 = arith.mulf %224, %223 : vector<24x128xf32>
    %226 = arith.addf %221, %225 : vector<24x128xf32>
    %227 = vector.extract_strided_slice %212 {offsets = [0, 3], sizes = [24, 1], strides = [1, 1]} : vector<24x128xf32> to vector<24x1xf32>
    %228 = vector.extract_strided_slice %210 {offsets = [0, 384], sizes = [24, 128], strides = [1, 1]} : vector<24x1280xf32> to vector<24x128xf32>
    %229 = vector.broadcast %227 : vector<24x1xf32> to vector<24x128xf32>
    %230 = arith.mulf %229, %228 : vector<24x128xf32>
    %231 = arith.addf %226, %230 : vector<24x128xf32>
    %232 = vector.extract_strided_slice %212 {offsets = [0, 4], sizes = [24, 1], strides = [1, 1]} : vector<24x128xf32> to vector<24x1xf32>
    %233 = vector.extract_strided_slice %210 {offsets = [0, 512], sizes = [24, 128], strides = [1, 1]} : vector<24x1280xf32> to vector<24x128xf32>
    %234 = vector.broadcast %232 : vector<24x1xf32> to vector<24x128xf32>
    %235 = arith.mulf %234, %233 : vector<24x128xf32>
    %236 = arith.addf %231, %235 : vector<24x128xf32>
    %237 = vector.extract_strided_slice %212 {offsets = [0, 5], sizes = [24, 1], strides = [1, 1]} : vector<24x128xf32> to vector<24x1xf32>
    %238 = vector.extract_strided_slice %210 {offsets = [0, 640], sizes = [24, 128], strides = [1, 1]} : vector<24x1280xf32> to vector<24x128xf32>
    %239 = vector.broadcast %237 : vector<24x1xf32> to vector<24x128xf32>
    %240 = arith.mulf %239, %238 : vector<24x128xf32>
    %241 = arith.addf %236, %240 : vector<24x128xf32>
    %242 = vector.extract_strided_slice %212 {offsets = [0, 6], sizes = [24, 1], strides = [1, 1]} : vector<24x128xf32> to vector<24x1xf32>
    %243 = vector.extract_strided_slice %210 {offsets = [0, 768], sizes = [24, 128], strides = [1, 1]} : vector<24x1280xf32> to vector<24x128xf32>
    %244 = vector.broadcast %242 : vector<24x1xf32> to vector<24x128xf32>
    %245 = arith.mulf %244, %243 : vector<24x128xf32>
    %246 = arith.addf %241, %245 : vector<24x128xf32>
    %247 = vector.extract_strided_slice %212 {offsets = [0, 7], sizes = [24, 1], strides = [1, 1]} : vector<24x128xf32> to vector<24x1xf32>
    %248 = vector.extract_strided_slice %210 {offsets = [0, 896], sizes = [24, 128], strides = [1, 1]} : vector<24x1280xf32> to vector<24x128xf32>
    %249 = vector.broadcast %247 : vector<24x1xf32> to vector<24x128xf32>
    %250 = arith.mulf %249, %248 : vector<24x128xf32>
    %251 = arith.addf %246, %250 : vector<24x128xf32>
    %252 = vector.extract_strided_slice %212 {offsets = [0, 8], sizes = [24, 1], strides = [1, 1]} : vector<24x128xf32> to vector<24x1xf32>
    %253 = vector.extract_strided_slice %210 {offsets = [0, 1024], sizes = [24, 128], strides = [1, 1]} : vector<24x1280xf32> to vector<24x128xf32>
    %254 = vector.broadcast %252 : vector<24x1xf32> to vector<24x128xf32>
    %255 = arith.mulf %254, %253 : vector<24x128xf32>
    %256 = arith.addf %251, %255 : vector<24x128xf32>
    %257 = vector.extract_strided_slice %212 {offsets = [0, 9], sizes = [24, 1], strides = [1, 1]} : vector<24x128xf32> to vector<24x1xf32>
    %258 = vector.extract_strided_slice %210 {offsets = [0, 1152], sizes = [24, 128], strides = [1, 1]} : vector<24x1280xf32> to vector<24x128xf32>
    %259 = vector.broadcast %257 : vector<24x1xf32> to vector<24x128xf32>
    %260 = arith.mulf %259, %258 : vector<24x128xf32>
    %261 = arith.addf %256, %260 : vector<24x128xf32>
    %c0_115 = arith.constant 0 : index
    %c0_116 = arith.constant 0 : index
    %262 = vector.load %arg32[%c0_115, %c0_116] : memref<24x128xf32, #tpu.memory_space<vmem>>, vector<24x128xf32>
    tpu.vector_store %arg32[%c0_115, %c0_116], %261 {strides = array<i32>} : memref<24x128xf32, #tpu.memory_space<vmem>>, vector<24x128xf32>,
    %cst_117 = arith.constant 0.000000e+00 : f32
    %263 = vector.broadcast %cst_117 : f32 to vector<16x128xf32>
    %c0_118 = arith.constant 0 : index
    %c0_119 = arith.constant 0 : index
    %264 = vector.load %arg30[%c0_118, %c0_119] : memref<16x128xf32, #tpu.memory_space<vmem>>, vector<16x128xf32>
    tpu.vector_store %arg30[%c0_118, %c0_119], %263 {strides = array<i32>} : memref<16x128xf32, #tpu.memory_space<vmem>>, vector<16x128xf32>,
    %c0_i32_120 = arith.constant 0 : i32
    %c20_i32_121 = arith.constant 20 : i32
    %265 = arith.addi %c0_i32_120, %c20_i32_121 : i32
    %c1_i32_122 = arith.constant 1 : i32
    scf.for %arg33 = %c0_i32_120 to %265 step %c1_i32_122  : i32 {
      %313 = arith.index_cast %arg33 : i32 to index
      %314 = memref.load %arg1[%313] : memref<20xi32, #tpu.memory_space<smem>>
      %315 = arith.index_cast %314 : i32 to index
      %c0_151 = arith.constant 0 : index
      %316 = vector.load %arg30[%315, %c0_151] : memref<16x128xf32, #tpu.memory_space<vmem>>, vector<1x128xf32>
      %317 = arith.index_cast %arg33 : i32 to index
      %c0_152 = arith.constant 0 : index
      %318 = vector.load %arg32[%317, %c0_152] : memref<24x128xf32, #tpu.memory_space<vmem>>, vector<1x128xf32>
      %319 = arith.addf %316, %318 : vector<1x128xf32>
      %320 = arith.index_cast %314 : i32 to index
      %c0_153 = arith.constant 0 : index
      %321 = vector.load %arg30[%320, %c0_153] : memref<16x128xf32, #tpu.memory_space<vmem>>, vector<1x128xf32>
      tpu.vector_store %arg30[%320, %c0_153], %319 {strides = array<i32>} : memref<16x128xf32, #tpu.memory_space<vmem>>, vector<1x128xf32>,
    }
    %c20_i32_123 = arith.constant 20 : i32
    %c0_124 = arith.constant 0 : index
    %c0_125 = arith.constant 0 : index
    %266 = vector.load %arg29[%c0_124, %c0_125] : memref<16x128xf32, #tpu.memory_space<vmem>>, vector<16x128xf32>
    %c0_126 = arith.constant 0 : index
    %c0_127 = arith.constant 0 : index
    %267 = vector.load %arg30[%c0_126, %c0_127] : memref<16x128xf32, #tpu.memory_space<vmem>>, vector<16x128xf32>
    %268 = vector.broadcast %10 : vector<16x1xf32> to vector<16x128xf32>
    %269 = arith.mulf %267, %268 : vector<16x128xf32>
    %c0_128 = arith.constant 0 : index
    %c0_129 = arith.constant 0 : index
    %270 = vector.load %arg26[%c0_128, %c0_129] : memref<128x128xf32, #tpu.memory_space<vmem>>, vector<128x128xf32>
    %cst_130 = arith.constant dense<0.000000e+00> : vector<16x128xf32>
    %271 = tpu.matmul %266, %270, %cst_130 {dimension_numbers = #tpu.dot_dimension_numbers<[1], [0], [0], [1], [0, 0, 1, 1], [], []>} : vector<16x128xf32>, vector<128x128xf32>, vector<16x128xf32> -> vector<16x128xf32>
    %272 = arith.addf %269, %271 : vector<16x128xf32>
    %c0_131 = arith.constant 0 : index
    %c0_132 = arith.constant 0 : index
    %273 = vector.load %arg27[%c0_131, %c0_132] : memref<1x128xf32, #tpu.memory_space<vmem>>, vector<1x128xf32>
    %274 = vector.broadcast %273 : vector<1x128xf32> to vector<16x128xf32>
    %275 = arith.addf %272, %274 : vector<16x128xf32>
    %cst_133 = arith.constant 0.000000e+00 : f32
    %276 = vector.broadcast %cst_133 : f32 to vector<16x128xf32>
    %277 = arith.maximumf %275, %276 : vector<16x128xf32>
    %c0_134 = arith.constant 0 : index
    %c0_135 = arith.constant 0 : index
    %278 = vector.load %arg29[%c0_134, %c0_135] : memref<16x128xf32, #tpu.memory_space<vmem>>, vector<16x128xf32>
    tpu.vector_store %arg29[%c0_134, %c0_135], %277 {strides = array<i32>} : memref<16x128xf32, #tpu.memory_space<vmem>>, vector<16x128xf32>,
    %c0_136 = arith.constant 0 : index
    %c0_137 = arith.constant 0 : index
    %279 = vector.load %arg29[%c0_136, %c0_137] : memref<16x128xf32, #tpu.memory_space<vmem>>, vector<16x128xf32>
    %c0_138 = arith.constant 0 : index
    %c0_139 = arith.constant 0 : index
    %280 = vector.load %arg6[%c0_138, %c0_139] : memref<16x1xi32, #tpu.memory_space<vmem>>, vector<16x1xi32>
    %c1_i32_140 = arith.constant 1 : i32
    %281 = vector.broadcast %c1_i32_140 : i32 to vector<16x1xi32>
    %282 = arith.cmpi eq, %280, %281 : vector<16x1xi32>
    %283 = arith.extui %282 : vector<16x1xi1> to vector<16x1xi32>
    %284 = arith.sitofp %283 : vector<16x1xi32> to vector<16x1xf32>
    %285 = vector.broadcast %284 : vector<16x1xf32> to vector<16x128xf32>
    %286 = arith.mulf %285, %279 : vector<16x128xf32>
    %cst_141 = arith.constant dense<0.000000e+00> : vector<128xf32>
    %287 = vector.multi_reduction <add>, %286, %cst_141 [0] : vector<16x128xf32> to vector<128xf32>
    %288 = vector.shape_cast %287 : vector<128xf32> to vector<1x128xf32>
    %289 = vector.shape_cast %284 : vector<16x1xf32> to vector<1x16x1xf32>
    %cst_142 = arith.constant dense<0.000000e+00> : vector<1xf32>
    %290 = vector.multi_reduction <add>, %289, %cst_142 [1, 2] : vector<1x16x1xf32> to vector<1xf32>
    %291 = vector.shape_cast %290 : vector<1xf32> to vector<1x1x1xf32>
    %292 = vector.extract %291[0, 0, 0] : f32 from vector<1x1x1xf32>
    %cst_143 = arith.constant 1.000000e+00 : f32
    %293 = arith.maximumf %292, %cst_143 : f32
    %294 = vector.broadcast %293 : f32 to vector<1x128xf32>
    %295 = arith.divf %288, %294 : vector<1x128xf32>
    %c0_144 = arith.constant 0 : index
    %c0_145 = arith.constant 0 : index
    %296 = vector.load %arg28[%c0_144, %c0_145] : memref<2x128xf32, #tpu.memory_space<vmem>>, vector<1x128xf32>
    tpu.vector_store %arg28[%c0_144, %c0_145], %295 {strides = array<i32>} : memref<2x128xf32, #tpu.memory_space<vmem>>, vector<1x128xf32>,
    %c2_i32 = arith.constant 2 : i32
    %297 = vector.broadcast %c2_i32 : i32 to vector<16x1xi32>
    %298 = arith.cmpi eq, %280, %297 : vector<16x1xi32>
    %299 = arith.extui %298 : vector<16x1xi1> to vector<16x1xi32>
    %300 = arith.sitofp %299 : vector<16x1xi32> to vector<16x1xf32>
    %301 = vector.broadcast %300 : vector<16x1xf32> to vector<16x128xf32>
    %302 = arith.mulf %301, %279 : vector<16x128xf32>
    %cst_146 = arith.constant dense<0.000000e+00> : vector<128xf32>
    %303 = vector.multi_reduction <add>, %302, %cst_146 [0] : vector<16x128xf32> to vector<128xf32>
    %304 = vector.shape_cast %303 : vector<128xf32> to vector<1x128xf32>
    %305 = vector.shape_cast %300 : vector<16x1xf32> to vector<1x16x1xf32>
    %cst_147 = arith.constant dense<0.000000e+00> : vector<1xf32>
    %306 = vector.multi_reduction <add>, %305, %cst_147 [1, 2] : vector<1x16x1xf32> to vector<1xf32>
    %307 = vector.shape_cast %306 : vector<1xf32> to vector<1x1x1xf32>
    %308 = vector.extract %307[0, 0, 0] : f32 from vector<1x1x1xf32>
    %cst_148 = arith.constant 1.000000e+00 : f32
    %309 = arith.maximumf %308, %cst_148 : f32
    %310 = vector.broadcast %309 : f32 to vector<1x128xf32>
    %311 = arith.divf %304, %310 : vector<1x128xf32>
    %c1_149 = arith.constant 1 : index
    %c0_150 = arith.constant 0 : index
    %312 = vector.load %arg28[%c1_149, %c0_150] : memref<2x128xf32, #tpu.memory_space<vmem>>, vector<1x128xf32>
    tpu.vector_store %arg28[%c1_149, %c0_150], %311 {strides = array<i32>} : memref<2x128xf32, #tpu.memory_space<vmem>>, vector<1x128xf32>,
    return
  }
}

</mosaic_0001>

<bundles_post_ra>
// kernel: tpu_custom_call.1
= control target key start
LH: loop header
LB: loop body
LE: loop exit
PB: predicated region body
PF: predicated region fallthrough
CT: control target
= control target key end

     0   :  { %s6134_s0 = inlined_call_operand.hbm [shape: s32[20], index: 0, kind: input, shape index: {}]   ;;  %s6135_s1 = inlined_call_operand.hbm [shape: s32[20], index: 1, kind: input, shape index: {}]   ;;  %s6136_s2 = inlined_call_operand.hbm [shape: f32[16,128], index: 2, kind: input, shape index: {}]   ;;  %s6137_s3 = inlined_call_operand.vmem [shape: s32[24,1], index: 3, kind: input, shape index: {}]   ;;  %s6138_s4 = inlined_call_operand.vmem [shape: f32[24,2], index: 4, kind: input, shape index: {}]   ;;  %s6139_s5 = inlined_call_operand.vmem [shape: f32[16,1], index: 5, kind: input, shape index: {}]   ;;  %s6140_s6 = inlined_call_operand.vmem [shape: s32[16,1], index: 6, kind: input, shape index: {}]   ;;  %s6141_s7 = inlined_call_operand.hbm [shape: f32[25,512], index: 7, kind: input, shape index: {}]   ;;  %s6142_s8 = inlined_call_operand.hbm [shape: f32[2,512], index: 8, kind: input, shape index: {}]   ;;  %s6143_s9 = inlined_call_operand.hbm [shape: f32[1,512], index: 9, kind: input, shape index: {}]   ;;  %s6144_s10 = inlined_call_operand.hbm [shape: f32[2,512], index: 10, kind: input, shape index: {}]   ;;  %s6145_s11 = inlined_call_operand.hbm [shape: f32[1,512], index: 11, kind: input, shape index: {}]   ;;  %s6146_s12 = inlined_call_operand.hbm [shape: f32[128,128], index: 12, kind: input, shape index: {}]   ;;  %s6147_s13 = inlined_call_operand.hbm [shape: f32[1,128], index: 13, kind: input, shape index: {}]   ;;  %s6148_s14 = inlined_call_operand.hbm [shape: f32[25,1280], index: 14, kind: input, shape index: {}]   ;;  %s6149_s15 = inlined_call_operand.vmem [shape: f32[2,1280], index: 15, kind: input, shape index: {}]   ;;  %s6150_s16 = inlined_call_operand.vmem [shape: f32[1,1280], index: 16, kind: input, shape index: {}]   ;;  %s6151_s17 = inlined_call_operand.vmem [shape: f32[2,1280], index: 17, kind: input, shape index: {}]   ;;  %s6152_s18 = inlined_call_operand.vmem [shape: f32[1,1280], index: 18, kind: input, shape index: {}]   ;;  %s6153_s19 = inlined_call_operand.hbm [shape: f32[128,128], index: 19, kind: input, shape index: {}]   ;;  %s6154_s20 = inlined_call_operand.vmem [shape: f32[1,128], index: 20, kind: input, shape index: {}]   ;;  %s6155_s21 = inlined_call_operand.hbm [shape: f32[25,1280], index: 21, kind: input, shape index: {}]   ;;  %s6156_s22 = inlined_call_operand.vmem [shape: f32[2,1280], index: 22, kind: input, shape index: {}]   ;;  %s6157_s23 = inlined_call_operand.hbm [shape: f32[1,1280], index: 23, kind: input, shape index: {}]   ;;  %s6158_s24 = inlined_call_operand.vmem [shape: f32[2,1280], index: 24, kind: input, shape index: {}]   ;;  %s6159_s25 = inlined_call_operand.hbm [shape: f32[1,1280], index: 25, kind: input, shape index: {}]   ;;  %s6160_s26 = inlined_call_operand.hbm [shape: f32[128,128], index: 26, kind: input, shape index: {}]   ;;  %s6161_s27 = inlined_call_operand.vmem [shape: f32[1,128], index: 27, kind: input, shape index: {}]   ;;  %s6162_s28 = inlined_call_operand.hbm [shape: f32[2,128], index: 28, kind: output, shape index: {}]  }
   0x1   :  { %6241 = sst [smem:[#allocation62_spill]] %s6134_s0 }
   0x2   :  { %6242 = sst [smem:[#allocation63_spill]] %s6135_s1 }
   0x3   :  { %6243 = sst [smem:[#allocation64_spill]] %s6136_s2 }
   0x4   :  { %6244 = sst [smem:[#allocation65_spill]] %s6137_s3 }
   0x5   :  { %6245 = sst [smem:[#allocation66_spill]] %s6138_s4 }
   0x6   :  { %6246 = sst [smem:[#allocation67_spill]] %s6139_s5 }
   0x7   :  { %6247 = sst [smem:[#allocation68_spill]] %s6140_s6 }
   0x8   :  { %6248 = sst [smem:[#allocation69_spill]] %s6141_s7 }
   0x9   :  { %6249 = sst [smem:[#allocation70_spill]] %s6142_s8 }
   0xa   :  { %6250 = sst [smem:[#allocation71_spill]] %s6143_s9 }
   0xb   :  { %6251 = sst [smem:[#allocation72_spill]] %s6144_s10 }
   0xc   :  { %6252 = sst [smem:[#allocation73_spill]] %s6145_s11 }
   0xd   :  { %6253 = sst [smem:[#allocation74_spill]] %s6146_s12 }
   0xe   :  { %6254 = sst [smem:[#allocation75_spill]] %s6154_s20 }
   0xf   :  { %6255 = sst [smem:[#allocation76_spill]] %s6161_s27 }
  0x10   :  { %6256 = sst [smem:[#allocation77_spill]] %s6162_s28 }
  0x11   :  { %33 = vsyncpa [#allocation9], 0 }
  0x12   :  { %34 = vsyncpa [#allocation11], 0 }
  0x13   :  { %35 = vsyncpa [#allocation7], 0 }
  0x14   :  { %36 = vsyncpa [#allocation14], 0 }
  0x15   :  { %37 = vsyncpa [#allocation17], 0 }
  0x16   :  { %38 = vsyncpa [#allocation20], 0 }
  0x17   :  { %39 = vsyncpa [#allocation23], 0 }
  0x18   :  { %40 = vsyncpa [#allocation26], 0 }
  0x19   :  { %41 = vsyncpa [#allocation29], 0 }
  0x1a   :  { %42 = vsyncpa [#allocation32], 0  ;;  %s6257_s9 = sld [smem:[#allocation69_spill]] }
  0x20   :  { %s87_s30 = sshll.u32 %s6257_s9, 4  ;;  %s88_s30 = int_to_ptr.hbm [resolvable:$true] %s87_s30 }
  0x21   :  { %43 = vsyncpa [#allocation8], 0  ;;  %s3990_s3 = smov [#allocation13]   ;;  %s6258_s11 = sld [smem:[#allocation71_spill]] }
  0x22   :  { %s89_s6 = sshll.u32 %s3990_s3, 4  ;;  %s3991_s2 = smov 512   ;;  %s90_s6 = int_to_ptr.vmem [resolvable:$true] %s89_s6 }
  0x23   :  { %s3992_s7 = smov 32   ;;  %s3993_s12 = smov [#allocation16]  }
  0x24   :  { %95 = dma.hbm_to_vmem [thread:$0]  %s88_s30, 2048, %s90_s6, [#allocation14], %s3991_s2, %s3991_s2, %s3992_s7  }
  0x25   :  { %s114_s1 = sshll.u32 %s3993_s12, 4  ;;  %s6259_s27 = sld [smem:[#allocation73_spill]]  ;;  %s115_s1 = int_to_ptr.vmem [resolvable:$true] %s114_s1 }
  0x26   :  { %s158_s3 = sshll.u32 %s6147_s13, 4  ;;  %s3994_s20 = smov [#allocation19]   ;;  %s159_s3 = int_to_ptr.hbm [resolvable:$true] %s158_s3 }
  0x27   :  { %s112_s29 = sshll.u32 %s6258_s11, 4  ;;  %s136_s10 = sshll.u32 %s3994_s20, 4  ;;  %s113_s29 = int_to_ptr.hbm [resolvable:$true] %s112_s29  ;;  %s137_s10 = int_to_ptr.vmem [resolvable:$true] %s136_s10 }
  0x28   :  { %117 = dma.hbm_to_vmem [thread:$0]  %s113_s29, 64, %s115_s1, [#allocation17]  }
  0x29   :  { %s3995_s30 = smov [#allocation22]   ;;  %s3996_s28 = smov [#allocation25]  }
  0x2a   :  { %s160_s6 = sshll.u32 %s3995_s30, 4  ;;  %s191_s29 = sshll.u32 %s3996_s28, 4  ;;  %s161_s6 = int_to_ptr.vmem [resolvable:$true] %s160_s6  ;;  %s192_s29 = int_to_ptr.vmem [resolvable:$true] %s191_s29 }
  0x2b   :  { %s134_s8 = sshll.u32 %s6259_s27, 4  ;;  %s189_s27 = sshll.u32 %s6153_s19, 4  ;;  %s135_s8 = int_to_ptr.hbm [resolvable:$true] %s134_s8  ;;  %s190_s27 = int_to_ptr.hbm [resolvable:$true] %s189_s27 }
  0x2c   :  { %139 = dma.hbm_to_vmem [thread:$0]  %s135_s8, 64, %s137_s10, [#allocation20]  }
  0x2d   :  { %163 = dma.hbm_to_vmem [thread:$0]  %s159_s3, 16, %s161_s6, [#allocation23]  }
  0x2e   :  { %s220_s13 = sshll.u32 %s6157_s23, 4  ;;  %s3997_s20 = smov 128   ;;  %s221_s13 = int_to_ptr.hbm [resolvable:$true] %s220_s13 }
  0x2f   :  { %s3998_s12 = smov 8   ;;  %s3999_s1 = smov [#allocation28]  }
  0x30   :  { %197 = dma.hbm_to_vmem [thread:$0]  %s190_s27, 2048, %s192_s29, [#allocation26], %s3997_s20, %s3997_s20, %s3998_s12  }
  0x31   :  { %s222_s4 = sshll.u32 %s3999_s1, 4  ;;  %s6260_s19 = sld [smem:[#allocation62_spill]]  ;;  %s223_s4 = int_to_ptr.vmem [resolvable:$true] %s222_s4 }
  0x32   :  { %225 = dma.hbm_to_vmem [thread:$0]  %s221_s13, 160, %s223_s4, [#allocation29]  }
  0x33   :  { %s6261_s30 = sld [smem:[#allocation63_spill]]  ;;  %s4000_s6 = smov [#allocation6]  }
  0x34   :  { %s4001_s0 = smov [#allocation10]   ;;  %s6262_s28 = sld [smem:[#allocation64_spill]] }
  0x35   :  { %s4002_s2 = smov [#allocation12]   ;;  %s6263_s13 = sld [smem:[#allocation70_spill]] }
  0x36   :  { %s68_s7 = sshll.u32 %s4002_s2, 4  ;;  %s4003_s5 = smov [#allocation15]   ;;  %s69_s7 = int_to_ptr.vmem [resolvable:$true] %s68_s7 }
  0x37   :  { %s49_s9 = sshll.u32 %s6260_s19, 4  ;;  %s103_s19 = sshll.u32 %s4003_s5, 4  ;;  %s50_s9 = int_to_ptr.hbm [resolvable:$true] %s49_s9  ;;  %s104_s19 = int_to_ptr.vmem [resolvable:$true] %s103_s19 }
  0x38   :  { %52 = dma.hbm_to_smem %s50_s9, 16, %s4000_s6, [#allocation9]  }
  0x39   :  { %s58_s23 = sshll.u32 %s6261_s30, 4  ;;  %s6264_s10 = sld [smem:[#allocation72_spill]]  ;;  %s59_s23 = int_to_ptr.hbm [resolvable:$true] %s58_s23 }
  0x3a   :  { %61 = dma.hbm_to_smem %s59_s23, 16, %s4001_s0, [#allocation11]  }
  0x3b   :  { %s66_s29 = sshll.u32 %s6262_s28, 4  ;;  %s101_s4 = sshll.u32 %s6263_s13, 4  ;;  %s67_s29 = int_to_ptr.hbm [resolvable:$true] %s66_s29  ;;  %s102_s4 = int_to_ptr.hbm [resolvable:$true] %s101_s4 }
  0x3c   :  { %74 = dma.hbm_to_vmem [thread:$0]  %s67_s29, 256, %s69_s7, [#allocation7], %s3997_s20, %s3997_s20, %s3998_s12  }
  0x3d   :  { %106 = dma.hbm_to_vmem [thread:$0]  %s102_s4, 128, %s104_s19, [#allocation14]  }
  0x3e   :  { %s6265_s0 = sld [smem:[#allocation74_spill]]  ;;  %s4004_s27 = smov [#allocation18]  }
  0x3f   :  { %s123_s30 = sshll.u32 %s6264_s10, 4  ;;  %s125_s28 = sshll.u32 %s4004_s27, 4  ;;  %s124_s30 = int_to_ptr.hbm [resolvable:$true] %s123_s30  ;;  %s126_s28 = int_to_ptr.vmem [resolvable:$true] %s125_s28 }
  0x40   :  { %128 = dma.hbm_to_vmem [thread:$0]  %s124_s30, 128, %s126_s28, [#allocation17]  }
  0x41   :  { %s4005_s29 = smov [#allocation21]   ;;  %s168_s8 = sshll.u32 %s6148_s14, 4  ;;  %s169_s8 = int_to_ptr.hbm [resolvable:$true] %s168_s8 }
  0x42   :  { %s146_s2 = sshll.u32 %s4005_s29, 4  ;;  %s4006_s13 = smov [#allocation24]   ;;  %s147_s2 = int_to_ptr.vmem [resolvable:$true] %s146_s2 }
  0x43   :  { %s170_s4 = sshll.u32 %s4006_s13, 4  ;;  %s204_s9 = sshll.u32 %s6155_s21, 4  ;;  %s171_s4 = int_to_ptr.vmem [resolvable:$true] %s170_s4  ;;  %s205_s9 = int_to_ptr.hbm [resolvable:$true] %s204_s9 }
  0x44   :  { %s144_s11 = sshll.u32 %s6265_s0, 4  ;;  %s4007_s3 = smov 1280   ;;  %s145_s11 = int_to_ptr.hbm [resolvable:$true] %s144_s11 }
  0x45   :  { %152 = dma.hbm_to_vmem [thread:$0]  %s145_s11, 2048, %s147_s2, [#allocation20], %s3997_s20, %s3997_s20, %s3998_s12  }
  0x46   :  { %s4008_s10 = smov 80   ;;  %s4009_s30 = smov [#allocation27]  }
  0x47   :  { %176 = dma.hbm_to_vmem [thread:$0]  %s169_s8, 5120, %s171_s4, [#allocation23], %s4007_s3, %s4007_s3, %s4008_s10  }
  0x48   :  { %s206_s23 = sshll.u32 %s4009_s30, 4  ;;  %s233_s0 = sshll.u32 %s6159_s25, 4  ;;  %s207_s23 = int_to_ptr.vmem [resolvable:$true] %s206_s23  ;;  %s234_s0 = int_to_ptr.hbm [resolvable:$true] %s233_s0 }
  0x49   :  { %212 = dma.hbm_to_vmem [thread:$0]  %s205_s9, 5120, %s207_s23, [#allocation26], %s4007_s3, %s4007_s3, %s4008_s10  }
  0x4a   :  { %s243_s28 = sshll.u32 %s6160_s26, 4  ;;  %s4010_s29 = smov [#allocation30]   ;;  %s244_s28 = int_to_ptr.hbm [resolvable:$true] %s243_s28 }
  0x4b   :  { %s235_s2 = sshll.u32 %s4010_s29, 4  ;;  %s4011_s21 = smov [#allocation31]   ;;  %s236_s2 = int_to_ptr.vmem [resolvable:$true] %s235_s2 }
  0x4c   :  { %238 = dma.hbm_to_vmem [thread:$0]  %s234_s0, 160, %s236_s2, [#allocation29]  }
  0x4d   :  { %s245_s7 = sshll.u32 %s4011_s21, 4  ;;  %s246_s7 = int_to_ptr.vmem [resolvable:$true] %s245_s7 }
  0x4e   :  { %251 = dma.hbm_to_vmem [thread:$0]  %s244_s28, 2048, %s246_s7, [#allocation32], %s3997_s20, %s3997_s20, %s3998_s12  }
  0x4f   :  { %3944 = dma.done.wait [#allocation9], 16  }
  0x50   :  { %3945 = vsyncadd [#allocation9], 4294967280 }
  0x51   :  { %3946 = dma.done.wait [#allocation11], 16  }
  0x52   :  { %3947 = vsyncadd [#allocation11], 4294967280 }
  0x53   :  { %3948 = dma.done.wait [#allocation7], 256  }
  0x54   :  { %3949 = vsyncadd [#allocation7], 4294967040 }
  0x55   :  { %3950 = dma.done.wait [#allocation14], 2176  }
  0x56   :  { %3951 = vsyncadd [#allocation14], 4294965120 }
  0x57   :  { %3952 = dma.done.wait [#allocation17], 192  }
  0x58   :  { %3953 = vsyncadd [#allocation17], 4294967104 }
  0x59   :  { %3954 = dma.done.wait [#allocation20], 2112  }
  0x5a   :  { %3955 = vsyncadd [#allocation20], 4294965184 }
  0x5b   :  { %3956 = dma.done.wait [#allocation23], 5136  }
  0x5c   :  { %3957 = vsyncadd [#allocation23], 4294962160 }
  0x5d   :  { %3958 = dma.done.wait [#allocation26], 7168  }
  0x5e   :  { %3959 = vsyncadd [#allocation26], 4294960128 }
  0x5f   :  { %3960 = dma.done.wait [#allocation29], 320  }
  0x60   :  { %3961 = vsyncadd [#allocation29], 4294966976 }
  0x61   :  { %3962 = dma.done.wait [#allocation32], 2048  }
  0x62   :  { %3963 = vsyncadd [#allocation32], 4294965248 }
  0x63   :  { %318 = sfence }
  0x64   :  { %s6266_s20 = sld [smem:[#allocation65_spill]]  ;;  %vm380_vm0 = vcmask 1040384   ;;  %v6176_v2 = vmov 0   ;;  %v347_v5 = vld [vmem:[#allocation12] sm:$0xff]  ;;  %v348_v6 = vld [vmem:[#allocation12 + $0x8] sm:$0xff]  ;;  %v6171_v8 = vmov 0.0   ;;  %v322_v29 = vlaneseq }
  0x65   :  { %3448 = vset.pattern.permute.xlu0 %v6176_v2  ;;  %3449 = vset.pattern.permute.xlu1 %v6176_v2  ;;  %s6267_s4 = sld [smem:[#allocation67_spill]]  ;;  %v366_v7 = vld [vmem:[#allocation13 + $0x60] sm:$0x1]  ;;  %351 = vst [vmem:[#allocation4] sm:$0xff] %v6171_v8  ;;  %v367_v9 = vld [vmem:[#allocation13 + $0x68] sm:$0x1] }
  0x66   :  { %349 = vst [vmem:[#allocation2] sm:$0xff] %v347_v5  ;;  %3233 = vmatpush.msk.msra.mxu0 %vm380_vm0, %v366_v7  ;;  %v368_v10 = vld [vmem:[#allocation13 + $0x70] sm:$0x1]  ;;  %v362_v11 = vld [vmem:[#allocation13 + $0x40] sm:$0xff]  ;;  %3450 = vset.pattern.permute.xlu2 %v6176_v2  ;;  %v369_v12 = vld [vmem:[#allocation13 + $0x78] sm:$0x1] }
  0x67   :  { %350 = vst [vmem:[#allocation2 + $0x8] sm:$0xff] %v348_v6  ;;  %3237 = vmatpush.msk.msra.mxu1 %vm380_vm0, %v367_v9  ;;  %3241 = vmatpush.msk.msra.mxu2 %vm380_vm0, %v368_v10  ;;  %v363_v13 = vld [vmem:[#allocation13 + $0x48] sm:$0xff]  ;;  %v364_v14 = vld [vmem:[#allocation13 + $0x50] sm:$0xff]  ;;  %v365_v15 = vld [vmem:[#allocation13 + $0x58] sm:$0xff]  ;;  %s6268_s23 = sld [smem:[#allocation66_spill]]  ;;  %v6167_v22 = vmov 1  }
  0x68   :  { %3245 = vmatpush.msk.msra.mxu3 %vm380_vm0, %v369_v12  ;;  %406 = vmatpush.msra.mxu0 %v362_v11  ;;  %v358_v16 = vld [vmem:[#allocation13 + $0x20] sm:$0xff]  ;;  %v359_v17 = vld [vmem:[#allocation13 + $0x28] sm:$0xff]  ;;  %352 = vst [vmem:[#allocation4 + $0x8] sm:$0xff] %v6171_v8  ;;  %v360_v18 = vld [vmem:[#allocation13 + $0x30] sm:$0xff]  ;;  %v323_v30 = vand.u32 127, %v322_v29  ;;  %vm370_vm1 = vcmask 203776  }
  0x69   :  { %432 = vmatpush.msra.mxu1 %v363_v13  ;;  %458 = vmatpush.msra.mxu2 %v364_v14  ;;  %v361_v19 = vld [vmem:[#allocation13 + $0x38] sm:$0xff]  ;;  %353 = vst [vmem:[#allocation4 + $0x10] sm:$0xff] %v6171_v8  ;;  %v354_v23 = vld [vmem:[#allocation13] sm:$0xff]  ;;  %v355_v24 = vld [vmem:[#allocation13 + $0x8] sm:$0xff]  ;;  %s3966_s27 = smov 0  }
  0x6a   :  { %v319_v0 = vld [vmem:[%s6266_s20] sm:$0xff]  ;;  %v321_v1 = vld [vmem:[%s6266_s20 + $0x10] sm:$0xff]  ;;  %v320_v20 = vld [vmem:[%s6266_s20 + $0x8] sm:$0xff]  ;;  %484 = vmatpush.msra.mxu3 %v365_v15  ;;  %407 = vmatpush.msra.mxu0 %v358_v16 }
  0x6b   :  { %v4241_v3 = vld [vmem:[%s6267_s4] sm:$0xff]  ;;  %v4246_v4 = vld [vmem:[%s6267_s4 + $0x8] sm:$0xff]  ;;  %325 = vperm.xlu0 %3448, %v319_v0   ;;  %331 = vperm.xlu1 %3449, %v321_v1   ;;  %v356_v25 = vld [vmem:[#allocation13 + $0x10] sm:$0xff] }
  0x6c   :  { %433 = vmatpush.msra.mxu1 %v359_v17  ;;  %459 = vmatpush.msra.mxu2 %v360_v18  ;;  %v357_v26 = vld [vmem:[#allocation13 + $0x18] sm:$0xff]  ;;  %v497_v37 = vld [vmem:[#allocation15] ss:$2 sm:$0xf]  ;;  %v581_v47 = vld [vmem:[#allocation16] sm:$0xf] }
  0x6d   :  { %v342_v21 = vld [vmem:[%s6268_s23] sm:$0xff]  ;;  %485 = vmatpush.msra.mxu3 %v361_v19  ;;  %408 = vmatpush.msra.mxu0 %v354_v23  ;;  %v343_v27 = vld [vmem:[%s6268_s23 + $0x8] sm:$0xff]  ;;  %v344_v28 = vld [vmem:[%s6268_s23 + $0x10] sm:$0xff]  ;;  %v4306_v42 = vperm.slane %v497_v37, 0  ;;  %v4312_v45 = vperm.slane %v497_v37, 1  ;;  %v4324_v53 = vperm.slane %v497_v37, 2 }
  0x6e   :  { %434 = vmatpush.msra.mxu1 %v355_v24  ;;  %460 = vmatpush.msra.mxu2 %v356_v25  ;;  %v535_v38 = vld [vmem:[#allocation15 + $0x1] ss:$2 sm:$0xf]  ;;  %v603_v39 = vld [vmem:[#allocation18] ss:$2 sm:$0xf] }
  0x6f   :  { %486 = vmatpush.msra.mxu3 %v357_v26  ;;  %505 = vperm.xlu2 %3450, %v343_v27   ;;  %v626_v40 = vld [vmem:[#allocation18 + $0x1] ss:$2 sm:$0xf]  ;;  %v4308_v43 = vperm.slane %v535_v38, 0  ;;  %v4310_v44 = vperm.slane %v603_v39, 0  ;;  %v4316_v49 = vperm.slane %v535_v38, 1 }
  0x70   :  { %v660_v48 = vld [vmem:[#allocation19] sm:$0xf]  ;;  %v4318_v50 = vperm.slane %v603_v39, 1  ;;  %v4320_v51 = vperm.slane %v626_v40, 0  ;;  %v4322_v52 = vperm.slane %v626_v40, 1  ;;  %v4326_v54 = vperm.slane %v535_v38, 2 }
  0x71   :  { %v4330_v56 = vperm.slane %v603_v39, 2  ;;  %v4332_v57 = vperm.slane %v626_v40, 2  ;;  %v4334_v58 = vperm.slane %v497_v37, 3  ;;  %v4336_v59 = vperm.slane %v535_v38, 3 }
  0x72   :  { %v4338_v60 = vperm.slane %v581_v47, 0  ;;  %v4340_v61 = vperm.slane %v660_v48, 0  ;;  %v4342_v62 = vperm.slane %v603_v39, 3  ;;  %v4344_v63 = vperm.slane %v626_v40, 3 }
  0x73   :  { %328 = vperm.xlu0 %3448, %v320_v20   ;;  %500 = vperm.xlu1 %3449, %v342_v21   ;;  %v4370_v16 = vperm.slane %v581_v47, 1  ;;  %v4372_v17 = vperm.slane %v660_v48, 1  ;;  %v4374_v18 = vperm.slane %v581_v47, 2  ;;  %v4376_v19 = vperm.slane %v660_v48, 2 }
  0x74   :  { %v4382_v23 = vperm.slane %v581_v47, 3  ;;  %v4386_v25 = vperm.slane %v660_v48, 3 }
  0x77   :  { %510 = vperm.xlu2 %3450, %v344_v28  }
  0x7b   :  { %3451 = vset.pattern.permute.xlu0 %v6167_v22  ;;  %3452 = vset.pattern.permute.xlu1 %v6167_v22 }
  0x7c   :  { %537 = vperm.xlu0 %3451, %v342_v21   ;;  %541 = vperm.xlu1 %3452, %v343_v27  }
  0x7f   :  { %3453 = vset.pattern.permute.xlu2 %v6167_v22 }
  0x80   :  { %545 = vperm.xlu2 %3453, %v344_v28  }
  0xc9   :  { %v4304_v41 = vpop.permute.xlu2 %505 }
  0xca   :  { %v526_v38 = vmul.f32 %v4306_v42, %v4304_v41  ;;  %v617_v40 = vmul.f32 %v4310_v44, %v4304_v41  ;;  %v527_v48 = vmul.f32 %v4312_v45, %v4304_v41 }
  0xd1   :  { %v4388_v26 = vpop.permute.xlu2 %510 }
  0xdd   :  { %v326_v31 = vpop.permute.xlu0 %325  ;;  %v332_v35 = vpop.permute.xlu1 %331 }
  0xde   :  { %vm333_vm2 = vcmp.eq.s32.totalorder %v326_v31, %v323_v30  ;;  %vm335_vm4 = vcmp.eq.s32.totalorder %v332_v35, %v323_v30 }
  0xdf   :  { %v4272_v32 = vsel %vm333_vm2, 1.0, %v6171_v8  ;;  %v4294_v36 = vsel %vm335_vm4, 1.0, %v6171_v8 }
  0xe0   :  { %6269 = vst [vmem:[#allocation45_spill] sm:$0xff] %v4272_v32  ;;  %3234 = vmatmul.msk.f32.vlgmr.msra.gmra.mxu0 %vm370_vm1, %v4272_v32  ;;  %3238 = vmatmul.msk.f32.vlgmr.msra.gmra.mxu1 %vm370_vm1, %v4272_v32 }
  0xe1   :  { %3242 = vmatmul.msk.f32.vlgmr.msra.gmra.mxu2 %vm370_vm1, %v4272_v32  ;;  %3246 = vmatmul.msk.f32.vlgmr.msra.gmra.mxu3 %vm370_vm1, %v4272_v32  ;;  %6271 = vst [vmem:[#allocation47_spill] sm:$0xff] %v4294_v36 }
  0xe5   :  { %v329_v33 = vpop.permute.xlu0 %328  ;;  %v4314_v46 = vpop.permute.xlu1 %500 }
  0xe6   :  { %vm334_vm3 = vcmp.eq.s32.totalorder %v329_v33, %v323_v30  ;;  %6272 = vst [vmem:[#allocation48_spill] sm:$0xff] %v4314_v46  ;;  %v522_v0 = vmul.f32 %v4306_v42, %v4314_v46  ;;  %v613_v1 = vmul.f32 %v4310_v44, %v4314_v46  ;;  %v523_v5 = vmul.f32 %v4312_v45, %v4314_v46 }
  0xe7   :  { %v4283_v34 = vsel %vm334_vm3, 1.0, %v6171_v8  ;;  %v614_v6 = vmul.f32 %v4318_v50, %v4314_v46  ;;  %v524_v11 = vmul.f32 %v4324_v53, %v4314_v46  ;;  %v615_v14 = vmul.f32 %v4330_v56, %v4314_v46 }
  0xe8   :  { %6270 = vst [vmem:[#allocation46_spill] sm:$0xff] %v4283_v34  ;;  %3235 = vmatmul.msk.f32.gmra.mxu0 %vm370_vm1, %v4283_v34  ;;  %3239 = vmatmul.msk.f32.gmra.mxu1 %vm370_vm1, %v4283_v34  ;;  %v525_v21 = vmul.f32 %v4334_v58, %v4314_v46  ;;  %v616_v24 = vmul.f32 %v4342_v62, %v4314_v46 }
  0xe9   :  { %3243 = vmatmul.msk.f32.gmra.mxu2 %vm370_vm1, %v4283_v34  ;;  %3247 = vmatmul.msk.f32.gmra.mxu3 %vm370_vm1, %v4283_v34 }
  0xee   :  { %v4328_v55 = vpop.permute.xlu0 %537  ;;  %v4378_v20 = vpop.permute.xlu1 %541 }
  0xef   :  { %6273 = vst [vmem:[#allocation49_spill] sm:$0xff] %v4328_v55  ;;  %v557_v7 = vmul.f32 %v4308_v43, %v4328_v55  ;;  %v636_v9 = vmul.f32 %v4320_v51, %v4328_v55  ;;  %v558_v10 = vmul.f32 %v4316_v49, %v4328_v55  ;;  %v637_v12 = vmul.f32 %v4322_v52, %v4328_v55 }
  0xf0   :  { %3236 = vmatmul.msk.f32.gmra.mxu0 %vm370_vm1, %v4294_v36  ;;  %3240 = vmatmul.msk.f32.gmra.mxu1 %vm370_vm1, %v4294_v36  ;;  %v559_v13 = vmul.f32 %v4326_v54, %v4328_v55  ;;  %v638_v15 = vmul.f32 %v4332_v57, %v4328_v55  ;;  %6274 = vst [vmem:[#allocation50_spill] sm:$0xff] %v4378_v20 }
  0xf1   :  { %3244 = vmatmul.msk.f32.gmra.mxu2 %vm370_vm1, %v4294_v36  ;;  %3248 = vmatmul.msk.f32.gmra.mxu3 %vm370_vm1, %v4294_v36  ;;  %v569_v27 = vadd.f32 %v557_v7, %v522_v0  ;;  %v648_v28 = vadd.f32 %v636_v9, %v613_v1  ;;  %v570_v29 = vadd.f32 %v558_v10, %v523_v5 }
  0xf2   :  { %v560_v30 = vmul.f32 %v4336_v59, %v4328_v55  ;;  %v649_v31 = vadd.f32 %v637_v12, %v614_v6  ;;  %v571_v33 = vadd.f32 %v559_v13, %v524_v11  ;;  %v650_v35 = vadd.f32 %v638_v15, %v615_v14 }
  0xf3   :  { %v639_v37 = vmul.f32 %v4344_v63, %v4328_v55  ;;  %v561_v39 = vmul.f32 %v4308_v43, %v4378_v20  ;;  %v640_v47 = vmul.f32 %v4320_v51, %v4378_v20  ;;  %v562_v0 = vmul.f32 %v4316_v49, %v4378_v20 }
  0xf4   :  { %v618_v1 = vmul.f32 %v4318_v50, %v4304_v41  ;;  %v641_v5 = vmul.f32 %v4322_v52, %v4378_v20  ;;  %v591_v6 = vadd.f32 %v4338_v60, %v569_v27  ;;  %v670_v7 = vadd.f32 %v4340_v61, %v648_v28 }
  0xf5   :  { %v592_v9 = vadd.f32 %v4370_v16, %v570_v29  ;;  %v572_v10 = vadd.f32 %v560_v30, %v525_v21  ;;  %v671_v11 = vadd.f32 %v4372_v17, %v649_v31  ;;  %v593_v12 = vadd.f32 %v4374_v18, %v571_v33 }
  0xf6   :  { %v672_v13 = vadd.f32 %v4376_v19, %v650_v35  ;;  %v651_v14 = vadd.f32 %v639_v37, %v616_v24  ;;  %v573_v8 = vadd.f32 %v561_v39, %v526_v38  ;;  %v652_v2 = vadd.f32 %v640_v47, %v617_v40  ;;  %v4434_v40 = vpop.permute.xlu2 %545 }
  0xf7   :  { %v528_v55 = vmul.f32 %v4324_v53, %v4304_v41  ;;  %v563_v27 = vmul.f32 %v4326_v54, %v4378_v20  ;;  %v574_v21 = vadd.f32 %v562_v0, %v527_v48  ;;  %v653_v30 = vadd.f32 %v641_v5, %v618_v1 }
  0xf8   :  { %v619_v31 = vmul.f32 %v4330_v56, %v4304_v41  ;;  %v642_v24 = vmul.f32 %v4332_v57, %v4378_v20  ;;  %v529_v33 = vmul.f32 %v4334_v58, %v4304_v41  ;;  %v564_v35 = vmul.f32 %v4336_v59, %v4378_v20 }
  0xf9   :  { %v673_v39 = vadd.f32 %v4386_v25, %v651_v14  ;;  %v595_v47 = vadd.f32 %v4338_v60, %v573_v8  ;;  %v674_v48 = vadd.f32 %v4340_v61, %v652_v2  ;;  %v620_v0 = vmul.f32 %v4342_v62, %v4304_v41 }
  0xfa   :  { %v643_v1 = vmul.f32 %v4344_v63, %v4378_v20  ;;  %v576_v14 = vadd.f32 %v564_v35, %v529_v33  ;;  %v530_v2 = vmul.f32 %v4306_v42, %v4388_v26  ;;  %v531_v5 = vmul.f32 %v4312_v45, %v4388_v26 }
  0xfb   :  { %v644_v42 = vmul.f32 %v4320_v51, %v4434_v40 }
 0x15d   :  { %v410_v15 = vpop.f32.mrf.mxu0  ;;  %v436_v22 = vpop.f32.mrf.mxu1 }
 0x15e   :  { %v682_v28 = vmul.f32 %v591_v6, %v410_v15  ;;  %v683_v29 = vmul.f32 %v592_v9, %v436_v22  ;;  %v594_v22 = vadd.f32 %v4382_v23, %v572_v10  ;;  %v575_v9 = vadd.f32 %v563_v27, %v528_v55 }
 0x15f   :  { %v675_v10 = vadd.f32 %v4372_v17, %v653_v30  ;;  %v566_v55 = vmul.f32 %v4316_v49, %v4434_v40 }
 0x160   :  { %v4428_v37 = vadd.f32 %v682_v28, %v670_v7  ;;  %v4430_v38 = vadd.f32 %v683_v29, %v671_v11  ;;  %v596_v7 = vadd.f32 %v4370_v16, %v574_v21  ;;  %v654_v11 = vadd.f32 %v642_v24, %v619_v31 }
 0x161   :  { %v565_v28 = vmul.f32 %v4308_v43, %v4434_v40  ;;  %v621_v29 = vmul.f32 %v4310_v44, %v4388_v26  ;;  %v655_v24 = vadd.f32 %v643_v1, %v620_v0  ;;  %v622_v43 = vmul.f32 %v4318_v50, %v4388_v26 }
 0x162   :  { %v645_v44 = vmul.f32 %v4322_v52, %v4434_v40  ;;  %v597_v49 = vadd.f32 %v4374_v18, %v575_v9  ;;  %v598_v52 = vadd.f32 %v4382_v23, %v576_v14  ;;  %v568_v14 = vmul.f32 %v4336_v59, %v4434_v40 }
 0x163   :  { %v577_v51 = vadd.f32 %v565_v28, %v530_v2  ;;  %v656_v9 = vadd.f32 %v644_v42, %v621_v29  ;;  %v623_v29 = vmul.f32 %v4330_v56, %v4388_v26  ;;  %v647_v59 = vmul.f32 %v4344_v63, %v4434_v40 }
 0x164   :  { %v462_v8 = vpop.f32.mrf.mxu2  ;;  %v488_v15 = vpop.f32.mrf.mxu3 }
 0x165   :  { %v684_v27 = vmul.f32 %v593_v12, %v462_v8  ;;  %v685_v21 = vmul.f32 %v594_v22, %v488_v15  ;;  %v413_v30 = vpop.f32.mrf.mxu0  ;;  %v439_v31 = vpop.f32.mrf.mxu1  ;;  %v676_v12 = vadd.f32 %v4376_v19, %v654_v11  ;;  %v657_v11 = vadd.f32 %v645_v44, %v622_v43 }
 0x166   :  { %v686_v33 = vmul.f32 %v595_v47, %v413_v30  ;;  %v687_v35 = vmul.f32 %v596_v7, %v439_v31  ;;  %v578_v47 = vadd.f32 %v566_v55, %v531_v5  ;;  %v567_v5 = vmul.f32 %v4326_v54, %v4434_v40 }
 0x167   :  { %v4462_v45 = vadd.f32 %v684_v27, %v672_v13  ;;  %v4464_v6 = vadd.f32 %v685_v21, %v673_v39  ;;  %v677_v13 = vadd.f32 %v4386_v25, %v655_v24  ;;  %v599_v15 = vadd.f32 %v4338_v60, %v577_v51 }
 0x168   :  { %v4468_v22 = vadd.f32 %v686_v33, %v674_v48  ;;  %v4470_v0 = vadd.f32 %v687_v35, %v675_v10  ;;  %v532_v48 = vmul.f32 %v4324_v53, %v4388_v26  ;;  %v533_v10 = vmul.f32 %v4334_v58, %v4388_v26 }
 0x169   :  { %v708_v1 = vmax.f32 %v4462_v45, 0.0  ;;  %v709_v50 = vmax.f32 %v4464_v6, 0.0  ;;  %v600_v28 = vadd.f32 %v4370_v16, %v578_v47  ;;  %v646_v53 = vmul.f32 %v4332_v57, %v4434_v40 }
 0x16a   :  { %v710_v39 = vmax.f32 %v4468_v22, 0.0  ;;  %v711_v7 = vmax.f32 %v4470_v0, 0.0  ;;  %v624_v58 = vmul.f32 %v4342_v62, %v4388_v26  ;;  %v678_v60 = vadd.f32 %v4340_v61, %v656_v9 }
 0x16b   :  { %v679_v16 = vadd.f32 %v4372_v17, %v657_v11  ;;  %v579_v57 = vadd.f32 %v567_v5, %v532_v48  ;;  %v580_v42 = vadd.f32 %v568_v14, %v533_v10  ;;  %v658_v43 = vadd.f32 %v646_v53, %v623_v29 }
 0x16c   :  { %v465_v2 = vpop.f32.mrf.mxu2  ;;  %v491_v8 = vpop.f32.mrf.mxu3  ;;  %v659_v61 = vadd.f32 %v647_v59, %v624_v58 }
 0x16d   :  { %v688_v55 = vmul.f32 %v597_v49, %v465_v2  ;;  %v689_v54 = vmul.f32 %v598_v52, %v491_v8  ;;  %v416_v27 = vpop.f32.mrf.mxu0  ;;  %v442_v21 = vpop.f32.mrf.mxu1  ;;  %v601_v49 = vadd.f32 %v4374_v18, %v579_v57  ;;  %v680_v52 = vadd.f32 %v4376_v19, %v658_v43 }
 0x16e   :  { %v690_v30 = vmul.f32 %v599_v15, %v416_v27  ;;  %v691_v31 = vmul.f32 %v600_v28, %v442_v21  ;;  %v681_v9 = vadd.f32 %v4386_v25, %v659_v61 }
 0x16f   :  { %v4498_v56 = vadd.f32 %v688_v55, %v676_v12  ;;  %v4500_v24 = vadd.f32 %v689_v54, %v677_v13  ;;  %v602_v12 = vadd.f32 %v4382_v23, %v580_v42 }
 0x170   :  { %v4502_v33 = vadd.f32 %v690_v30, %v678_v60  ;;  %v4504_v35 = vadd.f32 %v691_v31, %v679_v16 }
 0x171   :  { %v712_v62 = vmax.f32 %v4498_v56, 0.0  ;;  %v713_v63 = vmax.f32 %v4500_v24, 0.0 }
 0x172   :  { %v714_v44 = vmax.f32 %v4502_v33, 0.0  ;;  %v715_v17 = vmax.f32 %v4504_v35, 0.0 }
 0x174   :  { %v468_v51 = vpop.f32.mrf.mxu2  ;;  %v494_v47 = vpop.f32.mrf.mxu3 }
 0x175   :  { %v692_v13 = vmul.f32 %v601_v49, %v468_v51  ;;  %v693_v11 = vmul.f32 %v602_v12, %v494_v47 }
 0x177   :  { %v4514_v48 = vadd.f32 %v692_v13, %v680_v52  ;;  %v4516_v5 = vadd.f32 %v693_v11, %v681_v9 }
 0x179   :  { %v716_v10 = vmax.f32 %v4514_v48, 0.0  ;;  %v717_v14 = vmax.f32 %v4516_v5, 0.0 }
 0x17a LB: > { %s724_s28 = sld [smem:[#allocation6 + %s3968_s27]]  ;;  %s727_s2 = scalar_lea.vmem [#allocation4], %s3968_s27  ;;  %s3968_s27 = sphi %s3966_s27, %s723_s27  }
 0x17b   : > { %s723_s27 = sadd.s32 1, %s3968_s27  }
 0x17c   : > { %p720_p0 = scmp.ge.s32.totalorder %s723_s27, 20  }
 0x17d   :  { %v6275_v19 = vmov (%p720_p0), 0   ;;  %v6276_v8 = vmov (%p720_p0), 0.0   ;;  %v6277_v15 = vmov (%p720_p0), 1   ;;  %v6187_v28 = vmov (%p720_p0), 2   ;;  %s3970_s21 = smov (%p720_p0), 0  }
 0x17e   :  { %722 = sbr.rel (!%p720_p0) target bundleno = 378 (0x17a), region = 264  ;;  %3455 = vset.pattern.permute.xlu1 (%p720_p0), %v6275_v19  ;;  %3454 = vset.pattern.permute.xlu0 (%p720_p0), %v6275_v19  ;;  %807 = vst [vmem:[#allocation3] sm:$0xff] (%p720_p0), %v6276_v8  ;;  %v6184_v29 = vmov (%p720_p0), 3   ;;  %v6278_v12 = vmax.f32 (%p720_p0), %v4430_v38, 0.0  ;;  %v6279_v51 = vmax.f32 (%p720_p0), %v4428_v37, 0.0 }
 0x17f   :  { %808 = vst [vmem:[#allocation3 + $0x8] sm:$0xff] (%p720_p0), %v6276_v8  ;;  %3457 = vset.pattern.permute.xlu2 (%p720_p0), %v6277_v15 }
 0x180   : > { %s725_s29 = scalar_lea.vmem [#allocation2], %s724_s28 }
 0x181   : > { %v726_v18 = vld [vmem:[%s725_s29] sm:$0x1] }
 0x182   : > { %728 = vst [vmem:[%s727_s2] sm:$0x1] %v726_v18 }
 0x189   :  { %v731_v23 = vld [vmem:[#allocation4 + $0x10] sm:$0xff]  ;;  %v729_v25 = vld [vmem:[#allocation4] sm:$0xff]  ;;  %v730_v2 = vld [vmem:[#allocation4 + $0x8] sm:$0xff] }
 0x18a   :  { %744 = vperm.xlu1 %3455, %v731_v23   ;;  %734 = vperm.xlu0 %3454, %v729_v25  }
 0x18b   :  { %755 = vperm.xlu2 %3457, %v730_v2  }
 0x192   :  { %3456 = vset.pattern.permute.xlu1 %v6277_v15  ;;  %739 = vperm.xlu0 %3454, %v730_v2  }
 0x193   :  { %751 = vperm.xlu1 %3456, %v729_v25   ;;  %759 = vperm.xlu2 %3457, %v731_v23  }
 0x19a   :  { %3458 = vset.pattern.permute.xlu0 %v6187_v28 }
 0x19b   :  { %3459 = vset.pattern.permute.xlu1 %v6187_v28  ;;  %769 = vperm.xlu0 %3458, %v729_v25  }
 0x19c   :  { %773 = vperm.xlu1 %3459, %v730_v2   ;;  %3460 = vset.pattern.permute.xlu2 %v6187_v28 }
 0x19d   :  { %777 = vperm.xlu2 %3460, %v731_v23  }
 0x1a3   :  { %3463 = vset.pattern.permute.xlu0 %v6184_v29 }
 0x1a4   :  { %3461 = vset.pattern.permute.xlu1 %v6184_v29  ;;  %795 = vperm.xlu0 %3463, %v731_v23  }
 0x1a5   :  { %787 = vperm.xlu1 %3461, %v729_v25   ;;  %3462 = vset.pattern.permute.xlu2 %v6184_v29 }
 0x1a6   :  { %791 = vperm.xlu2 %3462, %v730_v2  }
 0x1e5   :  { %v756_v53 = vpop.permute.xlu2 %755 }
 0x1e6   :  { %v763_v16 = vmul.f32 %v756_v53, %v711_v7 }
 0x1ed   :  { %v760_v55 = vpop.permute.xlu2 %759 }
 0x1ee   :  { %v764_v57 = vmul.f32 %v760_v55, %v715_v17 }
 0x1f7   :  { %v778_v21 = vpop.permute.xlu2 %777 }
 0x1f8   :  { %v782_v35 = vmul.f32 %v778_v21, %v716_v10 }
 0x1fc   :  { %v745_v54 = vpop.permute.xlu1 %744  ;;  %v735_v27 = vpop.permute.xlu0 %734 }
 0x1fd   :  { %v749_v43 = vmul.f32 %v745_v54, %v714_v44  ;;  %v747_v33 = vmul.f32 %v735_v27, %v6279_v51 }
 0x1ff   :  { %v767_v7 = vadd.f32 %v764_v57, %v749_v43 }
 0x200   :  { %v792_v30 = vpop.permute.xlu2 %791 }
 0x201   :  { %v799_v22 = vmul.f32 %v792_v30, %v713_v63  ;;  %v785_v24 = vadd.f32 %v782_v35, %v767_v7 }
 0x204   :  { %v740_v58 = vpop.permute.xlu0 %739 }
 0x205   :  { %v752_v59 = vpop.permute.xlu1 %751  ;;  %v748_v60 = vmul.f32 %v740_v58, %v710_v39 }
 0x206   :  { %v762_v0 = vmul.f32 %v752_v59, %v6278_v12 }
 0x207   :  { %v766_v61 = vadd.f32 %v763_v16, %v748_v60 }
 0x208   :  { %v765_v56 = vadd.f32 %v762_v0, %v747_v33 }
 0x20d   :  { %v770_v31 = vpop.permute.xlu0 %769 }
 0x20e   :  { %v774_v42 = vpop.permute.xlu1 %773  ;;  %v780_v44 = vmul.f32 %v770_v31, %v708_v1 }
 0x20f   :  { %v781_v49 = vmul.f32 %v774_v42, %v712_v62 }
 0x210   :  { %v783_v47 = vadd.f32 %v780_v44, %v765_v56 }
 0x211   :  { %v784_v39 = vadd.f32 %v781_v49, %v766_v61 }
 0x213   :  { %v802_v17 = vadd.f32 %v799_v22, %v784_v39 }
 0x215   :  { %805 = vst [vmem:[#allocation5 + $0x8] sm:$0xff] %v802_v17 }
 0x216   :  { %v796_v62 = vpop.permute.xlu0 %795 }
 0x217   :  { %v800_v63 = vmul.f32 %v796_v62, %v717_v14  ;;  %v788_v38 = vpop.permute.xlu1 %787 }
 0x218   :  { %v798_v52 = vmul.f32 %v788_v38, %v709_v50 }
 0x219   :  { %v803_v13 = vadd.f32 %v800_v63, %v785_v24 }
 0x21a   :  { %v801_v9 = vadd.f32 %v798_v52, %v783_v47 }
 0x21b   :  { %806 = vst [vmem:[#allocation5 + $0x10] sm:$0xff] %v803_v13 }
 0x21c   :  { %804 = vst [vmem:[#allocation5] sm:$0xff] %v801_v9 }
 0x21d LB: > { %s815_s7 = sld [smem:[#allocation10 + %s3972_s21]]  ;;  %s818_s25 = scalar_lea.vmem [#allocation5], %s3972_s21  ;;  %s3972_s21 = sphi %s3970_s21, %s814_s21  }
 0x21e   : > { %s814_s21 = sadd.s32 1, %s3972_s21  }
 0x21f   : > { %p811_p1 = scmp.ge.s32.totalorder %s814_s21, 20  }
 0x220   :  { %v853_v6 = vld [vmem:[#allocation21 + $0x78] sm:$0xff] (%p811_p1)  ;;  %v852_v50 = vld [vmem:[#allocation21 + $0x70] sm:$0xff] (%p811_p1)  ;;  %v6280_v11 = vmov (%p811_p1), 0   ;;  %v851_v5 = vld [vmem:[#allocation21 + $0x68] sm:$0xff] (%p811_p1) }
 0x221   :  { %3464 = vset.pattern.permute.xlu0 (%p811_p1), %v6280_v11  ;;  %3345 = vmatpush.msrb.mxu3 (%p811_p1), %v853_v6  ;;  %v920_v48 = vld [vmem:[#allocation24 + $0xf8] sm:$0x1] (%p811_p1)  ;;  %v910_v10 = vld [vmem:[#allocation24 + $0xa8] sm:$0xff] (%p811_p1)  ;;  %v919_v18 = vld [vmem:[#allocation24 + $0xf0] sm:$0x1] (%p811_p1) }
 0x222   :  { %854 = vmatpush.msrb.mxu0 (%p811_p1), %v853_v6  ;;  %3253 = vmatpush.msk.msrb.mxu2 (%p811_p1), %vm380_vm0, %v920_v48  ;;  %v900_v14 = vld [vmem:[#allocation24 + $0x58] sm:$0xff] (%p811_p1)  ;;  %v890_v23 = vld [vmem:[#allocation24 + $0x8] sm:$0xff] (%p811_p1)  ;;  %v909_v25 = vld [vmem:[#allocation24 + $0xa0] sm:$0xff] (%p811_p1) }
 0x223   : > { %v819_v37 = vld [vmem:[%s818_s25] sm:$0x1]  ;;  %s816_s26 = scalar_lea.vmem [#allocation3], %s815_s7  ;;  %813 = sbr.rel (!%p811_p1) target bundleno = 541 (0x21d), region = 275  ;;  %828 = vperm.xlu0 (%p811_p1), %3464, %v4241_v3   ;;  %3346 = vmatpush.msrb.mxu3 (%p811_p1), %v852_v50  ;;  %v850_v19 = vld [vmem:[#allocation21 + $0x60] sm:$0xff] (%p811_p1)  ;;  %v899_v2 = vld [vmem:[#allocation24 + $0x50] sm:$0xff] (%p811_p1) }
 0x224   : > { %v817_v45 = vld [vmem:[%s816_s26] sm:$0x1]  ;;  %855 = vmatpush.msrb.mxu0 (%p811_p1), %v852_v50  ;;  %998 = vmatpush.msrb.mxu2 (%p811_p1), %v910_v10  ;;  %v849_v8 = vld [vmem:[#allocation21 + $0x58] sm:$0xff] (%p811_p1)  ;;  %v848_v3 = vld [vmem:[#allocation21 + $0x50] sm:$0xff] (%p811_p1) }
 0x225   : > { %v820_v1 = vadd.f32 %v819_v37, %v817_v45  ;;  %3249 = vmatpush.msk.msrb.mxu1 (%p811_p1), %vm380_vm0, %v919_v18  ;;  %3347 = vmatpush.msrb.mxu3 (%p811_p1), %v851_v5  ;;  %v889_v15 = vld [vmem:[#allocation24] sm:$0xff] (%p811_p1)  ;;  %v924_v53 = vld [vmem:[#allocation24 + $0x118] sm:$0x1] (%p811_p1)  ;;  %v923_v54 = vld [vmem:[#allocation24 + $0x110] sm:$0x1] (%p811_p1) }
 0x226   :  { %856 = vmatpush.msrb.mxu0 (%p811_p1), %v851_v5  ;;  %999 = vmatpush.msrb.mxu2 (%p811_p1), %v900_v14  ;;  %v847_v55 = vld [vmem:[#allocation21 + $0x48] sm:$0xff] (%p811_p1)  ;;  %v846_v21 = vld [vmem:[#allocation21 + $0x40] sm:$0xff] (%p811_p1)  ;;  %v845_v60 = vld [vmem:[#allocation21 + $0x38] sm:$0xff] (%p811_p1) }
 0x227   : > { %821 = vst [vmem:[%s816_s26] sm:$0x1] %v820_v1  ;;  %972 = vmatpush.msrb.mxu1 (%p811_p1), %v909_v25  ;;  %3348 = vmatpush.msrb.mxu3 (%p811_p1), %v850_v19  ;;  %v914_v27 = vld [vmem:[#allocation24 + $0xc8] sm:$0xff] (%p811_p1)  ;;  %v913_v58 = vld [vmem:[#allocation24 + $0xc0] sm:$0xff] (%p811_p1)  ;;  %v904_v59 = vld [vmem:[#allocation24 + $0x78] sm:$0xff] (%p811_p1) }
 0x228   :  { %857 = vmatpush.msrb.mxu0 %v850_v19  ;;  %1000 = vmatpush.msrb.mxu2 %v890_v23  ;;  %v903_v30 = vld [vmem:[#allocation24 + $0x70] sm:$0xff]  ;;  %v894_v31 = vld [vmem:[#allocation24 + $0x28] sm:$0xff]  ;;  %v893_v42 = vld [vmem:[#allocation24 + $0x20] sm:$0xff] }
 0x229   :  { %973 = vmatpush.msrb.mxu1 %v899_v2  ;;  %3349 = vmatpush.msrb.mxu3 %v849_v8  ;;  %v844_v16 = vld [vmem:[#allocation21 + $0x30] sm:$0xff]  ;;  %v843_v57 = vld [vmem:[#allocation21 + $0x28] sm:$0xff]  ;;  %v928_v43 = vld [vmem:[#allocation24 + $0x138] sm:$0x1] }
 0x22a   :  { %858 = vmatpush.msrb.mxu0 %v849_v8  ;;  %3254 = vmatmul.msk.f32.vlgmr.msrb.gmra.mxu2 %vm370_vm1, %v4272_v32  ;;  %v842_v61 = vld [vmem:[#allocation21 + $0x20] sm:$0xff]  ;;  %v927_v49 = vld [vmem:[#allocation24 + $0x130] sm:$0x1]  ;;  %v918_v22 = vld [vmem:[#allocation24 + $0xe8] sm:$0xff] }
 0x22b   :  { %974 = vmatpush.msrb.mxu1 %v889_v15  ;;  %3350 = vmatpush.msrb.mxu3 %v848_v3  ;;  %v841_v39 = vld [vmem:[#allocation21 + $0x18] sm:$0xff]  ;;  %v840_v12 = vld [vmem:[#allocation21 + $0x10] sm:$0xff]  ;;  %v917_v0 = vld [vmem:[#allocation24 + $0xe0] sm:$0xff] }
 0x22c   :  { %3269 = vmatpush.msk.msra.mxu2 %vm380_vm0, %v924_v53  ;;  %859 = vmatpush.msrb.mxu0 %v848_v3  ;;  %v839_v7 = vld [vmem:[#allocation21 + $0x8] sm:$0xff]  ;;  %v908_v35 = vld [vmem:[#allocation24 + $0x98] sm:$0xff]  ;;  %v907_v17 = vld [vmem:[#allocation24 + $0x90] sm:$0xff] }
 0x22d   :  { %3250 = vmatmul.msk.f32.vlgmr.msrb.gmra.mxu1 %vm370_vm1, %v4272_v32  ;;  %3351 = vmatpush.msrb.mxu3 %v847_v55  ;;  %v838_v51 = vld [vmem:[#allocation21] sm:$0xff]  ;;  %v898_v33 = vld [vmem:[#allocation24 + $0x48] sm:$0xff]  ;;  %v911_v24 = vld [vmem:[#allocation24 + $0xb0] sm:$0xff] }
 0x22e   :  { %3265 = vmatpush.msk.msra.mxu1 %vm380_vm0, %v923_v54  ;;  %860 = vmatpush.msrb.mxu0 %v847_v55  ;;  %v823_v44 = vld [vmem:[#allocation2 + $0x8] sm:$0xff]  ;;  %v921_v56 = vld [vmem:[#allocation24 + $0x100] sm:$0x1]  ;;  %v922_v62 = vld [vmem:[#allocation24 + $0x108] sm:$0x1] }
 0x22f   :  { %1102 = vmatpush.msra.mxu2 %v914_v27  ;;  %3352 = vmatpush.msrb.mxu3 %v846_v21  ;;  %v897_v63 = vld [vmem:[#allocation24 + $0x40] sm:$0xff]  ;;  %v912_v38 = vld [vmem:[#allocation24 + $0xb8] sm:$0xff]  ;;  %v902_v52 = vld [vmem:[#allocation24 + $0x68] sm:$0xff] }
 0x230   :  { %1076 = vmatpush.msra.mxu1 %v913_v58  ;;  %861 = vmatpush.msrb.mxu0 %v846_v21  ;;  %v901_v47 = vld [vmem:[#allocation24 + $0x60] sm:$0xff]  ;;  %v891_v13 = vld [vmem:[#allocation24 + $0x10] sm:$0xff]  ;;  %v892_v9 = vld [vmem:[#allocation24 + $0x18] sm:$0xff] }
 0x231   :  { %1103 = vmatpush.msra.mxu2 %v904_v59  ;;  %3353 = vmatpush.msrb.mxu3 %v845_v60  ;;  %v925_v37 = vld [vmem:[#allocation24 + $0x120] sm:$0x1]  ;;  %v926_v45 = vld [vmem:[#allocation24 + $0x128] sm:$0x1]  ;;  %v915_v1 = vld [vmem:[#allocation24 + $0xd0] sm:$0xff] }
 0x232   :  { %1077 = vmatpush.msra.mxu1 %v903_v30  ;;  %862 = vmatpush.msrb.mxu0 %v845_v60  ;;  %v916_v6 = vld [vmem:[#allocation24 + $0xd8] sm:$0xff]  ;;  %v905_v50 = vld [vmem:[#allocation24 + $0x80] sm:$0xff]  ;;  %v906_v11 = vld [vmem:[#allocation24 + $0x88] sm:$0xff] }
 0x233   :  { %3255 = vmatmul.msk.f32.gmra.mxu2 %vm370_vm1, %v4283_v34  ;;  %3354 = vmatpush.msrb.mxu3 %v844_v16  ;;  %v895_v48 = vld [vmem:[#allocation24 + $0x30] sm:$0xff]  ;;  %v896_v5 = vld [vmem:[#allocation24 + $0x38] sm:$0xff]  ;;  %v4662_v58 = vld [vmem:[%s6150_s16] sm:$0xff] }
 0x234   :  { %1104 = vmatpush.msra.mxu2 %v894_v31  ;;  %863 = vmatpush.msrb.mxu0 %v844_v16  ;;  %v4632_v10 = vld [vmem:[%s6149_s15] ss:$2 sm:$0xff]  ;;  %v4637_v14 = vld [vmem:[%s6149_s15 + $0x1] ss:$2 sm:$0xff]  ;;  %v6283_v27 = vld [vmem:[#allocation49_spill] sm:$0xff] }
 0x235   :  { %3251 = vmatmul.msk.f32.gmra.mxu1 %vm370_vm1, %v4283_v34  ;;  %3355 = vmatpush.msrb.mxu3 %v843_v57  ;;  %v4642_v18 = vld [vmem:[%s6151_s17] ss:$2 sm:$0xff]  ;;  %v4647_v19 = vld [vmem:[%s6151_s17 + $0x1] ss:$2 sm:$0xff]  ;;  %v1224_v23 = vperm.slane %v4632_v10, 0  ;;  %v1280_v25 = vperm.slane %v4637_v14, 0 }
 0x236   :  { %1078 = vmatpush.msra.mxu1 %v893_v42  ;;  %864 = vmatpush.msrb.mxu0 %v843_v57  ;;  %6281 = vst [vmem:[#allocation51_spill] sm:$0xff] %v4642_v18  ;;  %v1419_v2 = vperm.slane %v4642_v18, 0  ;;  %v1475_v8 = vperm.slane %v4647_v19, 0  ;;  %v1225_v15 = vperm.slane %v4632_v10, 1  ;;  %v1281_v3 = vperm.slane %v4637_v14, 1  ;;  %v4669_v30 = vld [vmem:[%s6152_s18] sm:$0xff] }
 0x237   :  { %3285 = vmatpush.msk.msrb.mxu2 %vm380_vm0, %v928_v43  ;;  %3356 = vmatpush.msrb.mxu3 %v842_v61  ;;  %6282 = vst [vmem:[#allocation52_spill] sm:$0xff] %v4647_v19  ;;  %v1420_v53 = vperm.slane %v4642_v18, 1  ;;  %v1476_v55 = vperm.slane %v4647_v19, 1  ;;  %v1244_v54 = vmul.f32 %v1224_v23, %v4314_v46  ;;  %v1300_v21 = vmul.f32 %v1280_v25, %v6283_v27 }
 0x238   :  { %3281 = vmatpush.msk.msrb.mxu1 %vm380_vm0, %v927_v49  ;;  %865 = vmatpush.msrb.mxu0 %v842_v61  ;;  %v1439_v59 = vmul.f32 %v1419_v2, %v4314_v46  ;;  %v1495_v60 = vmul.f32 %v1475_v8, %v6283_v27  ;;  %6284 = vst [vmem:[#allocation53_spill] sm:$0xff] %v4669_v30 }
 0x239   :  { %1206 = vmatpush.msrb.mxu2 %v918_v22  ;;  %3357 = vmatpush.msrb.mxu3 %v841_v39  ;;  %v1245_v16 = vmul.f32 %v1225_v15, %v4314_v46  ;;  %v1301_v31 = vmul.f32 %v1281_v3, %v6283_v27  ;;  %v1440_v57 = vmul.f32 %v1420_v53, %v4314_v46 }
 0x23a   :  { %833 = vperm.xlu0 %3464, %v4246_v4   ;;  %866 = vmatpush.msrb.mxu0 %v841_v39  ;;  %v822_v4 = vld [vmem:[#allocation2] sm:$0xff]  ;;  %v1496_v42 = vmul.f32 %v1476_v55, %v6283_v27  ;;  %v1254_v43 = vmul.f32 %v1224_v23, %v4304_v41  ;;  %v1310_v61 = vmul.f32 %v1280_v25, %v4378_v20 }
 0x23b   :  { %3256 = vmatmul.msk.f32.gmra.mxu2 %vm370_vm1, %v4294_v36  ;;  %3358 = vmatpush.msrb.mxu3 %v840_v12  ;;  %v1449_v49 = vmul.f32 %v1419_v2, %v4304_v41  ;;  %v1505_v22 = vmul.f32 %v1475_v8, %v4378_v20  ;;  %v1255_v39 = vmul.f32 %v1225_v15, %v4304_v41 }
 0x23c   :  { %1180 = vmatpush.msrb.mxu1 %v917_v0  ;;  %867 = vmatpush.msrb.mxu0 %v840_v12  ;;  %v1311_v12 = vmul.f32 %v1281_v3, %v4378_v20  ;;  %v1330_v0 = vadd.f32 %v1300_v21, %v1244_v54  ;;  %v1515_v54 = vmul.f32 %v1475_v8, %v4434_v40 }
 0x23d   :  { %3252 = vmatmul.msk.f32.gmra.mxu1 %vm370_vm1, %v4294_v36  ;;  %3359 = vmatpush.msrb.mxu3 %v839_v7 }
 0x23e   :  { %1207 = vmatpush.msrb.mxu2 %v908_v35  ;;  %868 = vmatpush.msrb.mxu0 %v839_v7  ;;  %v1364_v7 = vperm.slane %v4662_v58, 0  ;;  %v1559_v35 = vperm.slane %v4669_v30, 0 }
 0x23f   :  { %1181 = vmatpush.msrb.mxu1 %v907_v17  ;;  %3360 = vmatpush.msrb.mxu3 %v838_v51  ;;  %v1365_v17 = vperm.slane %v4662_v58, 1 }
 0x240   :  { %1208 = vmatpush.msrb.mxu2 %v898_v33  ;;  %873 = vmatmul.f32.vlgmr.msrb.gmra.mxu3 %v823_v44  ;;  %v1331_v33 = vadd.f32 %v1301_v31, %v1245_v16  ;;  %v1450_v44 = vmul.f32 %v1420_v53, %v4304_v41 }
 0x241   :  { %869 = vmatpush.msrb.mxu0 %v838_v51  ;;  %3257 = vmatpush.msk.msra.mxu3 %vm380_vm0, %v921_v56  ;;  %v1525_v51 = vadd.f32 %v1495_v60, %v1439_v59  ;;  %v1506_v56 = vmul.f32 %v1476_v55, %v4378_v20 }
 0x242   :  { %870 = vmatmul.f32.vlgmr.msrb.gmra.mxu0 %v822_v4  ;;  %1182 = vmatpush.msrb.mxu1 %v897_v63  ;;  %v1560_v4 = vperm.slane %v4669_v30, 1  ;;  %v1535_v63 = vadd.f32 %v1505_v22, %v1449_v49  ;;  %v4730_v22 = vperm.slane %v4637_v14, 3 }
 0x243   :  { %3261 = vmatpush.msk.msra.mxu0 %vm380_vm0, %v922_v62  ;;  %3270 = vmatmul.msk.f32.vlgmr.msra.gmra.mxu2 %vm370_vm1, %v4272_v32  ;;  %v1526_v62 = vadd.f32 %v1496_v42, %v1440_v57 }
 0x244   :  { %1024 = vmatpush.msra.mxu3 %v911_v24  ;;  %v1340_v24 = vadd.f32 %v1310_v61, %v1254_v43  ;;  %v4706_v60 = vadd.f32 %v1559_v35, %v1535_v63  ;;  %v4725_v61 = vperm.slane %v4632_v10, 3 }
 0x245   :  { %1050 = vmatpush.msra.mxu0 %v912_v38  ;;  %3266 = vmatmul.msk.f32.vlgmr.msra.gmra.mxu1 %vm370_vm1, %v4272_v32  ;;  %v1341_v38 = vadd.f32 %v1311_v12, %v1255_v39  ;;  %v4733_v39 = vperm.slane %v4632_v10, 4  ;;  %v4736_v12 = vperm.slane %v4637_v14, 4 }
 0x246   :  { %1025 = vmatpush.msra.mxu3 %v901_v47  ;;  %v824_v47 = vld [vmem:[#allocation3] sm:$0xff]  ;;  %v4704_v59 = vadd.f32 %v1364_v7, %v1340_v24 }
 0x247   :  { %1051 = vmatpush.msra.mxu0 %v902_v52  ;;  %v1264_v52 = vmul.f32 %v1224_v23, %v4388_v26  ;;  %v4697_v23 = vadd.f32 %v1560_v4, %v1526_v62  ;;  %v4708_v16 = vadd.f32 %v1365_v17, %v1341_v38  ;;  %v4759_v62 = vperm.slane %v4662_v58, 2 }
 0x248   :  { %1026 = vmatpush.msra.mxu3 %v891_v13  ;;  %v1320_v13 = vmul.f32 %v1280_v25, %v4434_v40 }
 0x249   :  { %3258 = vmatmul.msk.f32.vlgmr.msra.gmra.mxu3 %vm370_vm1, %v4272_v32  ;;  %1052 = vmatpush.msra.mxu0 %v892_v9  ;;  %v1265_v9 = vmul.f32 %v1225_v15, %v4388_v26  ;;  %v1460_v15 = vmul.f32 %v1420_v53, %v4388_v26  ;;  %v4719_v53 = vperm.slane %v4632_v10, 2 }
 0x24a   :  { %3273 = vmatpush.msk.msrb.mxu3 %vm380_vm0, %v925_v37  ;;  %3262 = vmatmul.msk.f32.vlgmr.msra.gmra.mxu0 %vm370_vm1, %v4272_v32  ;;  %v1321_v37 = vmul.f32 %v1281_v3, %v4434_v40  ;;  %v1516_v3 = vmul.f32 %v1476_v55, %v4434_v40  ;;  %v4722_v55 = vperm.slane %v4637_v14, 2 }
 0x24b   :  { %3277 = vmatpush.msk.msrb.mxu0 %vm380_vm0, %v926_v45  ;;  %3271 = vmatmul.msk.f32.gmra.mxu2 %vm370_vm1, %v4283_v34  ;;  %v1384_v45 = vadd.f32 %v1364_v7, %v1330_v0  ;;  %v1246_v0 = vmul.f32 %v4719_v53, %v4314_v46 }
 0x24c   :  { %1128 = vmatpush.msrb.mxu3 %v915_v1  ;;  %v1579_v1 = vadd.f32 %v1559_v35, %v1525_v51  ;;  %v1351_v21 = vadd.f32 %v1321_v37, %v1265_v9  ;;  %v1546_v42 = vadd.f32 %v1516_v3, %v1460_v15  ;;  %v1247_v51 = vmul.f32 %v4725_v61, %v4314_v46 }
 0x24d   :  { %1154 = vmatpush.msrb.mxu0 %v916_v6  ;;  %3267 = vmatmul.msk.f32.gmra.mxu1 %vm370_vm1, %v4283_v34  ;;  %v4691_v6 = vadd.f32 %v1365_v17, %v1331_v33  ;;  %v1303_v33 = vmul.f32 %v4730_v22, %v6283_v27 }
 0x24e   :  { %1129 = vmatpush.msrb.mxu3 %v905_v50  ;;  %v1536_v50 = vadd.f32 %v1506_v56, %v1450_v44  ;;  %v4714_v57 = vadd.f32 %v1365_v17, %v1351_v21  ;;  %v4727_v49 = vadd.f32 %v1560_v4, %v1546_v42  ;;  %v4746_v17 = vperm.slane %v4647_v19, 2 }
 0x24f   :  { %1155 = vmatpush.msrb.mxu0 %v906_v11  ;;  %v4753_v44 = vperm.slane %v4642_v18, 3  ;;  %v4756_v56 = vperm.slane %v4647_v19, 3  ;;  %v1248_v42 = vmul.f32 %v4733_v39, %v4314_v46 }
 0x250   :  { %1130 = vmatpush.msrb.mxu3 %v895_v48  ;;  %v1350_v48 = vadd.f32 %v1320_v13, %v1264_v52  ;;  %v1497_v63 = vmul.f32 %v4746_v17, %v6283_v27  ;;  %v1333_v52 = vadd.f32 %v1303_v33, %v1247_v51  ;;  %v4766_v13 = vperm.slane %v4662_v58, 3 }
 0x251   :  { %3259 = vmatmul.msk.f32.gmra.mxu3 %vm370_vm1, %v4283_v34  ;;  %1156 = vmatpush.msrb.mxu0 %v896_v5  ;;  %v1459_v5 = vmul.f32 %v1419_v2, %v4388_v26  ;;  %v4710_v2 = vadd.f32 %v1560_v4, %v1536_v50  ;;  %v1442_v9 = vmul.f32 %v4753_v44, %v4314_v46 }
 0x252   :  { %3263 = vmatmul.msk.f32.gmra.mxu0 %vm370_vm1, %v4283_v34  ;;  %v4712_v8 = vadd.f32 %v1364_v7, %v1350_v48  ;;  %v1302_v7 = vmul.f32 %v4722_v55, %v6283_v27  ;;  %v1498_v37 = vmul.f32 %v4756_v56, %v6283_v27  ;;  %v4781_v15 = vadd.f32 %v4766_v13, %v1333_v52 }
 0x253   :  { %3272 = vmatmul.msk.f32.gmra.mxu2 %vm370_vm1, %v4294_v36  ;;  %v1545_v31 = vadd.f32 %v1515_v54, %v1459_v5  ;;  %v4776_v54 = vperm.slane %v4669_v30, 2  ;;  %v1304_v51 = vmul.f32 %v4736_v12, %v6283_v27 }
 0x254   :  { %v1332_v4 = vadd.f32 %v1302_v7, %v1246_v0  ;;  %v1528_v3 = vadd.f32 %v1498_v37, %v1442_v9  ;;  %v4813_v9 = vperm.slane %v4669_v30, 4 }
 0x255   :  { %3268 = vmatmul.msk.f32.gmra.mxu1 %vm370_vm1, %v4294_v36  ;;  %v4716_v43 = vadd.f32 %v1559_v35, %v1545_v31  ;;  %v4743_v35 = vperm.slane %v4642_v18, 2  ;;  %v4784_v31 = vperm.slane %v4669_v30, 3  ;;  %v1334_v52 = vadd.f32 %v1304_v51, %v1248_v42 }
 0x256   :  { %v4773_v48 = vadd.f32 %v4759_v62, %v1332_v4  ;;  %v4832_v42 = vperm.slane %v4662_v58, 5  ;;  %v4835_v51 = vperm.slane %v4642_v18, 5 }
 0x257   :  { %v1441_v24 = vmul.f32 %v4743_v35, %v4314_v46  ;;  %v4799_v4 = vadd.f32 %v4784_v31, %v1528_v3  ;;  %v4823_v3 = vperm.slane %v4637_v14, 5 }
 0x258   :  { %6286 = vst [vmem:[#allocation55_spill] sm:$0xff] %v4773_v48 }
 0x259   :  { %3260 = vmatmul.msk.f32.gmra.mxu3 %vm370_vm1, %v4294_v36  ;;  %v1527_v5 = vadd.f32 %v1497_v63, %v1441_v24  ;;  %v4802_v24 = vperm.slane %v4662_v58, 4  ;;  %v4805_v63 = vperm.slane %v4642_v18, 4 }
 0x25a   :  { %3264 = vmatmul.msk.f32.gmra.mxu0 %vm370_vm1, %v4294_v36 }
 0x25b   :  { %3286 = vmatmul.msk.f32.vlgmr.msrb.gmra.mxu2 %vm370_vm1, %v4272_v32  ;;  %v4794_v7 = vadd.f32 %v4776_v54, %v1527_v5  ;;  %v1443_v37 = vmul.f32 %v4805_v63, %v4314_v46  ;;  %v4820_v5 = vperm.slane %v4632_v10, 5 }
 0x25d   :  { %3282 = vmatmul.msk.f32.vlgmr.msrb.gmra.mxu1 %vm370_vm1, %v4272_v32  ;;  %6289 = vst [vmem:[#allocation58_spill] sm:$0xff] %v4794_v7  ;;  %v1249_v28 = vmul.f32 %v4820_v5, %v4314_v46 }
 0x261   :  { %3274 = vmatmul.msk.f32.vlgmr.msrb.gmra.mxu3 %vm370_vm1, %v4272_v32 }
 0x262   :  { %3278 = vmatmul.msk.f32.vlgmr.msrb.gmra.mxu0 %vm370_vm1, %v4272_v32  ;;  %v1256_v32 = vmul.f32 %v4719_v53, %v4304_v41 }
 0x263   :  { %3287 = vmatmul.msk.f32.gmra.mxu2 %vm370_vm1, %v4283_v34 }
 0x265   :  { %3283 = vmatmul.msk.f32.gmra.mxu1 %vm370_vm1, %v4283_v34 }
 0x269   :  { %3275 = vmatmul.msk.f32.gmra.mxu3 %vm370_vm1, %v4283_v34 }
 0x26a   :  { %3279 = vmatmul.msk.f32.gmra.mxu0 %vm370_vm1, %v4283_v34 }
 0x26b   :  { %3288 = vmatmul.msk.f32.gmra.mxu2 %vm370_vm1, %v4294_v36 }
 0x26d   :  { %3284 = vmatmul.msk.f32.gmra.mxu1 %vm370_vm1, %v4294_v36 }
 0x271   :  { %3276 = vmatmul.msk.f32.gmra.mxu3 %vm370_vm1, %v4294_v36 }
 0x272   :  { %3280 = vmatmul.msk.f32.gmra.mxu0 %vm370_vm1, %v4294_v36  ;;  %v4849_v36 = vperm.slane %v4669_v30, 5 }
 0x295   :  { %v4693_v11 = vpop.permute.xlu0 %828 }
 0x296   :  { %6285 = vst [vmem:[#allocation54_spill] sm:$0xff] %v4693_v11  ;;  %v4700_v25 = vmul.f32 %v4693_v11, %v824_v47  ;;  %v825_v47 = vld [vmem:[#allocation3 + $0x8] sm:$0xff]  ;;  %v1444_v11 = vmul.f32 %v4835_v51, %v4314_v46 }
 0x2aa   :  { %v976_v38 = vpop.f32.mrf.mxu1 }
 0x2ab   :  { %v1609_v50 = vmul.f32 %v1384_v45, %v976_v38 }
 0x2ac   :  { %v4778_v21 = vpop.permute.xlu0 %833 }
 0x2ad   :  { %6287 = vst [vmem:[#allocation56_spill] sm:$0xff] %v4778_v21  ;;  %v4788_v45 = vadd.f32 %v1609_v50, %v1579_v1  ;;  %v4791_v0 = vmul.f32 %v4778_v21, %v825_v47  ;;  %v1002_v33 = vpop.f32.mrf.mxu2  ;;  %v4808_v1 = vperm.slane %v4647_v19, 4  ;;  %v1305_v21 = vmul.f32 %v4823_v3, %v6283_v27 }
 0x2ae   :  { %v1610_v47 = vmul.f32 %v4691_v6, %v1002_v33  ;;  %v4829_v6 = vadd.f32 %v4802_v24, %v1334_v52 }
 0x2af   :  { %6288 = vst [vmem:[#allocation57_spill] sm:$0xff] %v4788_v45  ;;  %v1499_v50 = vmul.f32 %v4808_v1, %v6283_v27  ;;  %v1257_v45 = vmul.f32 %v4725_v61, %v4304_v41 }
 0x2b0   :  { %v4826_v38 = vadd.f32 %v1610_v47, %v4697_v23  ;;  %v4842_v23 = vperm.slane %v4647_v19, 5 }
 0x2b1   :  { %v1529_v29 = vadd.f32 %v1499_v50, %v1443_v37  ;;  %v1335_v50 = vadd.f32 %v1305_v21, %v1249_v28 }
 0x2b2   :  { %6290 = vst [vmem:[#allocation59_spill] sm:$0xff] %v4826_v38  ;;  %v979_v33 = vpop.f32.mrf.mxu1  ;;  %v1500_v34 = vmul.f32 %v4842_v23, %v6283_v27 }
 0x2b3   :  { %v1619_v52 = vmul.f32 %v4704_v59, %v979_v33  ;;  %v4852_v37 = vadd.f32 %v4813_v9, %v1529_v29  ;;  %v1312_v59 = vmul.f32 %v4722_v55, %v4378_v20  ;;  %v1451_v33 = vmul.f32 %v4743_v35, %v4304_v41 }
 0x2b4   :  { %v1507_v29 = vmul.f32 %v4746_v17, %v4378_v20  ;;  %v4868_v28 = vadd.f32 %v4832_v42, %v1335_v50  ;;  %v1530_v21 = vadd.f32 %v1500_v34, %v1444_v11  ;;  %v1452_v50 = vmul.f32 %v4753_v44, %v4304_v41 }
 0x2b5   :  { %v4859_v47 = vadd.f32 %v1619_v52, %v4706_v60  ;;  %v1313_v60 = vmul.f32 %v4730_v22, %v4378_v20  ;;  %v1342_v30 = vadd.f32 %v1312_v59, %v1256_v32  ;;  %v1508_v34 = vmul.f32 %v4756_v56, %v4378_v20 }
 0x2b6   :  { %v1005_v38 = vpop.f32.mrf.mxu2  ;;  %v1537_v19 = vadd.f32 %v1507_v29, %v1451_v33  ;;  %v4877_v18 = vadd.f32 %v4849_v36, %v1530_v21  ;;  %v1258_v32 = vmul.f32 %v4733_v39, %v4304_v41  ;;  %v1314_v33 = vmul.f32 %v4736_v12, %v4378_v20 }
 0x2b7   :  { %6291 = vst [vmem:[#allocation60_spill] sm:$0xff] %v4859_v47  ;;  %v1620_v7 = vmul.f32 %v4708_v16, %v1005_v38  ;;  %v1343_v27 = vadd.f32 %v1313_v60, %v1257_v45  ;;  %v4887_v48 = vadd.f32 %v4759_v62, %v1342_v30  ;;  %v1538_v59 = vadd.f32 %v1508_v34, %v1452_v50  ;;  %v3465_v30 = vld [vmem:[#allocation22] ss:$0 sm:$0xff] }
 0x2b8   :  { %v4890_v16 = vadd.f32 %v4776_v54, %v1537_v19  ;;  %v1509_v19 = vmul.f32 %v4808_v1, %v4378_v20  ;;  %v1259_v29 = vmul.f32 %v4820_v5, %v4304_v41  ;;  %v1344_v21 = vadd.f32 %v1314_v33, %v1258_v32 }
 0x2b9   :  { %v4884_v11 = vadd.f32 %v1620_v7, %v4710_v2  ;;  %v4895_v45 = vadd.f32 %v4766_v13, %v1343_v27  ;;  %v1453_v2 = vmul.f32 %v4805_v63, %v4304_v41  ;;  %v4908_v27 = vadd.f32 %v4784_v31, %v1538_v59 }
 0x2ba   :  { %v982_v38 = vpop.f32.mrf.mxu1  ;;  %v1315_v60 = vmul.f32 %v4823_v3, %v4378_v20  ;;  %v1454_v50 = vmul.f32 %v4835_v51, %v4304_v41  ;;  %v1266_v52 = vmul.f32 %v4719_v53, %v4388_v26  ;;  %v1398_v32 = vadd.f32 %v4802_v24, %v1344_v21 }
 0x2bb   :  { %6292 = vst [vmem:[#allocation61_spill] sm:$0xff] %v4884_v11  ;;  %v1629_v7 = vmul.f32 %v4712_v8, %v982_v38  ;;  %v1539_v8 = vadd.f32 %v1509_v19, %v1453_v2  ;;  %v1510_v38 = vmul.f32 %v4842_v23, %v4378_v20  ;;  %v1322_v47 = vmul.f32 %v4722_v55, %v4434_v40 }
 0x2bc   :  { %v1345_v33 = vadd.f32 %v1315_v60, %v1259_v29  ;;  %v1461_v11 = vmul.f32 %v4743_v35, %v4388_v26  ;;  %v1517_v55 = vmul.f32 %v4746_v17, %v4434_v40  ;;  %v1462_v17 = vmul.f32 %v4753_v44, %v4388_v26 }
 0x2bd   :  { %v4915_v34 = vadd.f32 %v1629_v7, %v4716_v43  ;;  %v4929_v19 = vadd.f32 %v4813_v9, %v1539_v8  ;;  %v1540_v53 = vadd.f32 %v1510_v38, %v1454_v50  ;;  %v1352_v29 = vadd.f32 %v1322_v47, %v1266_v52 }
 0x2be   :  { %v1008_v59 = vpop.f32.mrf.mxu2  ;;  %v4933_v21 = vadd.f32 %v4832_v42, %v1345_v33  ;;  %v1323_v50 = vmul.f32 %v4730_v22, %v4434_v40  ;;  %v1547_v47 = vadd.f32 %v1517_v55, %v1461_v11  ;;  %v1268_v22 = vmul.f32 %v4733_v39, %v4388_v26 }
 0x2bf   :  { %v871_v43 = vpop.f32.mrf.mxu0  ;;  %v1630_v7 = vmul.f32 %v4714_v57, %v1008_v59  ;;  %v4941_v60 = vadd.f32 %v4849_v36, %v1540_v53  ;;  %v1267_v57 = vmul.f32 %v4725_v61, %v4388_v26  ;;  %v4948_v38 = vadd.f32 %v4759_v62, %v1352_v29 }
 0x2c0   :  { %v877_v20 = vadd.f32 %v871_v43, %v4700_v25  ;;  %v1518_v61 = vmul.f32 %v4756_v56, %v4434_v40  ;;  %v1324_v62 = vmul.f32 %v4736_v12, %v4434_v40  ;;  %v1519_v39 = vmul.f32 %v4808_v1, %v4434_v40 }
 0x2c1   :  { %v4938_v35 = vadd.f32 %v1630_v7, %v4727_v49  ;;  %v1353_v59 = vadd.f32 %v1323_v50, %v1267_v57  ;;  %v1269_v12 = vmul.f32 %v4820_v5, %v4388_v26  ;;  %v1325_v1 = vmul.f32 %v4823_v3, %v4434_v40 }
 0x2c2   :  { %v883_v25 = vadd.f32 %v3465_v30, %v877_v20  ;;  %v1080_v8 = vpop.f32.mrf.mxu1  ;;  %v4957_v20 = vadd.f32 %v4776_v54, %v1547_v47  ;;  %v1548_v56 = vadd.f32 %v1518_v61, %v1462_v17  ;;  %v1354_v53 = vadd.f32 %v1324_v62, %v1268_v22  ;;  %v6293_v61 = vld [vmem:[#allocation55_spill] sm:$0xff]  ;;  %v6294_v22 = vld [vmem:[#allocation49_spill] sm:$0xff] }
 0x2c3   :  { %v1613_v52 = vmul.f32 %v4829_v6, %v1080_v8  ;;  %v874_v43 = vpop.f32.mrf.mxu3  ;;  %v4968_v6 = vadd.f32 %v4766_v13, %v1353_v59  ;;  %v1463_v54 = vmul.f32 %v4805_v63, %v4388_v26  ;;  %v1355_v8 = vadd.f32 %v1325_v1, %v1269_v12 }
 0x2c4   :  { %v885_v33 = vmax.f32 %v883_v25, 0.0  ;;  %v878_v44 = vadd.f32 %v874_v43, %v4791_v0  ;;  %v4979_v55 = vadd.f32 %v4784_v31, %v1548_v56  ;;  %v1408_v50 = vadd.f32 %v4802_v24, %v1354_v53  ;;  %v6295_v56 = vld [vmem:[#allocation51_spill] sm:$0xff] }
 0x2c5   :  { %v4965_v11 = vadd.f32 %v1613_v52, %v4852_v37  ;;  %v1549_v63 = vadd.f32 %v1519_v39, %v1463_v54  ;;  %v4997_v47 = vperm.slane %v4632_v10, 6  ;;  %v5008_v59 = vperm.slane %v4662_v58, 6  ;;  %v6297_v54 = vld [vmem:[#allocation53_spill] sm:$0xff] }
 0x2c6   :  { %887 = vst [vmem:[#allocation2] sm:$0xff] %v885_v33  ;;  %v1106_v7 = vpop.f32.mrf.mxu2  ;;  %v884_v0 = vadd.f32 %v3465_v30, %v878_v44  ;;  %v1464_v30 = vmul.f32 %v4835_v51, %v4388_v26  ;;  %v5001_v51 = vperm.slane %v4637_v14, 6  ;;  %v5024_v39 = vperm.slane %v6297_v54, 6 }
 0x2c7   :  { %v1054_v29 = vpop.f32.mrf.mxu0  ;;  %v1614_v13 = vmul.f32 %v4868_v28, %v1106_v7  ;;  %v1520_v28 = vmul.f32 %v4842_v23, %v4434_v40  ;;  %v1603_v24 = vadd.f32 %v4813_v9, %v1549_v63  ;;  %v1250_v9 = vmul.f32 %v4997_v47, %v4314_v46 }
 0x2c8   :  { %v1612_v57 = vmul.f32 %v4781_v15, %v1054_v29  ;;  %v886_v25 = vmax.f32 %v884_v0, 0.0  ;;  %v1306_v62 = vmul.f32 %v5001_v51, %v6294_v22  ;;  %v5018_v7 = vperm.slane %v6295_v56, 6 }
 0x2c9   :  { %v4986_v5 = vadd.f32 %v1614_v13, %v4877_v18  ;;  %v1550_v17 = vadd.f32 %v1520_v28, %v1464_v30  ;;  %v5027_v12 = vperm.slane %v4632_v10, 7 }
 0x2ca   :  { %v4993_v31 = vadd.f32 %v1612_v57, %v4799_v4  ;;  %v1083_v15 = vpop.f32.mrf.mxu1  ;;  %888 = vst [vmem:[#allocation2 + $0x8] sm:$0xff] %v886_v25  ;;  %v1409_v4 = vadd.f32 %v4832_v42, %v1355_v8  ;;  %v6296_v42 = vld [vmem:[#allocation52_spill] sm:$0xff]  ;;  %v1336_v57 = vadd.f32 %v1306_v62, %v1250_v9  ;;  %v1445_v1 = vmul.f32 %v5018_v7, %v4314_v46  ;;  %v3291_v8 = vld [vmem:[%s6149_s15 + $0x11] ss:$2 sm:$0x3] }
 0x2cb   :  { %v1623_v3 = vmul.f32 %v1398_v32, %v1083_v15  ;;  %v1604_v32 = vadd.f32 %v4849_v36, %v1550_v17  ;;  %v5021_v53 = vperm.slane %v6296_v42, 6  ;;  %v1251_v10 = vmul.f32 %v5027_v12, %v4314_v46 }
 0x2cc   :  { %v1028_v52 = vpop.f32.mrf.mxu3  ;;  %v5046_v15 = vadd.f32 %v5008_v59, %v1336_v57  ;;  %v5064_v9 = vperm.slane %v6295_v56, 7  ;;  %v5134_v29 = vperm.slane %v3291_v8, 1 }
 0x2cd   :  { %v1611_v33 = vmul.f32 %v6293_v61, %v1028_v52  ;;  %v5012_v43 = vadd.f32 %v1623_v3, %v4929_v19  ;;  %v6298_v19 = vld [vmem:[#allocation58_spill] sm:$0xff]  ;;  %v1501_v25 = vmul.f32 %v5021_v53, %v6294_v22  ;;  %v5061_v52 = vperm.slane %v4662_v58, 7  ;;  %v1361_v58 = vld [vmem:[%s6150_s16 + $0x8] sm:$0x3] }
 0x2ce   :  { %v1109_v44 = vpop.f32.mrf.mxu2  ;;  %v5099_v18 = vperm.slane %v1361_v58, 0 }
 0x2cf   :  { %v5030_v0 = vadd.f32 %v1611_v33, %v6298_v19  ;;  %v1057_v36 = vpop.f32.mrf.mxu0  ;;  %v1624_v13 = vmul.f32 %v4933_v21, %v1109_v44  ;;  %v5049_v21 = vperm.slane %v4637_v14, 7  ;;  %v3292_v14 = vld [vmem:[%s6151_s17 + $0x10] ss:$2 sm:$0x3] }
 0x2d0   :  { %v1622_v63 = vmul.f32 %v4895_v45, %v1057_v36  ;;  %v3289_v45 = vld [vmem:[%s6149_s15 + $0x10] ss:$2 sm:$0x3]  ;;  %v1446_v36 = vmul.f32 %v5064_v9, %v4314_v46 }
 0x2d1   :  { %v5043_v28 = vadd.f32 %v1624_v13, %v4941_v60  ;;  %v1531_v60 = vadd.f32 %v1501_v25, %v1445_v1  ;;  %v1307_v62 = vmul.f32 %v5049_v21, %v6294_v22  ;;  %v3294_v1 = vld [vmem:[%s6151_s17 + $0x11] ss:$2 sm:$0x3] }
 0x2d2   :  { %v5058_v3 = vadd.f32 %v1622_v63, %v4908_v27  ;;  %v1086_v17 = vpop.f32.mrf.mxu1  ;;  %v5073_v27 = vperm.slane %v6296_v42, 7 }
 0x2d3   :  { %v1633_v33 = vmul.f32 %v1408_v50, %v1086_v17  ;;  %v5080_v19 = vadd.f32 %v5024_v39, %v1531_v60  ;;  %v5085_v50 = vperm.slane %v6297_v54, 7  ;;  %v1337_v57 = vadd.f32 %v1307_v62, %v1251_v10 }
 0x2d4   :  { %v1031_v44 = vpop.f32.mrf.mxu3  ;;  %v1502_v63 = vmul.f32 %v5073_v27, %v6294_v22  ;;  %v5095_v17 = vperm.slane %v3289_v45, 0  ;;  %v5097_v60 = vperm.slane %v3291_v8, 0  ;;  %v5101_v54 = vperm.slane %v3292_v14, 0 }
 0x2d5   :  { %v1621_v13 = vmul.f32 %v4887_v48, %v1031_v44  ;;  %v5088_v42 = vadd.f32 %v1633_v33, %v1603_v24  ;;  %v1391_v62 = vadd.f32 %v5061_v52, %v1337_v57  ;;  %v1556_v44 = vld [vmem:[%s6152_s18 + $0x8] sm:$0x3]  ;;  %v5121_v57 = vperm.slane %v3294_v1, 0  ;;  %s3974_s18 = smov 0  }
 0x2d6   :  { %v1112_v25 = vpop.f32.mrf.mxu2  ;;  %v1532_v23 = vadd.f32 %v1502_v63, %v1446_v36  ;;  %v1252_v30 = vmul.f32 %v5095_v17, %v4314_v46  ;;  %v5127_v63 = vperm.slane %v1556_v44, 0 }
 0x2d7   :  { %6299 = vst [vmem:[#allocation55_spill] sm:$0xff] %v5088_v42  ;;  %v5104_v48 = vadd.f32 %v1621_v13, %v4890_v16  ;;  %v1060_v24 = vpop.f32.mrf.mxu0  ;;  %v1634_v33 = vmul.f32 %v1409_v4, %v1112_v25  ;;  %v1308_v16 = vmul.f32 %v5097_v60, %v6294_v22  ;;  %v1447_v4 = vmul.f32 %v5101_v54, %v4314_v46 }
 0x2d8   :  { %v1632_v37 = vmul.f32 %v4968_v6, %v1060_v24  ;;  %v1586_v6 = vadd.f32 %v5085_v50, %v1532_v23  ;;  %v5140_v23 = vperm.slane %v3292_v14, 1  ;;  %v5149_v13 = vperm.slane %v3294_v1, 1 }
 0x2d9   :  { %v5117_v61 = vadd.f32 %v1634_v33, %v1604_v32  ;;  %v1338_v36 = vadd.f32 %v1308_v16, %v1252_v30  ;;  %v1503_v32 = vmul.f32 %v5121_v57, %v6294_v22  ;;  %v5132_v33 = vperm.slane %v3289_v45, 1 }
 0x2da   :  { %v5124_v25 = vadd.f32 %v1632_v37, %v4979_v55  ;;  %v1184_v10 = vpop.f32.mrf.mxu1  ;;  %v5138_v55 = vperm.slane %v1361_v58, 1  ;;  %v1309_v45 = vmul.f32 %v5134_v29, %v6294_v22  ;;  %v1448_v2 = vmul.f32 %v5140_v23, %v4314_v46 }
 0x2db   :  { %6300 = vst [vmem:[#allocation51_spill] sm:$0xff] %v5117_v61  ;;  %v1392_v37 = vadd.f32 %v5099_v18, %v1338_v36  ;;  %v1533_v16 = vadd.f32 %v1503_v32, %v1447_v4  ;;  %v1253_v24 = vmul.f32 %v5132_v33, %v4314_v46  ;;  %v5151_v36 = vperm.slane %v1556_v44, 1 }
 0x2dc   :  { %v1034_v56 = vpop.f32.mrf.mxu3  ;;  %v1260_v4 = vmul.f32 %v4997_v47, %v4304_v41  ;;  %v1455_v44 = vmul.f32 %v5018_v7, %v4304_v41 }
 0x2dd   :  { %v1631_v30 = vmul.f32 %v4948_v38, %v1034_v56  ;;  %v1617_v8 = vmul.f32 %v1392_v37, %v1184_v10  ;;  %v1587_v38 = vadd.f32 %v5127_v63, %v1533_v16  ;;  %v1339_v56 = vadd.f32 %v1309_v45, %v1253_v24  ;;  %v6301_v37 = vld [vmem:[#allocation50_spill] sm:$0xff] }
 0x2de   :  { %v1210_v49 = vpop.f32.mrf.mxu2  ;;  %v1504_v10 = vmul.f32 %v5149_v13, %v6294_v22  ;;  %v1316_v1 = vmul.f32 %v5001_v51, %v6301_v37  ;;  %v1511_v16 = vmul.f32 %v5021_v53, %v6301_v37  ;;  %v1261_v22 = vmul.f32 %v5027_v12, %v4304_v41 }
 0x2df   :  { %v5154_v14 = vadd.f32 %v1631_v30, %v4957_v20  ;;  %v1158_v58 = vpop.f32.mrf.mxu0  ;;  %v5166_v30 = vadd.f32 %v1617_v8, %v1587_v38  ;;  %v1393_v24 = vadd.f32 %v5138_v55, %v1339_v56  ;;  %v1317_v8 = vmul.f32 %v5049_v21, %v6301_v37 }
 0x2e0   :  { %v1616_v32 = vmul.f32 %v1391_v62, %v1158_v58  ;;  %v1534_v45 = vadd.f32 %v1504_v10, %v1448_v2  ;;  %v1346_v58 = vadd.f32 %v1316_v1, %v1260_v4  ;;  %v1541_v42 = vadd.f32 %v1511_v16, %v1455_v44 }
 0x2e1   :  { %6302 = vst [vmem:[#allocation52_spill] sm:$0xff] %v5166_v30  ;;  %v1618_v61 = vmul.f32 %v1393_v24, %v1210_v49  ;;  %v1456_v2 = vmul.f32 %v5064_v9, %v4304_v41  ;;  %v1347_v10 = vadd.f32 %v1317_v8, %v1261_v22  ;;  %v1512_v49 = vmul.f32 %v5073_v27, %v6301_v37 }
 0x2e2   :  { %v5171_v62 = vadd.f32 %v1616_v32, %v1586_v6  ;;  %v1588_v20 = vadd.f32 %v5151_v36, %v1534_v45  ;;  %v1400_v6 = vadd.f32 %v5008_v59, %v1346_v58  ;;  %v1595_v32 = vadd.f32 %v5024_v39, %v1541_v42  ;;  %v1187_v56 = vpop.f32.mrf.mxu1 }
 0x2e3   :  { %v1262_v44 = vmul.f32 %v5095_v17, %v4304_v41  ;;  %v1318_v24 = vmul.f32 %v5097_v60, %v6301_v37  ;;  %v1457_v16 = vmul.f32 %v5101_v54, %v4304_v41  ;;  %v1401_v42 = vadd.f32 %v5061_v52, %v1347_v10 }
 0x2e4   :  { %v1132_v38 = vpop.f32.mrf.mxu3  ;;  %v5187_v1 = vadd.f32 %v1618_v61, %v1588_v20  ;;  %v1542_v58 = vadd.f32 %v1512_v49, %v1456_v2  ;;  %v1513_v61 = vmul.f32 %v5121_v57, %v6301_v37  ;;  %v1263_v8 = vmul.f32 %v5132_v33, %v4304_v41 }
 0x2e5   :  { %v1615_v4 = vmul.f32 %v5046_v15, %v1132_v38  ;;  %v1348_v22 = vadd.f32 %v1318_v24, %v1262_v44  ;;  %v1319_v38 = vmul.f32 %v5134_v29, %v6301_v37  ;;  %v1458_v20 = vmul.f32 %v5140_v23, %v4304_v41 }
 0x2e6   :  { %6303 = vst [vmem:[#allocation53_spill] sm:$0xff] %v5187_v1  ;;  %v1543_v10 = vadd.f32 %v1513_v61, %v1457_v16  ;;  %v1514_v44 = vmul.f32 %v5149_v13, %v6301_v37  ;;  %v1213_v30 = vpop.f32.mrf.mxu2  ;;  %v1326_v16 = vmul.f32 %v5001_v51, %v4434_v40 }
 0x2e7   :  { %v5196_v45 = vadd.f32 %v1615_v4, %v5080_v19  ;;  %v1161_v15 = vpop.f32.mrf.mxu0  ;;  %v1596_v19 = vadd.f32 %v5085_v50, %v1542_v58  ;;  %v1402_v2 = vadd.f32 %v5099_v18, %v1348_v22  ;;  %v1349_v49 = vadd.f32 %v1319_v38, %v1263_v8 }
 0x2e8   :  { %v1626_v4 = vmul.f32 %v1401_v42, %v1161_v15  ;;  %v1597_v1 = vadd.f32 %v5127_v63, %v1543_v10  ;;  %v1270_v58 = vmul.f32 %v4997_v47, %v4388_v26  ;;  %v1544_v22 = vadd.f32 %v1514_v44, %v1458_v20 }
 0x2e9   :  { %v1675_v46 = vmax.f32 %v5196_v45, 0.0  ;;  %v1627_v42 = vmul.f32 %v1402_v2, %v1187_v56  ;;  %v1403_v61 = vadd.f32 %v5138_v55, %v1349_v49  ;;  %v1465_v8 = vmul.f32 %v5018_v7, %v4388_v26 }
 0x2ea   :  { %v5213_v24 = vadd.f32 %v1626_v4, %v1596_v19  ;;  %v1356_v19 = vadd.f32 %v1326_v16, %v1270_v58  ;;  %v1521_v4 = vmul.f32 %v5021_v53, %v4434_v40  ;;  %v1598_v47 = vadd.f32 %v5151_v36, %v1544_v22 }
 0x2eb   :  { %v5226_v10 = vadd.f32 %v1627_v42, %v1597_v1  ;;  %v1628_v51 = vmul.f32 %v1403_v61, %v1213_v30  ;;  %v1271_v56 = vmul.f32 %v5027_v12, %v4388_v26  ;;  %v1466_v53 = vmul.f32 %v5064_v9, %v4388_v26 }
 0x2ec   :  { %v1135_v15 = vpop.f32.mrf.mxu3  ;;  %v1686_v38 = vmax.f32 %v5213_v24, 0.0  ;;  %v1410_v20 = vadd.f32 %v5008_v59, %v1356_v19  ;;  %v1551_v7 = vadd.f32 %v1521_v4, %v1465_v8  ;;  %v1522_v30 = vmul.f32 %v5073_v27, %v4434_v40  ;;  %v1190_v19 = vpop.f32.mrf.mxu1 }
 0x2ed   :  { %v1625_v37 = vmul.f32 %v1400_v6, %v1135_v15  ;;  %v1327_v6 = vmul.f32 %v5049_v21, %v4434_v40  ;;  %v1687_v49 = vmax.f32 %v5226_v10, 0.0  ;;  %v5237_v44 = vadd.f32 %v1628_v51, %v1598_v47 }
 0x2ee   :  { %v1272_v59 = vmul.f32 %v5095_v17, %v4388_v26  ;;  %v1552_v16 = vadd.f32 %v1522_v30, %v1466_v53  ;;  %v1328_v15 = vmul.f32 %v5097_v60, %v4434_v40  ;;  %v1467_v9 = vmul.f32 %v5101_v54, %v4388_v26  ;;  %v1216_v47 = vpop.f32.mrf.mxu2 }
 0x2ef   :  { %v5231_v2 = vadd.f32 %v1625_v37, %v1595_v32  ;;  %v1605_v32 = vadd.f32 %v5024_v39, %v1551_v7  ;;  %v1357_v1 = vadd.f32 %v1327_v6, %v1271_v56  ;;  %v1688_v21 = vmax.f32 %v5237_v44, 0.0  ;;  %v1164_v58 = vpop.f32.mrf.mxu0 }
 0x2f0   :  { %v1523_v42 = vmul.f32 %v5121_v57, %v4434_v40  ;;  %v1273_v39 = vmul.f32 %v5132_v33, %v4388_v26  ;;  %v1329_v17 = vmul.f32 %v5134_v29, %v4434_v40  ;;  %v1606_v22 = vadd.f32 %v5085_v50, %v1552_v16 }
 0x2f1   :  { %v1685_v12 = vmax.f32 %v5231_v2, 0.0  ;;  %v1411_v27 = vadd.f32 %v5061_v52, %v1357_v1  ;;  %v1358_v8 = vadd.f32 %v1328_v15, %v1272_v59  ;;  %v1468_v60 = vmul.f32 %v5140_v23, %v4388_v26 }
 0x2f2   :  { %v1524_v54 = vmul.f32 %v5149_v13, %v4434_v40  ;;  %v1553_v57 = vadd.f32 %v1523_v42, %v1467_v9  ;;  %v1359_v4 = vadd.f32 %v1329_v17, %v1273_v39 }
 0x2f3   :  { %v1636_v37 = vmul.f32 %v1411_v27, %v1164_v58  ;;  %v1412_v33 = vadd.f32 %v5099_v18, %v1358_v8 }
 0x2f4   :  { %v1138_v61 = vpop.f32.mrf.mxu3  ;;  %v1554_v51 = vadd.f32 %v1524_v54, %v1468_v60  ;;  %v1607_v50 = vadd.f32 %v5127_v63, %v1553_v57  ;;  %v1413_v23 = vadd.f32 %v5138_v55, %v1359_v4 }
 0x2f5   :  { %v1635_v52 = vmul.f32 %v1410_v20, %v1138_v61  ;;  %v5267_v56 = vadd.f32 %v1636_v37, %v1606_v22  ;;  %v1637_v7 = vmul.f32 %v1412_v33, %v1190_v19 }
 0x2f6   :  { %v1608_v13 = vadd.f32 %v5151_v36, %v1554_v51  ;;  %v1638_v53 = vmul.f32 %v1413_v23, %v1216_v47 }
 0x2f7   :  { %v5265_v29 = vadd.f32 %v1635_v52, %v1605_v32  ;;  %v5274_v30 = vadd.f32 %v1637_v7, %v1607_v50 }
 0x2f8   :  { %v5276_v18 = vadd.f32 %v1638_v53, %v1608_v13 }
 0x2f9   :  { %v1695_v20 = vmax.f32 %v5265_v29, 0.0 }
 0x2fa LB: > { %s1705_s21 = sld [smem:[#allocation6 + %s3976_s18]]  ;;  %s1708_s25 = scalar_lea.vmem [#allocation4], %s3976_s18  ;;  %s3976_s18 = sphi %s3974_s18, %s1704_s18  }
 0x2fb   : > { %s1704_s18 = sadd.s32 1, %s3976_s18  }
 0x2fc   : > { %p1701_p2 = scmp.ge.s32.totalorder %s1704_s18, 20  }
 0x2fd   :  { %v6304_v55 = vmov (%p1701_p2), 0   ;;  %v6305_v16 = vmov (%p1701_p2), 0.0   ;;  %v6306_v15 = vmov (%p1701_p2), 1   ;;  %v6307_v9 = vmov (%p1701_p2), 2   ;;  %v6329_v24 = vld [vmem:[#allocation55_spill] sm:$0xff] (%p1701_p2)  ;;  %s3978_s26 = smov (%p1701_p2), 0  }
 0x2fe   :  { %1703 = sbr.rel (!%p1701_p2) target bundleno = 762 (0x2fa), region = 286  ;;  %3467 = vset.pattern.permute.xlu1 (%p1701_p2), %v6304_v55  ;;  %3466 = vset.pattern.permute.xlu0 (%p1701_p2), %v6304_v55  ;;  %1896 = vst [vmem:[#allocation3] sm:$0xff] (%p1701_p2), %v6305_v16  ;;  %v6308_v27 = vmov (%p1701_p2), 3   ;;  %v6228_v42 = vmov (%p1701_p2), 5   ;;  %v6226_v39 = vmov (%p1701_p2), 4   ;;  %v6224_v17 = vmov (%p1701_p2), 7  }
 0x2ff   :  { %1897 = vst [vmem:[#allocation3 + $0x8] sm:$0xff] (%p1701_p2), %v6305_v16  ;;  %3469 = vset.pattern.permute.xlu2 (%p1701_p2), %v6306_v15  ;;  %v6222_v61 = vmov (%p1701_p2), 8   ;;  %v6220_v22 = vmov (%p1701_p2), 6   ;;  %v6218_v8 = vmov (%p1701_p2), 9   ;;  %v6309_v37 = vmax.f32 (%p1701_p2), %v4938_v35, 0.0 }
 0x300   : > { %s1706_s7 = scalar_lea.vmem [#allocation2], %s1705_s21  ;;  %v6310_v4 = vmax.f32 (%p1701_p2), %v4915_v34, 0.0  ;;  %v6311_v47 = vmax.f32 (%p1701_p2), %v5154_v14, 0.0  ;;  %v6312_v14 = vld [vmem:[#allocation61_spill] sm:$0xff] (%p1701_p2)  ;;  %v6318_v32 = vmax.f32 (%p1701_p2), %v5012_v43, 0.0  ;;  %v6326_v2 = vmax.f32 (%p1701_p2), %v4965_v11, 0.0 }
 0x301   : > { %v1707_v63 = vld [vmem:[%s1706_s7] sm:$0x1]  ;;  %v6339_v29 = vmax.f32 (%p1701_p2), %v5274_v30, 0.0 }
 0x302   : > { %1709 = vst [vmem:[%s1708_s25] sm:$0x1] %v1707_v63 }
 0x309   :  { %v5282_v36 = vld [vmem:[#allocation4 + $0x10] sm:$0xff]  ;;  %v1710_v59 = vld [vmem:[#allocation4] sm:$0xff]  ;;  %v1711_v58 = vld [vmem:[#allocation4 + $0x8] sm:$0xff] }
 0x30a   :  { %1725 = vperm.xlu1 %3467, %v5282_v36   ;;  %1715 = vperm.xlu0 %3466, %v1710_v59  }
 0x30b   :  { %1736 = vperm.xlu2 %3469, %v1711_v58  }
 0x312   :  { %3468 = vset.pattern.permute.xlu1 %v6306_v15  ;;  %1720 = vperm.xlu0 %3466, %v1711_v58  }
 0x313   :  { %1732 = vperm.xlu1 %3468, %v1710_v59   ;;  %1740 = vperm.xlu2 %3469, %v5282_v36  }
 0x31a   :  { %3470 = vset.pattern.permute.xlu0 %v6307_v9 }
 0x31b   :  { %3471 = vset.pattern.permute.xlu1 %v6307_v9  ;;  %1750 = vperm.xlu0 %3470, %v1710_v59  }
 0x31c   :  { %1754 = vperm.xlu1 %3471, %v1711_v58   ;;  %3472 = vset.pattern.permute.xlu2 %v6307_v9 }
 0x31d   :  { %1758 = vperm.xlu2 %3472, %v5282_v36  }
 0x323   :  { %3475 = vset.pattern.permute.xlu0 %v6308_v27 }
 0x324   :  { %3473 = vset.pattern.permute.xlu1 %v6308_v27  ;;  %1776 = vperm.xlu0 %3475, %v5282_v36  }
 0x325   :  { %1768 = vperm.xlu1 %3473, %v1710_v59   ;;  %3474 = vset.pattern.permute.xlu2 %v6308_v27 }
 0x326   :  { %1772 = vperm.xlu2 %3474, %v1711_v58  }
 0x32c   :  { %3479 = vset.pattern.permute.xlu0 %v6228_v42 }
 0x32d   :  { %3476 = vset.pattern.permute.xlu1 %v6226_v39  ;;  %1808 = vperm.xlu0 %3479, %v1711_v58  }
 0x32e   :  { %1786 = vperm.xlu1 %3476, %v1710_v59   ;;  %3477 = vset.pattern.permute.xlu2 %v6226_v39 }
 0x32f   :  { %1790 = vperm.xlu2 %3477, %v1711_v58  }
 0x335   :  { %3483 = vset.pattern.permute.xlu0 %v6224_v17 }
 0x336   :  { %1794 = vperm.xlu1 %3476, %v5282_v36   ;;  %1840 = vperm.xlu0 %3483, %v1710_v59  }
 0x337   :  { %3478 = vset.pattern.permute.xlu2 %v6228_v42 }
 0x338   :  { %1804 = vperm.xlu2 %3478, %v1710_v59  }
 0x33e   :  { %3480 = vset.pattern.permute.xlu1 %v6228_v42  ;;  %3488 = vset.pattern.permute.xlu0 %v6222_v61 }
 0x33f   :  { %1812 = vperm.xlu1 %3480, %v5282_v36   ;;  %1866 = vperm.xlu0 %3488, %v5282_v36  }
 0x340   :  { %3481 = vset.pattern.permute.xlu2 %v6220_v22 }
 0x341   :  { %1822 = vperm.xlu2 %3481, %v1710_v59  }
 0x347   :  { %3482 = vset.pattern.permute.xlu1 %v6220_v22  ;;  %3491 = vset.pattern.permute.xlu0 %v6218_v8 }
 0x348   :  { %1826 = vperm.xlu1 %3482, %v1711_v58  }
 0x349   :  { %1830 = vperm.xlu2 %3481, %v5282_v36  }
 0x350   :  { %3484 = vset.pattern.permute.xlu1 %v6224_v17 }
 0x351   :  { %1844 = vperm.xlu1 %3484, %v1711_v58   ;;  %3485 = vset.pattern.permute.xlu2 %v6224_v17 }
 0x352   :  { %1848 = vperm.xlu2 %3485, %v5282_v36  }
 0x359   :  { %3486 = vset.pattern.permute.xlu1 %v6222_v61 }
 0x35a   :  { %1858 = vperm.xlu1 %3486, %v1710_v59   ;;  %3487 = vset.pattern.permute.xlu2 %v6222_v61 }
 0x35b   :  { %1862 = vperm.xlu2 %3487, %v1711_v58  }
 0x362   :  { %3489 = vset.pattern.permute.xlu1 %v6218_v8 }
 0x363   :  { %1876 = vperm.xlu1 %3489, %v1710_v59   ;;  %3490 = vset.pattern.permute.xlu2 %v6218_v8  ;;  %v6317_v8 = vmax.f32 %v5058_v3, 0.0 }
 0x364   :  { %1880 = vperm.xlu2 %3490, %v1711_v58  }
 0x365   :  { %v1737_v60 = vpop.permute.xlu2 %1736 }
 0x36b   :  { %1884 = vperm.xlu1 %3489, %v5282_v36  }
 0x36d   :  { %v1741_v54 = vpop.permute.xlu2 %1740 }
 0x36e   :  { %v1745_v19 = vmul.f32 %v1741_v54, %v6309_v37 }
 0x377   :  { %v1759_v52 = vpop.permute.xlu2 %1758 }
 0x378   :  { %v1763_v51 = vmul.f32 %v1759_v52, %v6311_v47  ;;  %v6313_v52 = vmax.f32 %v6312_v14, 0.0  ;;  %v6316_v47 = vmax.f32 %v5104_v48, 0.0  ;;  %v6322_v48 = vld [vmem:[#allocation59_spill] sm:$0xff] }
 0x37c   :  { %v1726_v57 = vpop.permute.xlu1 %1725  ;;  %v1716_v55 = vpop.permute.xlu0 %1715 }
 0x37d   :  { %v1730_v33 = vmul.f32 %v1726_v57, %v6310_v4  ;;  %v6314_v57 = vld [vmem:[#allocation60_spill] sm:$0xff] }
 0x37e   :  { %v6315_v4 = vmax.f32 %v6314_v57, 0.0 }
 0x37f   :  { %v1748_v50 = vadd.f32 %v1745_v19, %v1730_v33  ;;  %v1744_v19 = vmul.f32 %v1737_v60, %v6313_v52  ;;  %v6319_v60 = vmax.f32 %v5043_v28, 0.0  ;;  %v6320_v52 = vld [vmem:[#allocation57_spill] sm:$0xff]  ;;  %v6325_v28 = vmax.f32 %v4993_v31, 0.0 }
 0x380   :  { %v1773_v7 = vpop.permute.xlu2 %1772  ;;  %v6327_v31 = vmax.f32 %v5124_v25, 0.0 }
 0x381   :  { %v1766_v23 = vadd.f32 %v1763_v51, %v1748_v50  ;;  %v1780_v22 = vmul.f32 %v1773_v7, %v6317_v8  ;;  %v6324_v8 = vmax.f32 %v5030_v0, 0.0 }
 0x384   :  { %v1721_v58 = vpop.permute.xlu0 %1720 }
 0x385   :  { %v1733_v13 = vpop.permute.xlu1 %1732  ;;  %v1729_v33 = vmul.f32 %v1721_v58, %v6315_v4  ;;  %v6321_v58 = vmax.f32 %v6320_v52, 0.0 }
 0x387   :  { %v1747_v50 = vadd.f32 %v1744_v19, %v1729_v33  ;;  %v1728_v57 = vmul.f32 %v1716_v55, %v6321_v58  ;;  %v6328_v33 = vmax.f32 %v4986_v5, 0.0  ;;  %v6333_v5 = vmax.f32 %v5171_v62, 0.0  ;;  %v6334_v58 = vld [vmem:[#allocation52_spill] sm:$0xff] }
 0x389   :  { %v1791_v53 = vpop.permute.xlu2 %1790 }
 0x38a   :  { %v1798_v6 = vmul.f32 %v1791_v53, %v6318_v32 }
 0x38d   :  { %v1751_v15 = vpop.permute.xlu0 %1750 }
 0x38e   :  { %v1755_v63 = vpop.permute.xlu1 %1754  ;;  %v1761_v7 = vmul.f32 %v1751_v15, %v6324_v8 }
 0x38f   :  { %v1762_v51 = vmul.f32 %v1755_v63, %v6316_v47  ;;  %v6323_v63 = vmax.f32 %v6322_v48, 0.0 }
 0x391   :  { %v1765_v61 = vadd.f32 %v1762_v51, %v1747_v50  ;;  %v1743_v19 = vmul.f32 %v1733_v13, %v6323_v63 }
 0x392   :  { %v1805_v36 = vpop.permute.xlu2 %1804 }
 0x393   :  { %v1783_v1 = vadd.f32 %v1780_v22, %v1765_v61  ;;  %v1746_v22 = vadd.f32 %v1743_v19, %v1728_v57  ;;  %v1815_v10 = vmul.f32 %v1805_v36, %v6328_v33  ;;  %v6335_v57 = vmax.f32 %v6334_v58, 0.0 }
 0x395   :  { %v1801_v4 = vadd.f32 %v1798_v6, %v1783_v1  ;;  %v1764_v1 = vadd.f32 %v1761_v7, %v1746_v22  ;;  %v6340_v22 = vmax.f32 %v5276_v18, 0.0 }
 0x396   :  { %v1777_v34 = vpop.permute.xlu0 %1776 }
 0x397   :  { %v1769_v59 = vpop.permute.xlu1 %1768 }
 0x39b   :  { %v1823_v16 = vpop.permute.xlu2 %1822 }
 0x39c   :  { %v1833_v44 = vmul.f32 %v1823_v16, %v1675_v46  ;;  %v6336_v46 = vmax.f32 %v5267_v56, 0.0 }
 0x39f   :  { %v1809_v42 = vpop.permute.xlu0 %1808 }
 0x3a0   :  { %v1787_v35 = vpop.permute.xlu1 %1786  ;;  %v1816_v14 = vmul.f32 %v1809_v42, %v6319_v60  ;;  %v1779_v42 = vmul.f32 %v1769_v59, %v6325_v28  ;;  %v1781_v59 = vmul.f32 %v1777_v34, %v6327_v31 }
 0x3a2   :  { %v1819_v61 = vadd.f32 %v1816_v14, %v1801_v4  ;;  %v1782_v13 = vadd.f32 %v1779_v42, %v1764_v1  ;;  %v1784_v51 = vadd.f32 %v1781_v59, %v1766_v23 }
 0x3a3   :  { %v1831_v9 = vpop.permute.xlu2 %1830 }
 0x3a4   :  { %v1835_v52 = vmul.f32 %v1831_v9, %v1695_v20 }
 0x3a8   :  { %v1795_v27 = vpop.permute.xlu1 %1794 }
 0x3ac   :  { %v1849_v37 = vpop.permute.xlu2 %1848 }
 0x3ad   :  { %v1853_v45 = vmul.f32 %v1849_v37, %v6336_v46 }
 0x3b1   :  { %v1813_v54 = vpop.permute.xlu1 %1812 }
 0x3b5   :  { %v1863_v17 = vpop.permute.xlu2 %1862 }
 0x3b6   :  { %v1870_v55 = vmul.f32 %v1863_v17, %v1687_v49 }
 0x3ba   :  { %v1827_v39 = vpop.permute.xlu1 %1826 }
 0x3bb   :  { %v1834_v3 = vmul.f32 %v1827_v39, %v1685_v12  ;;  %v1797_v12 = vmul.f32 %v1787_v35, %v6326_v2  ;;  %v1841_v35 = vpop.permute.xlu0 %1840 }
 0x3bc   :  { %v1851_v36 = vmul.f32 %v1841_v35, %v6333_v5 }
 0x3bd   :  { %v1837_v53 = vadd.f32 %v1834_v3, %v1819_v61  ;;  %v1800_v49 = vadd.f32 %v1797_v12, %v1782_v13 }
 0x3be   :  { %v1881_v32 = vpop.permute.xlu2 %1880 }
 0x3bf   :  { %v1888_v39 = vmul.f32 %v1881_v32, %v1688_v21  ;;  %v1818_v50 = vadd.f32 %v1815_v10, %v1800_v49  ;;  %v6331_v21 = vld [vmem:[#allocation51_spill] sm:$0xff] }
 0x3c0   :  { %v6332_v60 = vmax.f32 %v6331_v21, 0.0 }
 0x3c1   :  { %v1836_v14 = vadd.f32 %v1833_v44, %v1818_v50 }
 0x3c2   :  { %v1817_v25 = vmul.f32 %v1813_v54, %v6332_v60  ;;  %v6337_v54 = vld [vmem:[#allocation53_spill] sm:$0xff] }
 0x3c3   :  { %v1845_v43 = vpop.permute.xlu1 %1844  ;;  %v1854_v23 = vadd.f32 %v1851_v36, %v1836_v14  ;;  %v6338_v4 = vmax.f32 %v6337_v54, 0.0  ;;  %v1867_v62 = vpop.permute.xlu0 %1866 }
 0x3c4   :  { %v1852_v6 = vmul.f32 %v1845_v43, %v1686_v38  ;;  %v6330_v38 = vmax.f32 %v6329_v24, 0.0  ;;  %v1871_v20 = vmul.f32 %v1867_v62, %v6339_v29 }
 0x3c6   :  { %v1855_v0 = vadd.f32 %v1852_v6, %v1837_v53  ;;  %v1799_v47 = vmul.f32 %v1795_v27, %v6330_v38 }
 0x3c8   :  { %v1873_v15 = vadd.f32 %v1870_v55, %v1855_v0  ;;  %v1802_v34 = vadd.f32 %v1799_v47, %v1784_v51 }
 0x3ca   :  { %v1891_v17 = vadd.f32 %v1888_v39, %v1873_v15  ;;  %v1820_v27 = vadd.f32 %v1817_v25, %v1802_v34 }
 0x3cc   :  { %1894 = vst [vmem:[#allocation5 + $0x8] sm:$0xff] %v1891_v17  ;;  %v1859_v11 = vpop.permute.xlu1 %1858  ;;  %v1838_v19 = vadd.f32 %v1835_v52, %v1820_v27 }
 0x3cd   :  { %v1869_v48 = vmul.f32 %v1859_v11, %v6335_v57 }
 0x3ce   :  { %v1856_v7 = vadd.f32 %v1853_v45, %v1838_v19 }
 0x3cf   :  { %v1872_v16 = vadd.f32 %v1869_v48, %v1854_v23 }
 0x3d0   :  { %v1874_v61 = vadd.f32 %v1871_v20, %v1856_v7 }
 0x3d5   :  { %v1877_v63 = vpop.permute.xlu1 %1876 }
 0x3d6   :  { %v1887_v3 = vmul.f32 %v1877_v63, %v6338_v4 }
 0x3d8   :  { %v1890_v8 = vadd.f32 %v1887_v3, %v1872_v16 }
 0x3da   :  { %1893 = vst [vmem:[#allocation5] sm:$0xff] %v1890_v8 }
 0x3dd   :  { %v1885_v9 = vpop.permute.xlu1 %1884 }
 0x3de   :  { %v1889_v43 = vmul.f32 %v1885_v9, %v6340_v22 }
 0x3e0   :  { %v1892_v32 = vadd.f32 %v1889_v43, %v1874_v61 }
 0x3e2   :  { %1895 = vst [vmem:[#allocation5 + $0x10] sm:$0xff] %v1892_v32 }
 0x3e3 LB: > { %s1904_s20 = sld [smem:[#allocation10 + %s3980_s26]]  ;;  %s1907_s12 = scalar_lea.vmem [#allocation5], %s3980_s26  ;;  %s3980_s26 = sphi %s3978_s26, %s1903_s26  }
 0x3e4   : > { %s1903_s26 = sadd.s32 1, %s3980_s26  }
 0x3e5   : > { %p1900_p3 = scmp.ge.s32.totalorder %s1903_s26, 20  }
 0x3e6   :  { %v1932_v30 = vld [vmem:[#allocation25 + $0x78] sm:$0xff] (%p1900_p3)  ;;  %v1931_v18 = vld [vmem:[#allocation25 + $0x70] sm:$0xff] (%p1900_p3)  ;;  %v1930_v42 = vld [vmem:[#allocation25 + $0x68] sm:$0xff] (%p1900_p3)  ;;  %s6358_s14 = sld [smem:[#allocation75_spill]] (%p1900_p3) }
 0x3e7   :  { %1933 = vmatpush.msra.mxu3 (%p1900_p3), %v1932_v30  ;;  %v1929_v53 = vld [vmem:[#allocation25 + $0x60] sm:$0xff] (%p1900_p3)  ;;  %v1998_v55 = vld [vmem:[#allocation27 + $0xf0] sm:$0x1] (%p1900_p3)  ;;  %v1999_v6 = vld [vmem:[#allocation27 + $0xf8] sm:$0x1] (%p1900_p3) }
 0x3e8   :  { %3295 = vmatpush.msk.msra.mxu0 (%p1900_p3), %vm380_vm0, %v1998_v55  ;;  %v1988_v1 = vld [vmem:[#allocation27 + $0xa0] sm:$0xff] (%p1900_p3)  ;;  %v1989_v2 = vld [vmem:[#allocation27 + $0xa8] sm:$0xff] (%p1900_p3)  ;;  %v1928_v12 = vld [vmem:[#allocation25 + $0x58] sm:$0xff] (%p1900_p3)  ;;  %3299 = vmatpush.msk.msra.mxu1 (%p1900_p3), %vm380_vm0, %v1999_v6 }
 0x3e9   : > { %v1908_v56 = vld [vmem:[%s1907_s12] sm:$0x1]  ;;  %s1905_s1 = scalar_lea.vmem [#allocation3], %s1904_s20  ;;  %1902 = sbr.rel (!%p1900_p3) target bundleno = 995 (0x3e3), region = 297  ;;  %1934 = vmatpush.msra.mxu3 (%p1900_p3), %v1931_v18  ;;  %v1978_v0 = vld [vmem:[#allocation27 + $0x50] sm:$0xff] (%p1900_p3)  ;;  %v1979_v39 = vld [vmem:[#allocation27 + $0x58] sm:$0xff] (%p1900_p3) }
 0x3ea   : > { %v1906_v37 = vld [vmem:[%s1905_s1] sm:$0x1]  ;;  %2051 = vmatpush.msra.mxu0 (%p1900_p3), %v1988_v1  ;;  %v1927_v13 = vld [vmem:[#allocation25 + $0x50] sm:$0xff] (%p1900_p3)  ;;  %2077 = vmatpush.msra.mxu1 (%p1900_p3), %v1989_v2  ;;  %v1969_v31 = vld [vmem:[#allocation27 + $0x8] sm:$0xff] (%p1900_p3) }
 0x3eb   : > { %v1909_v28 = vadd.f32 %v1908_v56, %v1906_v37  ;;  %1935 = vmatpush.msra.mxu3 (%p1900_p3), %v1930_v42  ;;  %v1968_v15 = vld [vmem:[#allocation27] sm:$0xff] (%p1900_p3)  ;;  %v1926_v59 = vld [vmem:[#allocation25 + $0x48] sm:$0xff] (%p1900_p3)  ;;  %v2002_v33 = vld [vmem:[#allocation27 + $0x110] sm:$0x1] (%p1900_p3) }
 0x3ec   :  { %2052 = vmatpush.msra.mxu0 (%p1900_p3), %v1978_v0  ;;  %2078 = vmatpush.msra.mxu1 (%p1900_p3), %v1979_v39  ;;  %v2003_v10 = vld [vmem:[#allocation27 + $0x118] sm:$0x1] (%p1900_p3)  ;;  %v1925_v49 = vld [vmem:[#allocation25 + $0x40] sm:$0xff] (%p1900_p3)  ;;  %v1993_v47 = vld [vmem:[#allocation27 + $0xc8] sm:$0xff] (%p1900_p3) }
 0x3ed   : > { %1910 = vst [vmem:[%s1905_s1] sm:$0x1] %v1909_v28  ;;  %1936 = vmatpush.msra.mxu3 (%p1900_p3), %v1929_v53  ;;  %v6341_v17 = vld [vmem:[#allocation45_spill] sm:$0xff] (%p1900_p3)  ;;  %v2000_v24 = vld [vmem:[#allocation27 + $0x100] sm:$0x1] (%p1900_p3)  ;;  %v1973_v60 = vld [vmem:[#allocation27 + $0x28] sm:$0xff] (%p1900_p3) }
 0x3ee   :  { %2053 = vmatpush.msra.mxu0 %v1968_v15  ;;  %2079 = vmatpush.msra.mxu1 %v1969_v31  ;;  %v1992_v38 = vld [vmem:[#allocation27 + $0xc0] sm:$0xff]  ;;  %v1924_v11 = vld [vmem:[#allocation25 + $0x38] sm:$0xff]  ;;  %v1990_v35 = vld [vmem:[#allocation27 + $0xb0] sm:$0xff] }
 0x3ef   :  { %1937 = vmatpush.msra.mxu3 %v1928_v12  ;;  %3296 = vmatmul.msk.f32.vlgmr.msra.gmra.mxu0 %vm370_vm1, %v6341_v17  ;;  %v1982_v51 = vld [vmem:[#allocation27 + $0x70] sm:$0xff]  ;;  %v1983_v50 = vld [vmem:[#allocation27 + $0x78] sm:$0xff]  ;;  %v1980_v21 = vld [vmem:[#allocation27 + $0x60] sm:$0xff] }
 0x3f0   :  { %3300 = vmatmul.msk.f32.vlgmr.msra.gmra.mxu1 %vm370_vm1, %v6341_v17  ;;  %3311 = vmatpush.msk.msrb.mxu0 %vm380_vm0, %v2002_v33  ;;  %v1923_v44 = vld [vmem:[#allocation25 + $0x30] sm:$0xff]  ;;  %v1922_v25 = vld [vmem:[#allocation25 + $0x28] sm:$0xff]  ;;  %v1972_v5 = vld [vmem:[#allocation27 + $0x20] sm:$0xff] }
 0x3f1   :  { %1938 = vmatpush.msra.mxu3 %v1927_v13  ;;  %3315 = vmatpush.msk.msrb.mxu1 %vm380_vm0, %v2003_v10  ;;  %v1970_v34 = vld [vmem:[#allocation27 + $0x10] sm:$0xff]  ;;  %v1921_v36 = vld [vmem:[#allocation25 + $0x20] sm:$0xff]  ;;  %v1920_v58 = vld [vmem:[#allocation25 + $0x18] sm:$0xff] }
 0x3f2   :  { %3303 = vmatpush.msk.msra.mxu2 %vm380_vm0, %v2000_v24  ;;  %2155 = vmatpush.msrb.mxu0 %v1992_v38  ;;  %v6342_v14 = vld [vmem:[#allocation46_spill] sm:$0xff]  ;;  %v2006_v27 = vld [vmem:[#allocation27 + $0x130] sm:$0x1]  ;;  %v2007_v57 = vld [vmem:[#allocation27 + $0x138] sm:$0x1] }
 0x3f3   :  { %1939 = vmatpush.msra.mxu3 %v1926_v59  ;;  %2181 = vmatpush.msrb.mxu1 %v1993_v47  ;;  %v2004_v52 = vld [vmem:[#allocation27 + $0x120] sm:$0x1]  ;;  %v1994_v48 = vld [vmem:[#allocation27 + $0xd0] sm:$0xff]  ;;  %v1997_v46 = vld [vmem:[#allocation27 + $0xe8] sm:$0xff] }
 0x3f4   :  { %2103 = vmatpush.msra.mxu2 %v1990_v35  ;;  %2156 = vmatpush.msrb.mxu0 %v1982_v51  ;;  %v1919_v23 = vld [vmem:[#allocation25 + $0x10] sm:$0xff]  ;;  %v1996_v63 = vld [vmem:[#allocation27 + $0xe0] sm:$0xff]  ;;  %v1918_v45 = vld [vmem:[#allocation25 + $0x8] sm:$0xff] }
 0x3f5   :  { %1940 = vmatpush.msra.mxu3 %v1925_v49  ;;  %2182 = vmatpush.msrb.mxu1 %v1983_v50  ;;  %v1984_v19 = vld [vmem:[#allocation27 + $0x80] sm:$0xff]  ;;  %v2001_v3 = vld [vmem:[#allocation27 + $0x108] sm:$0x1]  ;;  %v1991_v62 = vld [vmem:[#allocation27 + $0xb8] sm:$0xff] }
 0x3f6   :  { %2104 = vmatpush.msra.mxu2 %v1980_v21  ;;  %2157 = vmatpush.msrb.mxu0 %v1972_v5  ;;  %v1917_v16 = vld [vmem:[#allocation25] sm:$0xff]  ;;  %v1974_v8 = vld [vmem:[#allocation27 + $0x30] sm:$0xff]  ;;  %v1987_v29 = vld [vmem:[#allocation27 + $0x98] sm:$0xff] }
 0x3f7   :  { %1941 = vmatpush.msra.mxu3 %v1924_v11  ;;  %3297 = vmatmul.msk.f32.gmra.mxu0 %vm370_vm1, %v6342_v14  ;;  %v6343_v54 = vld [vmem:[#allocation47_spill] sm:$0xff]  ;;  %v1986_v7 = vld [vmem:[#allocation27 + $0x90] sm:$0xff]  ;;  %v1971_v9 = vld [vmem:[#allocation27 + $0x18] sm:$0xff] }
 0x3f8   :  { %2183 = vmatpush.msrb.mxu1 %v1973_v60  ;;  %2105 = vmatpush.msra.mxu2 %v1970_v34  ;;  %v1911_v4 = vld [vmem:[#allocation2] sm:$0xff]  ;;  %v1912_v61 = vld [vmem:[#allocation2 + $0x8] sm:$0xff]  ;;  %v1995_v43 = vld [vmem:[#allocation27 + $0xd8] sm:$0xff] }
 0x3f9   :  { %1942 = vmatpush.msra.mxu3 %v1923_v44  ;;  %3301 = vmatmul.msk.f32.gmra.mxu1 %vm370_vm1, %v6342_v14  ;;  %v1981_v20 = vld [vmem:[#allocation27 + $0x68] sm:$0xff]  ;;  %v1976_v32 = vld [vmem:[#allocation27 + $0x40] sm:$0xff]  ;;  %v1975_v28 = vld [vmem:[#allocation27 + $0x38] sm:$0xff] }
 0x3fa   :  { %3304 = vmatmul.msk.f32.vlgmr.msra.gmra.mxu2 %vm370_vm1, %v6341_v17  ;;  %3327 = vmatpush.msk.msra.mxu0 %vm380_vm0, %v2006_v27  ;;  %v2005_v22 = vld [vmem:[#allocation27 + $0x128] sm:$0x1]  ;;  %v5458_v18 = vld [vmem:[%s6156_s22 + $0x1] ss:$2 sm:$0xff]  ;;  %v6346_v59 = vld [vmem:[#allocation49_spill] sm:$0xff] }
 0x3fb   :  { %1943 = vmatpush.msra.mxu3 %v1922_v25  ;;  %3319 = vmatpush.msk.msrb.mxu2 %vm380_vm0, %v2004_v52  ;;  %v1977_v56 = vld [vmem:[#allocation27 + $0x48] sm:$0xff]  ;;  %v2359_v6 = vperm.slane %v5458_v18, 0  ;;  %v2360_v0 = vperm.slane %v5458_v18, 1  ;;  %v5480_v10 = vld [vmem:[#allocation28] sm:$0xff] }
 0x3fc   :  { %3331 = vmatpush.msk.msra.mxu1 %vm380_vm0, %v2007_v57  ;;  %2259 = vmatpush.msra.mxu0 %v1996_v63  ;;  %v1985_v37 = vld [vmem:[#allocation27 + $0x88] sm:$0xff]  ;;  %v6348_v50 = vld [vmem:[#allocation50_spill] sm:$0xff]  ;;  %v2443_v60 = vperm.slane %v5480_v10, 0 }
 0x3fd   :  { %1944 = vmatpush.msra.mxu3 %v1921_v36  ;;  %2207 = vmatpush.msrb.mxu2 %v1994_v48  ;;  %v5453_v30 = vld [vmem:[%s6156_s22] ss:$2 sm:$0xff]  ;;  %v5468_v53 = vld [vmem:[%s6158_s24 + $0x1] ss:$2 sm:$0xff]  ;;  %v2379_v33 = vmul.f32 %v2359_v6, %v6346_v59  ;;  %v2380_v38 = vmul.f32 %v2360_v0, %v6346_v59  ;;  %v2389_v44 = vmul.f32 %v2359_v6, %v6348_v50  ;;  %v1913_v48 = vld [vmem:[#allocation3] sm:$0xff] }
 0x3fe   :  { %2285 = vmatpush.msra.mxu1 %v1997_v46  ;;  %2260 = vmatpush.msra.mxu0 %v1986_v7  ;;  %v5463_v42 = vld [vmem:[%s6158_s24] ss:$2 sm:$0xff]  ;;  %6344 = vst [vmem:[#allocation58_spill] sm:$0xff] %v5468_v53  ;;  %v2303_v55 = vperm.slane %v5453_v30, 0  ;;  %v2554_v2 = vperm.slane %v5468_v53, 0  ;;  %v2304_v12 = vperm.slane %v5453_v30, 1  ;;  %v2390_v34 = vmul.f32 %v2360_v0, %v6348_v50 }
 0x3ff   :  { %1945 = vmatpush.msra.mxu3 %v1920_v58  ;;  %3298 = vmatmul.msk.f32.gmra.mxu0 %vm370_vm1, %v6343_v54  ;;  %v2498_v1 = vperm.slane %v5463_v42, 0  ;;  %v2499_v39 = vperm.slane %v5463_v42, 1  ;;  %v2555_v13 = vperm.slane %v5468_v53, 1  ;;  %v6345_v15 = vld [vmem:[#allocation48_spill] sm:$0xff]  ;;  %v2444_v58 = vperm.slane %v5480_v10, 1 }
 0x400   :  { %2208 = vmatpush.msrb.mxu2 %v1984_v19  ;;  %2286 = vmatpush.msra.mxu1 %v1987_v29  ;;  %v2323_v31 = vmul.f32 %v2303_v55, %v6345_v15  ;;  %v2324_v24 = vmul.f32 %v2304_v12, %v6345_v15  ;;  %v5486_v47 = vld [vmem:[#allocation30] sm:$0xff]  ;;  %v2333_v51 = vmul.f32 %v2303_v55, %v4304_v41 }
 0x401   :  { %1946 = vmatpush.msra.mxu3 %v1919_v23  ;;  %3302 = vmatmul.msk.f32.gmra.mxu1 %vm370_vm1, %v6343_v54  ;;  %v2518_v49 = vmul.f32 %v2498_v1, %v6345_v15  ;;  %6347 = vst [vmem:[#allocation61_spill] sm:$0xff] %v5486_v47  ;;  %v2519_v11 = vmul.f32 %v2499_v39, %v6345_v15  ;;  %v2638_v27 = vperm.slane %v5486_v47, 0  ;;  %v2639_v57 = vperm.slane %v5486_v47, 1 }
 0x402   :  { %3305 = vmatmul.msk.f32.gmra.mxu2 %vm370_vm1, %v6342_v14  ;;  %2261 = vmatpush.msra.mxu0 %v1976_v32  ;;  %v2575_v35 = vmul.f32 %v2555_v13, %v6346_v59  ;;  %v2409_v21 = vadd.f32 %v2379_v33, %v2323_v31  ;;  %v2334_v25 = vmul.f32 %v2304_v12, %v4304_v41 }
 0x403   :  { %1947 = vmatpush.msra.mxu3 %v1918_v45  ;;  %2209 = vmatpush.msrb.mxu2 %v1974_v8  ;;  %v2528_v5 = vmul.f32 %v2498_v1, %v4304_v41  ;;  %v2584_v36 = vmul.f32 %v2554_v2, %v6348_v50  ;;  %v2585_v52 = vmul.f32 %v2555_v13, %v6348_v50 }
 0x404   :  { %2287 = vmatpush.msra.mxu1 %v1977_v56  ;;  %v2410_v63 = vadd.f32 %v2380_v38, %v2324_v24  ;;  %v2605_v19 = vadd.f32 %v2575_v35, %v2519_v11  ;;  %v2419_v46 = vadd.f32 %v2389_v44, %v2333_v51  ;;  %v2463_v45 = vadd.f32 %v2443_v60, %v2409_v21  ;;  %v6350_v38 = vld [vmem:[#allocation56_spill] sm:$0xff] }
 0x405   :  { %1948 = vmatpush.msra.mxu3 %v1917_v16  ;;  %v6349_v16 = vld [vmem:[#allocation54_spill] sm:$0xff]  ;;  %v2343_v8 = vmul.f32 %v2303_v55, %v4388_v26  ;;  %v2399_v7 = vmul.f32 %v2359_v6, %v4434_v40  ;;  %v2344_v29 = vmul.f32 %v2304_v12, %v4388_v26  ;;  %v2538_v56 = vmul.f32 %v2498_v1, %v4388_v26 }
 0x406   :  { %1949 = vmatmul.f32.vlgmr.msra.gmra.mxu3 %v1911_v4  ;;  %v2614_v4 = vadd.f32 %v2584_v36, %v2528_v5  ;;  %v1914_v55 = vld [vmem:[#allocation3 + $0x8] sm:$0xff]  ;;  %v2539_v6 = vmul.f32 %v2499_v39, %v4388_v26  ;;  %v2595_v12 = vmul.f32 %v2555_v13, %v4434_v40  ;;  %v5526_v13 = vperm.slane %v5458_v18, 2 }
 0x407   :  { %3307 = vmatpush.msk.msrb.mxu3 %vm380_vm0, %v2001_v3  ;;  %3312 = vmatmul.msk.f32.vlgmr.msrb.gmra.mxu0 %vm370_vm1, %v6341_v17  ;;  %v2420_v3 = vadd.f32 %v2390_v34, %v2334_v25  ;;  %v2429_v32 = vadd.f32 %v2399_v7, %v2343_v8  ;;  %v5514_v11 = vmul.f32 %v1914_v55, %v6350_v38  ;;  %v5533_v36 = vperm.slane %v5453_v30, 3 }
 0x408   :  { %v2668_v33 = vadd.f32 %v2638_v27, %v2614_v4  ;;  %v5565_v8 = vperm.slane %v5463_v42, 3  ;;  %v5568_v7 = vperm.slane %v5468_v53, 3  ;;  %v5587_v55 = vperm.slane %v5453_v30, 4 }
 0x409   :  { %2129 = vmatpush.msrb.mxu3 %v1991_v62  ;;  %3316 = vmatmul.msk.f32.vlgmr.msrb.gmra.mxu1 %vm370_vm1, %v6341_v17  ;;  %v2483_v1 = vadd.f32 %v2443_v60, %v2429_v32 }
 0x40a   :  { %3306 = vmatmul.msk.f32.gmra.mxu2 %vm370_vm1, %v6343_v54 }
 0x40b   :  { %2130 = vmatpush.msrb.mxu3 %v1981_v20  ;;  %v2400_v20 = vmul.f32 %v2360_v0, %v4434_v40 }
 0x40d   :  { %2131 = vmatpush.msrb.mxu3 %v1971_v9 }
 0x40e   :  { %1952 = vmatmul.f32.gmra.mxu3 %v1912_v61  ;;  %v2464_v61 = vadd.f32 %v2444_v58, %v2410_v63 }
 0x40f   :  { %3323 = vmatpush.msk.msra.mxu3 %vm380_vm0, %v2005_v22  ;;  %3313 = vmatmul.msk.f32.gmra.mxu0 %vm370_vm1, %v6342_v14  ;;  %v2659_v22 = vadd.f32 %v2639_v57, %v2605_v19 }
 0x411   :  { %2233 = vmatpush.msra.mxu3 %v1995_v43  ;;  %3317 = vmatmul.msk.f32.gmra.mxu1 %vm370_vm1, %v6342_v14  ;;  %v2473_v43 = vadd.f32 %v2443_v60, %v2419_v46  ;;  %v5536_v60 = vperm.slane %v5458_v18, 3  ;;  %v5555_v46 = vperm.slane %v5480_v10, 2 }
 0x412   :  { %3320 = vmatmul.msk.f32.vlgmr.msrb.gmra.mxu2 %vm370_vm1, %v6341_v17 }
 0x413   :  { %2234 = vmatpush.msra.mxu3 %v1985_v37  ;;  %v2594_v37 = vmul.f32 %v2554_v2, %v4434_v40  ;;  %v2382_v63 = vmul.f32 %v5536_v60, %v6346_v59 }
 0x415   :  { %2235 = vmatpush.msra.mxu3 %v1975_v28  ;;  %v2430_v28 = vadd.f32 %v2400_v20, %v2344_v29  ;;  %v2624_v35 = vadd.f32 %v2594_v37, %v2538_v56 }
 0x416   :  { %3308 = vmatmul.msk.f32.vlgmr.msrb.gmra.mxu3 %vm370_vm1, %v6341_v17 }
 0x417   :  { %3314 = vmatmul.msk.f32.gmra.mxu0 %vm370_vm1, %v6343_v54  ;;  %v5516_v44 = vadd.f32 %v2444_v58, %v2430_v28  ;;  %v5520_v25 = vadd.f32 %v2638_v27, %v2624_v35  ;;  %v2521_v28 = vmul.f32 %v5565_v8, %v6345_v15  ;;  %v2327_v35 = vmul.f32 %v5587_v55, %v6345_v15 }
 0x419   :  { %3318 = vmatmul.msk.f32.gmra.mxu1 %vm370_vm1, %v6343_v54 }
 0x41a   :  { %3321 = vmatmul.msk.f32.gmra.mxu2 %vm370_vm1, %v6342_v14 }
 0x41e   :  { %3309 = vmatmul.msk.f32.gmra.mxu3 %vm370_vm1, %v6342_v14 }
 0x41f   :  { %3328 = vmatmul.msk.f32.vlgmr.msra.gmra.mxu0 %vm370_vm1, %v6341_v17 }
 0x421   :  { %3332 = vmatmul.msk.f32.vlgmr.msra.gmra.mxu1 %vm370_vm1, %v6341_v17 }
 0x422   :  { %3322 = vmatmul.msk.f32.gmra.mxu2 %vm370_vm1, %v6343_v54 }
 0x426   :  { %3310 = vmatmul.msk.f32.gmra.mxu3 %vm370_vm1, %v6343_v54 }
 0x427   :  { %3329 = vmatmul.msk.f32.gmra.mxu0 %vm370_vm1, %v6342_v14 }
 0x429   :  { %3333 = vmatmul.msk.f32.gmra.mxu1 %vm370_vm1, %v6342_v14 }
 0x42e   :  { %3324 = vmatmul.msk.f32.vlgmr.msra.gmra.mxu3 %vm370_vm1, %v6341_v17  ;;  %v2574_v17 = vmul.f32 %v2554_v2, %v6346_v59  ;;  %v2625_v2 = vadd.f32 %v2595_v12, %v2539_v6  ;;  %v5590_v6 = vperm.slane %v5458_v18, 4 }
 0x42f   :  { %3330 = vmatmul.msk.f32.gmra.mxu0 %vm370_vm1, %v6343_v54 }
 0x430   :  { %v2604_v23 = vadd.f32 %v2574_v17, %v2518_v49  ;;  %v2474_v49 = vadd.f32 %v2444_v58, %v2420_v3  ;;  %v5530_v5 = vadd.f32 %v2639_v57, %v2625_v2  ;;  %v5544_v58 = vperm.slane %v5463_v42, 2 }
 0x431   :  { %3334 = vmatmul.msk.f32.gmra.mxu1 %vm370_vm1, %v6343_v54 }
 0x432   :  { %v2658_v9 = vadd.f32 %v2638_v27, %v2604_v23  ;;  %v2381_v27 = vmul.f32 %v5526_v13, %v6346_v59  ;;  %v2326_v23 = vmul.f32 %v5533_v36, %v6345_v15 }
 0x436   :  { %3325 = vmatmul.msk.f32.gmra.mxu3 %vm370_vm1, %v6342_v14  ;;  %v2529_v14 = vmul.f32 %v2499_v39, %v4304_v41  ;;  %v5523_v39 = vperm.slane %v5453_v30, 2 }
 0x438   :  { %v2615_v62 = vadd.f32 %v2585_v52, %v2529_v14  ;;  %v2325_v52 = vmul.f32 %v5523_v39, %v6345_v15 }
 0x43a   :  { %v2669_v24 = vadd.f32 %v2639_v57, %v2615_v62  ;;  %v2411_v19 = vadd.f32 %v2381_v27, %v2325_v52  ;;  %v2412_v62 = vadd.f32 %v2382_v63, %v2326_v23  ;;  %v5610_v52 = vperm.slane %v5468_v53, 4 }
 0x43b   :  { %v5613_v27 = vperm.slane %v5486_v47, 4 }
 0x43e   :  { %3326 = vmatmul.msk.f32.gmra.mxu3 %vm370_vm1, %v6343_v54  ;;  %v5503_v54 = vmul.f32 %v1913_v48, %v6349_v16  ;;  %v5548_v48 = vperm.slane %v5468_v53, 2  ;;  %v5560_v16 = vperm.slane %v5480_v10, 3 }
 0x440   :  { %v2576_v3 = vmul.f32 %v5548_v48, %v6346_v59  ;;  %v5578_v37 = vadd.f32 %v5560_v16, %v2412_v62  ;;  %v5627_v62 = vperm.slane %v5480_v10, 5 }
 0x46c   :  { %v2055_v31 = vpop.f32.mrf.mxu0 }
 0x46d   :  { %v2688_v17 = vmul.f32 %v2463_v45, %v2055_v31  ;;  %v2081_v0 = vpop.f32.mrf.mxu1  ;;  %v2520_v45 = vmul.f32 %v5544_v58, %v6345_v15 }
 0x46e   :  { %v2689_v51 = vmul.f32 %v2464_v61, %v2081_v0  ;;  %v5572_v61 = vperm.slane %v5486_v47, 2  ;;  %v5599_v0 = vperm.slane %v5463_v42, 4 }
 0x46f   :  { %v5518_v21 = vadd.f32 %v2688_v17, %v2658_v9  ;;  %v2465_v9 = vadd.f32 %v5555_v46, %v2411_v19  ;;  %v2606_v56 = vadd.f32 %v2576_v3, %v2520_v45  ;;  %v5596_v17 = vperm.slane %v5480_v10, 4 }
 0x470   :  { %v5528_v34 = vadd.f32 %v2689_v51, %v2659_v22  ;;  %v5575_v22 = vperm.slane %v5486_v47, 3  ;;  %v2383_v51 = vmul.f32 %v5590_v6, %v6346_v59  ;;  %v2522_v2 = vmul.f32 %v5599_v0, %v6345_v15 }
 0x471   :  { %6351 = vst [vmem:[#allocation60_spill] sm:$0xff] %v5518_v21  ;;  %v5619_v19 = vperm.slane %v5453_v30, 5  ;;  %v5622_v45 = vperm.slane %v5458_v18, 5  ;;  %v2578_v3 = vmul.f32 %v5610_v52, %v6346_v59 }
 0x472   :  { %6352 = vst [vmem:[#allocation57_spill] sm:$0xff] %v5528_v34  ;;  %v2413_v63 = vadd.f32 %v2383_v51, %v2327_v35 }
 0x473   :  { %v2384_v35 = vmul.f32 %v5622_v45, %v6346_v59  ;;  %v2608_v14 = vadd.f32 %v2578_v3, %v2522_v2 }
 0x474   :  { %v2058_v4 = vpop.f32.mrf.mxu0 }
 0x475   :  { %v2698_v29 = vmul.f32 %v2473_v43, %v2058_v4  ;;  %v2577_v43 = vmul.f32 %v5568_v7, %v6346_v59 }
 0x476   :  { %v2084_v20 = vpop.f32.mrf.mxu1 }
 0x477   :  { %v2699_v32 = vmul.f32 %v2474_v49, %v2084_v20  ;;  %v5582_v31 = vadd.f32 %v2698_v29, %v2668_v33  ;;  %v2660_v49 = vadd.f32 %v5572_v61, %v2606_v56  ;;  %v2607_v38 = vadd.f32 %v2577_v43, %v2521_v28 }
 0x478   :  { %v5630_v29 = vperm.slane %v5463_v42, 5  ;;  %v5633_v20 = vperm.slane %v5468_v53, 5  ;;  %v2467_v43 = vadd.f32 %v5596_v17, %v2413_v63 }
 0x479   :  { %6353 = vst [vmem:[#allocation59_spill] sm:$0xff] %v5582_v31  ;;  %v5592_v12 = vadd.f32 %v2699_v32, %v2669_v24  ;;  %v5616_v23 = vadd.f32 %v5575_v22, %v2607_v38  ;;  %v2328_v38 = vmul.f32 %v5619_v19, %v6345_v15 }
 0x47a   :  { %v2523_v33 = vmul.f32 %v5630_v29, %v6345_v15  ;;  %v2579_v63 = vmul.f32 %v5633_v20, %v6346_v59 }
 0x47b   :  { %6354 = vst [vmem:[#allocation55_spill] sm:$0xff] %v5592_v12 }
 0x47c   :  { %v2061_v4 = vpop.f32.mrf.mxu0  ;;  %v2609_v3 = vadd.f32 %v2579_v63, %v2523_v33  ;;  %v2392_v33 = vmul.f32 %v5536_v60, %v6348_v50  ;;  %v2587_v63 = vmul.f32 %v5568_v7, %v6348_v50 }
 0x47d   :  { %v2708_v32 = vmul.f32 %v2483_v1, %v2061_v4  ;;  %v2107_v28 = vpop.f32.mrf.mxu2  ;;  %v2414_v1 = vadd.f32 %v2384_v35, %v2328_v38  ;;  %v5649_v4 = vperm.slane %v5486_v47, 5  ;;  %v2336_v38 = vmul.f32 %v5533_v36, %v4304_v41 }
 0x47e   :  { %v2087_v56 = vpop.f32.mrf.mxu1  ;;  %v2690_v57 = vmul.f32 %v2465_v9, %v2107_v28  ;;  %v2335_v9 = vmul.f32 %v5523_v39, %v4304_v41 }
 0x47f   :  { %v2709_v51 = vmul.f32 %v5516_v44, %v2087_v56  ;;  %v5644_v24 = vadd.f32 %v2708_v32, %v5520_v25  ;;  %v2662_v44 = vadd.f32 %v5613_v27, %v2608_v14  ;;  %v2468_v2 = vadd.f32 %v5627_v62, %v2414_v1 }
 0x480   :  { %v5654_v21 = vadd.f32 %v2690_v57, %v2660_v49  ;;  %v2391_v32 = vmul.f32 %v5526_v13, %v6348_v50  ;;  %v2530_v57 = vmul.f32 %v5544_v58, %v4304_v41  ;;  %v2586_v14 = vmul.f32 %v5548_v48, %v6348_v50 }
 0x481   :  { %6355 = vst [vmem:[#allocation51_spill] sm:$0xff] %v5644_v24  ;;  %v5652_v34 = vadd.f32 %v2709_v51, %v5530_v5  ;;  %v2663_v49 = vadd.f32 %v5649_v4, %v2609_v3  ;;  %v2531_v1 = vmul.f32 %v5565_v8, %v4304_v41  ;;  %v2337_v5 = vmul.f32 %v5587_v55, %v4304_v41 }
 0x482   :  { %6357 = vst [vmem:[#allocation53_spill] sm:$0xff] %v5654_v21  ;;  %v2421_v28 = vadd.f32 %v2391_v32, %v2335_v9  ;;  %v2616_v51 = vadd.f32 %v2586_v14, %v2530_v57  ;;  %v3492_v9 = vld [vmem:[%s6358_s14] ss:$0 sm:$0xff]  ;;  %v2422_v21 = vadd.f32 %v2392_v33, %v2336_v38  ;;  %v2393_v57 = vmul.f32 %v5590_v6, %v6348_v50 }
 0x483   :  { %6356 = vst [vmem:[#allocation52_spill] sm:$0xff] %v5652_v34  ;;  %v2617_v24 = vadd.f32 %v2587_v63, %v2531_v1  ;;  %v2532_v34 = vmul.f32 %v5599_v0, %v4304_v41  ;;  %v2588_v33 = vmul.f32 %v5610_v52, %v6348_v50 }
 0x484   :  { %v2159_v35 = vpop.f32.mrf.mxu0  ;;  %v2475_v56 = vadd.f32 %v5555_v46, %v2421_v28  ;;  %v2670_v12 = vadd.f32 %v5572_v61, %v2616_v51 }
 0x485   :  { %v2692_v3 = vmul.f32 %v2467_v43, %v2159_v35  ;;  %v2110_v25 = vpop.f32.mrf.mxu2  ;;  %v5693_v35 = vadd.f32 %v5560_v16, %v2422_v21  ;;  %v5698_v38 = vadd.f32 %v5575_v22, %v2617_v24  ;;  %v2394_v24 = vmul.f32 %v5622_v45, %v6348_v50 }
 0x486   :  { %v2185_v32 = vpop.f32.mrf.mxu1  ;;  %v2700_v43 = vmul.f32 %v2475_v56, %v2110_v25 }
 0x487   :  { %v2693_v31 = vmul.f32 %v2468_v2, %v2185_v32  ;;  %v5690_v53 = vadd.f32 %v2692_v3, %v2662_v44  ;;  %v2423_v2 = vadd.f32 %v2393_v57, %v2337_v5  ;;  %v2618_v44 = vadd.f32 %v2588_v33, %v2532_v34 }
 0x488   :  { %v5703_v63 = vadd.f32 %v2700_v43, %v2670_v12  ;;  %v2589_v12 = vmul.f32 %v5633_v20, %v6348_v50  ;;  %v2345_v32 = vmul.f32 %v5523_v39, %v4388_v26  ;;  %v2401_v34 = vmul.f32 %v5526_v13, %v4434_v40 }
 0x489   :  { %v1950_v14 = vpop.f32.mrf.mxu3  ;;  %v5695_v28 = vadd.f32 %v2693_v31, %v2663_v49  ;;  %v2477_v31 = vadd.f32 %v5596_v17, %v2423_v2  ;;  %v2672_v49 = vadd.f32 %v5613_v27, %v2618_v44  ;;  %v2540_v2 = vmul.f32 %v5544_v58, %v4388_v26 }
 0x48a   :  { %v1956_v47 = vadd.f32 %v1950_v14, %v5503_v54  ;;  %v2338_v54 = vmul.f32 %v5619_v19, %v4304_v41  ;;  %v2596_v33 = vmul.f32 %v5548_v48, %v4434_v40  ;;  %v2346_v39 = vmul.f32 %v5533_v36, %v4388_v26 }
 0x48b   :  { %v2402_v13 = vmul.f32 %v5536_v60, %v4434_v40 }
 0x48c   :  { %v1962_v51 = vadd.f32 %v3492_v9, %v1956_v47  ;;  %v2533_v47 = vmul.f32 %v5630_v29, %v4304_v41  ;;  %v2162_v5 = vpop.f32.mrf.mxu0  ;;  %v2424_v3 = vadd.f32 %v2394_v24, %v2338_v54  ;;  %v2431_v54 = vadd.f32 %v2401_v34, %v2345_v32 }
 0x48d   :  { %v2702_v57 = vmul.f32 %v2477_v31, %v2162_v5  ;;  %v2113_v58 = vpop.f32.mrf.mxu2  ;;  %v2432_v5 = vadd.f32 %v2402_v13, %v2346_v39 }
 0x48e   :  { %v1964_v25 = vmax.f32 %v1962_v51, 0.0  ;;  %v2188_v14 = vpop.f32.mrf.mxu1  ;;  %v2619_v43 = vadd.f32 %v2589_v12, %v2533_v47  ;;  %v2478_v44 = vadd.f32 %v5627_v62, %v2424_v3  ;;  %v2626_v47 = vadd.f32 %v2596_v33, %v2540_v2 }
 0x48f   :  { %v5731_v24 = vadd.f32 %v2702_v57, %v2672_v49  ;;  %v2485_v48 = vadd.f32 %v5555_v46, %v2431_v54  ;;  %v2541_v3 = vmul.f32 %v5565_v8, %v4388_v26  ;;  %v5744_v57 = vadd.f32 %v5560_v16, %v2432_v5 }
 0x490   :  { %1966 = vst [vmem:[#allocation2] sm:$0xff] %v1964_v25  ;;  %v2673_v25 = vadd.f32 %v5649_v4, %v2619_v43  ;;  %v2703_v12 = vmul.f32 %v2478_v44, %v2188_v14  ;;  %v2680_v60 = vadd.f32 %v5572_v61, %v2626_v47  ;;  %v2347_v46 = vmul.f32 %v5587_v55, %v4388_v26 }
 0x491   :  { %v1953_v51 = vpop.f32.mrf.mxu3  ;;  %v2710_v34 = vmul.f32 %v2485_v48, %v2113_v58  ;;  %v2403_v8 = vmul.f32 %v5590_v6, %v4434_v40  ;;  %v2542_v61 = vmul.f32 %v5599_v0, %v4388_v26  ;;  %v2598_v2 = vmul.f32 %v5610_v52, %v4434_v40 }
 0x492   :  { %v1957_v31 = vadd.f32 %v1953_v51, %v5514_v11  ;;  %v2597_v11 = vmul.f32 %v5568_v7, %v4434_v40  ;;  %v5741_v49 = vadd.f32 %v2703_v12, %v2673_v25  ;;  %v2348_v16 = vmul.f32 %v5619_v19, %v4388_v26 }
 0x493   :  { %v5753_v7 = vadd.f32 %v2710_v34, %v2680_v60  ;;  %v2433_v33 = vadd.f32 %v2403_v8, %v2347_v46  ;;  %v2404_v6 = vmul.f32 %v5622_v45, %v4434_v40  ;;  %v2543_v0 = vmul.f32 %v5630_v29, %v4388_v26  ;;  %v6360_v60 = vld [vmem:[#allocation61_spill] sm:$0xff] }
 0x494   :  { %v1963_v32 = vadd.f32 %v3492_v9, %v1957_v31  ;;  %v2627_v43 = vadd.f32 %v2597_v11, %v2541_v3  ;;  %v2165_v54 = vpop.f32.mrf.mxu0  ;;  %v2628_v39 = vadd.f32 %v2598_v2, %v2542_v61  ;;  %v2599_v52 = vmul.f32 %v5633_v20, %v4434_v40  ;;  %v6359_v3 = vld [vmem:[#allocation58_spill] sm:$0xff]  ;;  %v3335_v2 = vld [vmem:[%s6156_s22 + $0x10] ss:$2 sm:$0x3] }
 0x495   :  { %v5770_v19 = vperm.slane %v5453_v30, 6  ;;  %v2487_v13 = vadd.f32 %v5596_v17, %v2433_v33  ;;  %v2434_v31 = vadd.f32 %v2404_v6, %v2348_v16  ;;  %v5775_v45 = vperm.slane %v5458_v18, 6 }
 0x496   :  { %v1965_v14 = vmax.f32 %v1963_v32, 0.0  ;;  %v5760_v55 = vadd.f32 %v5575_v22, %v2627_v43  ;;  %v2682_v29 = vadd.f32 %v5613_v27, %v2628_v39  ;;  %v2191_v25 = vpop.f32.mrf.mxu1  ;;  %v2629_v58 = vadd.f32 %v2599_v52, %v2543_v0 }
 0x497   :  { %v2329_v47 = vmul.f32 %v5770_v19, %v6345_v15  ;;  %v5781_v20 = vperm.slane %v5480_v10, 6  ;;  %v2488_v17 = vadd.f32 %v5627_v62, %v2434_v31  ;;  %v2385_v48 = vmul.f32 %v5775_v45, %v6346_v59 }
 0x498   :  { %1967 = vst [vmem:[#allocation2 + $0x8] sm:$0xff] %v1965_v14  ;;  %v2683_v5 = vadd.f32 %v5649_v4, %v2629_v58  ;;  %v5791_v27 = vperm.slane %v5463_v42, 6  ;;  %v5794_v32 = vperm.slane %v6359_v3, 6  ;;  %v5797_v11 = vperm.slane %v6360_v60, 6  ;;  %v2211_v14 = vpop.f32.mrf.mxu2 }
 0x499   :  { %v2133_v51 = vpop.f32.mrf.mxu3  ;;  %v2713_v46 = vmul.f32 %v2488_v17, %v2191_v25  ;;  %v2415_v62 = vadd.f32 %v2385_v48, %v2329_v47  ;;  %v5807_v8 = vperm.slane %v5453_v30, 7  ;;  %v5810_v61 = vperm.slane %v5458_v18, 7  ;;  %v3337_v30 = vld [vmem:[%s6156_s22 + $0x11] ss:$2 sm:$0x3] }
 0x49a   :  { %v2691_v22 = vmul.f32 %v5578_v37, %v2133_v51  ;;  %v2712_v37 = vmul.f32 %v2487_v13, %v2165_v54  ;;  %v2524_v43 = vmul.f32 %v5791_v27, %v6345_v15  ;;  %v2580_v4 = vmul.f32 %v5794_v32, %v6346_v59  ;;  %v2440_v25 = vld [vmem:[#allocation28 + $0x8] sm:$0x3] }
 0x49b   :  { %v5816_v33 = vadd.f32 %v2713_v46, %v2683_v5  ;;  %v2469_v6 = vadd.f32 %v5781_v20, %v2415_v62  ;;  %v5820_v0 = vperm.slane %v5480_v10, 7  ;;  %v2330_v54 = vmul.f32 %v5807_v8, %v6345_v15  ;;  %v3338_v10 = vld [vmem:[%s6158_s24 + $0x10] ss:$2 sm:$0x3]  ;;  %v2635_v46 = vld [vmem:[#allocation30 + $0x8] sm:$0x3] }
 0x49c   :  { %v5784_v12 = vadd.f32 %v2691_v22, %v5616_v23  ;;  %v5800_v34 = vadd.f32 %v2712_v37, %v2682_v29  ;;  %v2610_v18 = vadd.f32 %v2580_v4, %v2524_v43  ;;  %v2386_v39 = vmul.f32 %v5810_v61, %v6346_v59  ;;  %v2263_v13 = vpop.f32.mrf.mxu0 }
 0x49d   :  { %v5830_v52 = vperm.slane %v5463_v42, 7  ;;  %v2694_v31 = vmul.f32 %v2469_v6, %v2211_v14  ;;  %v5838_v29 = vperm.slane %v6359_v3, 7  ;;  %v5844_v37 = vperm.slane %v6360_v60, 7 }
 0x49e   :  { %v2664_v58 = vadd.f32 %v5797_v11, %v2610_v18  ;;  %v2416_v47 = vadd.f32 %v2386_v39, %v2330_v54  ;;  %v5854_v5 = vperm.slane %v3335_v2, 0  ;;  %v5856_v3 = vperm.slane %v3337_v30, 0  ;;  %v2289_v36 = vpop.f32.mrf.mxu1 }
 0x49f   :  { %v2525_v42 = vmul.f32 %v5830_v52, %v6345_v15  ;;  %v2581_v48 = vmul.f32 %v5838_v29, %v6346_v59  ;;  %v5861_v14 = vperm.slane %v2440_v25, 0  ;;  %v5863_v43 = vperm.slane %v3338_v10, 0 }
 0x4a0   :  { %v5858_v62 = vadd.f32 %v2694_v31, %v2664_v58  ;;  %v2470_v60 = vadd.f32 %v5820_v0, %v2416_v47  ;;  %v2331_v6 = vmul.f32 %v5854_v5, %v6345_v15  ;;  %v5878_v47 = vperm.slane %v3335_v2, 1 }
 0x4a1   :  { %v2136_v51 = vpop.f32.mrf.mxu3  ;;  %v2526_v54 = vmul.f32 %v5863_v43, %v6345_v15  ;;  %v5884_v18 = vperm.slane %v2440_v25, 1  ;;  %v5886_v21 = vperm.slane %v3338_v10, 1  ;;  %v5900_v25 = vperm.slane %v2635_v46, 1 }
 0x4a2   :  { %v2701_v22 = vmul.f32 %v5693_v35, %v2136_v51  ;;  %v3340_v35 = vld [vmem:[%s6158_s24 + $0x11] ss:$2 sm:$0x3]  ;;  %v2387_v51 = vmul.f32 %v5856_v3, %v6346_v59  ;;  %v2332_v2 = vmul.f32 %v5878_v47, %v6345_v15  ;;  %v2397_v44 = vmul.f32 %v5856_v3, %v6348_v50  ;;  %s3982_s24 = smov 0  }
 0x4a3   :  { %v5873_v39 = vperm.slane %v3340_v35, 0  ;;  %v5888_v1 = vperm.slane %v3340_v35, 1  ;;  %v2536_v56 = vmul.f32 %v5863_v43, %v4304_v41 }
 0x4a4   :  { %v5850_v17 = vadd.f32 %v2701_v22, %v5698_v38  ;;  %v2611_v38 = vadd.f32 %v2581_v48, %v2525_v42  ;;  %v5875_v22 = vperm.slane %v2635_v46, 0  ;;  %v2417_v58 = vadd.f32 %v2387_v51, %v2331_v6 }
 0x4a5   :  { %v5880_v42 = vperm.slane %v3337_v30, 1  ;;  %v2582_v16 = vmul.f32 %v5873_v39, %v6346_v59  ;;  %v2527_v51 = vmul.f32 %v5886_v21, %v6345_v15  ;;  %v2583_v10 = vmul.f32 %v5888_v1, %v6346_v59 }
 0x4a6   :  { %v2665_v31 = vadd.f32 %v5844_v37, %v2611_v38  ;;  %v2471_v38 = vadd.f32 %v5861_v14, %v2417_v58  ;;  %v2395_v15 = vmul.f32 %v5775_v45, %v6348_v50  ;;  %v2591_v46 = vmul.f32 %v5838_v29, %v6348_v50 }
 0x4a7   :  { %v2388_v30 = vmul.f32 %v5880_v42, %v6346_v59  ;;  %v2612_v6 = vadd.f32 %v2582_v16, %v2526_v54  ;;  %v2613_v16 = vadd.f32 %v2583_v10, %v2527_v51  ;;  %v2534_v59 = vmul.f32 %v5791_v27, %v4304_v41  ;;  %v2214_v51 = vpop.f32.mrf.mxu2 }
 0x4a9   :  { %v2139_v48 = vpop.f32.mrf.mxu3  ;;  %v2418_v58 = vadd.f32 %v2388_v30, %v2332_v2  ;;  %v2666_v9 = vadd.f32 %v5875_v22, %v2612_v6  ;;  %v2396_v30 = vmul.f32 %v5810_v61, %v6348_v50 }
 0x4aa   :  { %v2711_v23 = vmul.f32 %v5744_v57, %v2139_v48  ;;  %v2696_v57 = vmul.f32 %v2471_v38, %v2263_v13  ;;  %v2339_v48 = vmul.f32 %v5770_v19, %v4304_v41  ;;  %v2340_v13 = vmul.f32 %v5807_v8, %v4304_v41 }
 0x4ab   :  { %v2667_v38 = vadd.f32 %v5900_v25, %v2613_v16 }
 0x4ac   :  { %v5903_v35 = vadd.f32 %v2711_v23, %v5760_v55  ;;  %v2472_v55 = vadd.f32 %v5884_v18, %v2418_v58  ;;  %v2590_v23 = vmul.f32 %v5794_v32, %v6348_v50  ;;  %v5918_v54 = vadd.f32 %v2696_v57, %v2666_v9 }
 0x4ad   :  { %v2425_v2 = vadd.f32 %v2395_v15, %v2339_v48  ;;  %v2535_v58 = vmul.f32 %v5830_v52, %v4304_v41  ;;  %v2426_v57 = vadd.f32 %v2396_v30, %v2340_v13  ;;  %v2341_v48 = vmul.f32 %v5854_v5, %v4304_v41 }
 0x4ae   :  { %v2697_v6 = vmul.f32 %v2472_v55, %v2289_v36  ;;  %v2620_v10 = vadd.f32 %v2590_v23, %v2534_v59  ;;  %v2342_v30 = vmul.f32 %v5878_v47, %v4304_v41 }
 0x4af   :  { %v2479_v9 = vadd.f32 %v5781_v20, %v2425_v2  ;;  %v2621_v59 = vadd.f32 %v2591_v46, %v2535_v58  ;;  %v2480_v23 = vadd.f32 %v5820_v0, %v2426_v57  ;;  %v2427_v46 = vadd.f32 %v2397_v44, %v2341_v48 }
 0x4b0   :  { %v5931_v15 = vadd.f32 %v2697_v6, %v2667_v38  ;;  %v2674_v36 = vadd.f32 %v5797_v11, %v2620_v10  ;;  %v2398_v6 = vmul.f32 %v5880_v42, %v6348_v50  ;;  %v2537_v58 = vmul.f32 %v5886_v21, %v4304_v41 }
 0x4b1   :  { %v2237_v4 = vpop.f32.mrf.mxu3  ;;  %v2704_v55 = vmul.f32 %v2479_v9, %v2214_v51  ;;  %v2593_v9 = vmul.f32 %v5888_v1, %v6348_v50  ;;  %v2481_v44 = vadd.f32 %v5861_v14, %v2427_v46  ;;  %v2544_v41 = vmul.f32 %v5791_v27, %v4388_v26 }
 0x4b2   :  { %v2695_v16 = vmul.f32 %v2470_v60, %v2237_v4  ;;  %v2675_v60 = vadd.f32 %v5844_v37, %v2621_v59  ;;  %v2592_v4 = vmul.f32 %v5873_v39, %v6348_v50  ;;  %v2428_v48 = vadd.f32 %v2398_v6, %v2342_v30  ;;  %v2292_v59 = vpop.f32.mrf.mxu1 }
 0x4b3   :  { %v5945_v38 = vadd.f32 %v2704_v55, %v2674_v36  ;;  %v2623_v55 = vadd.f32 %v2593_v9, %v2537_v58  ;;  %v2600_v46 = vmul.f32 %v5794_v32, %v4434_v40  ;;  %v2217_v9 = vpop.f32.mrf.mxu2 }
 0x4b4   :  { %v5939_v2 = vadd.f32 %v2695_v16, %v2665_v31  ;;  %v2266_v31 = vpop.f32.mrf.mxu0  ;;  %v2622_v10 = vadd.f32 %v2592_v4, %v2536_v56  ;;  %v2349_v16 = vmul.f32 %v5770_v19, %v4388_v26  ;;  %v2405_v56 = vmul.f32 %v5775_v45, %v4434_v40 }
 0x4b5   :  { %v2764_v57 = vmax.f32 %v5945_v38, 0.0  ;;  %v2706_v50 = vmul.f32 %v2481_v44, %v2266_v31  ;;  %v2482_v13 = vadd.f32 %v5884_v18, %v2428_v48  ;;  %v2350_v19 = vmul.f32 %v5807_v8, %v4388_v26 }
 0x4b6   :  { %v2755_v51 = vmax.f32 %v5939_v2, 0.0  ;;  %v2676_v36 = vadd.f32 %v5875_v22, %v2622_v10  ;;  %v2677_v6 = vadd.f32 %v5900_v25, %v2623_v55  ;;  %v2435_v10 = vadd.f32 %v2405_v56, %v2349_v16 }
 0x4b7   :  { %v2406_v45 = vmul.f32 %v5810_v61, %v4434_v40  ;;  %v2707_v27 = vmul.f32 %v2482_v13, %v2292_v59  ;;  %v2630_v31 = vadd.f32 %v2600_v46, %v2544_v41  ;;  %v2545_v44 = vmul.f32 %v5830_v52, %v4388_v26 }
 0x4b8   :  { %v5973_v58 = vadd.f32 %v2706_v50, %v2676_v36  ;;  %v2489_v32 = vadd.f32 %v5781_v20, %v2435_v10  ;;  %v2351_v13 = vmul.f32 %v5854_v5, %v4388_v26  ;;  %v2546_v56 = vmul.f32 %v5863_v43, %v4388_v26 }
 0x4b9   :  { %v2240_v4 = vpop.f32.mrf.mxu3  ;;  %v2436_v8 = vadd.f32 %v2406_v45, %v2350_v19  ;;  %v5983_v55 = vadd.f32 %v2707_v27, %v2677_v6  ;;  %v2684_v61 = vadd.f32 %v5797_v11, %v2630_v31  ;;  %v2602_v11 = vmul.f32 %v5873_v39, %v4434_v40 }
 0x4ba   :  { %v2705_v30 = vmul.f32 %v2480_v23, %v2240_v4  ;;  %v2601_v23 = vmul.f32 %v5838_v29, %v4434_v40  ;;  %v2766_v16 = vmax.f32 %v5973_v58, 0.0  ;;  %v2714_v52 = vmul.f32 %v2489_v32, %v2217_v9  ;;  %v2295_v45 = vpop.f32.mrf.mxu1 }
 0x4bb   :  { %v2767_v20 = vmax.f32 %v5983_v55, 0.0  ;;  %v2407_v29 = vmul.f32 %v5856_v3, %v4434_v40  ;;  %v2352_v4 = vmul.f32 %v5878_v47, %v4388_v26  ;;  %v2632_v19 = vadd.f32 %v2602_v11, %v2546_v56 }
 0x4bc   :  { %v5977_v48 = vadd.f32 %v2705_v30, %v2675_v60  ;;  %v2490_v60 = vadd.f32 %v5820_v0, %v2436_v8  ;;  %v2631_v59 = vadd.f32 %v2601_v23, %v2545_v44  ;;  %v5997_v41 = vadd.f32 %v2714_v52, %v2684_v61  ;;  %v2269_v6 = vpop.f32.mrf.mxu0 }
 0x4bd   :  { %v2408_v0 = vmul.f32 %v5880_v42, %v4434_v40  ;;  %v2437_v46 = vadd.f32 %v2407_v29, %v2351_v13  ;;  %v2547_v3 = vmul.f32 %v5886_v21, %v4388_v26  ;;  %v2603_v43 = vmul.f32 %v5888_v1, %v4434_v40 }
 0x4be   :  { %v2765_v36 = vmax.f32 %v5977_v48, 0.0  ;;  %v2685_v5 = vadd.f32 %v5844_v37, %v2631_v59  ;;  %v2774_v39 = vmax.f32 %v5997_v41, 0.0  ;;  %v2686_v47 = vadd.f32 %v5875_v22, %v2632_v19 }
 0x4bf   :  { %v2438_v37 = vadd.f32 %v2408_v0, %v2352_v4  ;;  %v2491_v10 = vadd.f32 %v5861_v14, %v2437_v46  ;;  %v2633_v42 = vadd.f32 %v2603_v43, %v2547_v3 }
 0x4c1   :  { %v2243_v50 = vpop.f32.mrf.mxu3  ;;  %v2492_v9 = vadd.f32 %v5884_v18, %v2438_v37  ;;  %v2716_v31 = vmul.f32 %v2491_v10, %v2269_v6  ;;  %v2687_v26 = vadd.f32 %v5900_v25, %v2633_v42 }
 0x4c2   :  { %v2715_v30 = vmul.f32 %v2490_v60, %v2243_v50 }
 0x4c3   :  { %v2717_v1 = vmul.f32 %v2492_v9, %v2295_v45  ;;  %v6016_v21 = vadd.f32 %v2716_v31, %v2686_v47 }
 0x4c4   :  { %v6011_v27 = vadd.f32 %v2715_v30, %v2685_v5 }
 0x4c5   :  { %v6018_v44 = vadd.f32 %v2717_v1, %v2687_v26 }
 0x4c6 LB: > { %s2784_s29 = sld [smem:[#allocation6 + %s3984_s24]]  ;;  %s2787_s17 = scalar_lea.vmem [#allocation4], %s3984_s24  ;;  %s3984_s24 = sphi %s3982_s24, %s2783_s24  }
 0x4c7   : > { %s2783_s24 = sadd.s32 1, %s3984_s24  }
 0x4c8   : > { %p2780_p4 = scmp.ge.s32.totalorder %s2783_s24, 20  }
 0x4c9   :  { %v6361_v25 = vmov (%p2780_p4), 0   ;;  %v6362_v61 = vmov (%p2780_p4), 0.0   ;;  %v6363_v13 = vmov (%p2780_p4), 1   ;;  %v6364_v52 = vmov (%p2780_p4), 2   ;;  %v6372_v19 = vld [vmem:[#allocation52_spill] sm:$0xff] (%p2780_p4)  ;;  %v6374_v6 = vld [vmem:[#allocation51_spill] sm:$0xff] (%p2780_p4) }
 0x4ca   :  { %2782 = sbr.rel (!%p2780_p4) target bundleno = 1222 (0x4c6), region = 308  ;;  %3494 = vset.pattern.permute.xlu1 (%p2780_p4), %v6361_v25  ;;  %3493 = vset.pattern.permute.xlu0 (%p2780_p4), %v6361_v25  ;;  %2975 = vst [vmem:[#allocation3] sm:$0xff] (%p2780_p4), %v6362_v61  ;;  %v6365_v60 = vmov (%p2780_p4), 3   ;;  %v6366_v59 = vmov (%p2780_p4), 5   ;;  %v6367_v29 = vmov (%p2780_p4), 4   ;;  %v6368_v56 = vmov (%p2780_p4), 7  }
 0x4cb   :  { %2976 = vst [vmem:[#allocation3 + $0x8] sm:$0xff] (%p2780_p4), %v6362_v61  ;;  %3496 = vset.pattern.permute.xlu2 (%p2780_p4), %v6363_v13  ;;  %v6369_v11 = vmov (%p2780_p4), 8   ;;  %v6370_v5 = vmov (%p2780_p4), 6   ;;  %v6371_v4 = vmov (%p2780_p4), 9   ;;  %v6373_v3 = vmax.f32 (%p2780_p4), %v6372_v19, 0.0  ;;  %s3986_s18 = smov (%p2780_p4), 0  }
 0x4cc   : > { %s2785_s2 = scalar_lea.vmem [#allocation2], %s2784_s29  ;;  %v6375_v37 = vmax.f32 (%p2780_p4), %v6374_v6, 0.0  ;;  %v6376_v47 = vmax.f32 (%p2780_p4), %v5753_v7, 0.0  ;;  %v6377_v7 = vld [vmem:[#allocation55_spill] sm:$0xff] (%p2780_p4)  ;;  %v6382_v6 = vmax.f32 (%p2780_p4), %v5850_v17, 0.0  ;;  %v6383_v14 = vmax.f32 (%p2780_p4), %v5731_v24, 0.0 }
 0x4cd   : > { %v2786_v18 = vld [vmem:[%s2785_s2] sm:$0x1]  ;;  %v6392_v38 = vmax.f32 (%p2780_p4), %v5690_v53, 0.0  ;;  %v6395_v48 = vmax.f32 (%p2780_p4), %v5800_v34, 0.0  ;;  %v6396_v55 = vmax.f32 (%p2780_p4), %v5858_v62, 0.0  ;;  %v6399_v62 = vmax.f32 (%p2780_p4), %v6011_v27, 0.0 }
 0x4ce   : > { %2788 = vst [vmem:[%s2787_s17] sm:$0x1] %v2786_v18  ;;  %v6401_v41 = vmax.f32 (%p2780_p4), %v6016_v21, 0.0 }
 0x4d5   :  { %v2791_v32 = vld [vmem:[#allocation4 + $0x10] sm:$0xff]  ;;  %v2789_v8 = vld [vmem:[#allocation4] sm:$0xff]  ;;  %v2790_v23 = vld [vmem:[#allocation4 + $0x8] sm:$0xff] }
 0x4d6   :  { %2804 = vperm.xlu1 %3494, %v2791_v32   ;;  %2794 = vperm.xlu0 %3493, %v2789_v8  }
 0x4d7   :  { %2815 = vperm.xlu2 %3496, %v2790_v23  }
 0x4de   :  { %3495 = vset.pattern.permute.xlu1 %v6363_v13  ;;  %2799 = vperm.xlu0 %3493, %v2790_v23  }
 0x4df   :  { %2811 = vperm.xlu1 %3495, %v2789_v8   ;;  %2819 = vperm.xlu2 %3496, %v2791_v32  }
 0x4e6   :  { %3497 = vset.pattern.permute.xlu0 %v6364_v52 }
 0x4e7   :  { %3498 = vset.pattern.permute.xlu1 %v6364_v52  ;;  %2829 = vperm.xlu0 %3497, %v2789_v8  }
 0x4e8   :  { %2833 = vperm.xlu1 %3498, %v2790_v23   ;;  %3499 = vset.pattern.permute.xlu2 %v6364_v52 }
 0x4e9   :  { %2837 = vperm.xlu2 %3499, %v2791_v32  }
 0x4ef   :  { %3502 = vset.pattern.permute.xlu0 %v6365_v60 }
 0x4f0   :  { %3500 = vset.pattern.permute.xlu1 %v6365_v60  ;;  %2855 = vperm.xlu0 %3502, %v2791_v32  }
 0x4f1   :  { %2847 = vperm.xlu1 %3500, %v2789_v8   ;;  %3501 = vset.pattern.permute.xlu2 %v6365_v60 }
 0x4f2   :  { %2851 = vperm.xlu2 %3501, %v2790_v23  }
 0x4f8   :  { %3506 = vset.pattern.permute.xlu0 %v6366_v59 }
 0x4f9   :  { %3503 = vset.pattern.permute.xlu1 %v6367_v29  ;;  %2887 = vperm.xlu0 %3506, %v2790_v23  }
 0x4fa   :  { %2865 = vperm.xlu1 %3503, %v2789_v8   ;;  %3504 = vset.pattern.permute.xlu2 %v6367_v29 }
 0x4fb   :  { %2869 = vperm.xlu2 %3504, %v2790_v23  }
 0x501   :  { %3510 = vset.pattern.permute.xlu0 %v6368_v56 }
 0x502   :  { %2873 = vperm.xlu1 %3503, %v2791_v32   ;;  %2919 = vperm.xlu0 %3510, %v2789_v8  }
 0x503   :  { %3505 = vset.pattern.permute.xlu2 %v6366_v59 }
 0x504   :  { %2883 = vperm.xlu2 %3505, %v2789_v8  }
 0x50a   :  { %3507 = vset.pattern.permute.xlu1 %v6366_v59  ;;  %3515 = vset.pattern.permute.xlu0 %v6369_v11 }
 0x50b   :  { %2891 = vperm.xlu1 %3507, %v2791_v32   ;;  %2945 = vperm.xlu0 %3515, %v2791_v32  }
 0x50c   :  { %3508 = vset.pattern.permute.xlu2 %v6370_v5 }
 0x50d   :  { %2901 = vperm.xlu2 %3508, %v2789_v8  }
 0x513   :  { %3509 = vset.pattern.permute.xlu1 %v6370_v5  ;;  %3518 = vset.pattern.permute.xlu0 %v6371_v4  ;;  %v6378_v5 = vmax.f32 %v6377_v7, 0.0 }
 0x514   :  { %2905 = vperm.xlu1 %3509, %v2790_v23  }
 0x515   :  { %2909 = vperm.xlu2 %3508, %v2791_v32  }
 0x51c   :  { %3511 = vset.pattern.permute.xlu1 %v6368_v56 }
 0x51d   :  { %2923 = vperm.xlu1 %3511, %v2790_v23   ;;  %3512 = vset.pattern.permute.xlu2 %v6368_v56 }
 0x51e   :  { %2927 = vperm.xlu2 %3512, %v2791_v32  }
 0x525   :  { %3513 = vset.pattern.permute.xlu1 %v6369_v11 }
 0x526   :  { %2937 = vperm.xlu1 %3513, %v2789_v8   ;;  %3514 = vset.pattern.permute.xlu2 %v6369_v11 }
 0x527   :  { %2941 = vperm.xlu2 %3514, %v2790_v23  }
 0x52e   :  { %3516 = vset.pattern.permute.xlu1 %v6371_v4 }
 0x52f   :  { %2955 = vperm.xlu1 %3516, %v2789_v8   ;;  %3517 = vset.pattern.permute.xlu2 %v6371_v4 }
 0x530   :  { %2959 = vperm.xlu2 %3517, %v2790_v23  }
 0x531   :  { %v2816_v0 = vpop.permute.xlu2 %2815 }
 0x532   :  { %v2823_v4 = vmul.f32 %v2816_v0, %v6378_v5  ;;  %v6384_v0 = vmax.f32 %v5741_v49, 0.0  ;;  %v6385_v5 = vld [vmem:[#allocation60_spill] sm:$0xff]  ;;  %v6391_v49 = vmax.f32 %v5784_v12, 0.0  ;;  %v6393_v12 = vmax.f32 %v5903_v35, 0.0 }
 0x537   :  { %2963 = vperm.xlu1 %3516, %v2791_v32  }
 0x539   :  { %v2820_v50 = vpop.permute.xlu2 %2819 }
 0x53a   :  { %v2824_v43 = vmul.f32 %v2820_v50, %v6373_v3  ;;  %v6379_v50 = vld [vmem:[#allocation59_spill] sm:$0xff]  ;;  %v6381_v3 = vmax.f32 %v5703_v63, 0.0  ;;  %v6387_v63 = vld [vmem:[#allocation57_spill] sm:$0xff] }
 0x543   :  { %v2838_v46 = vpop.permute.xlu2 %2837 }
 0x544   :  { %v2842_v45 = vmul.f32 %v2838_v46, %v6376_v47  ;;  %v6380_v46 = vmax.f32 %v6379_v50, 0.0 }
 0x548   :  { %v2805_v30 = vpop.permute.xlu1 %2804  ;;  %v2795_v25 = vpop.permute.xlu0 %2794 }
 0x549   :  { %v2809_v10 = vmul.f32 %v2805_v30, %v6375_v37 }
 0x54b   :  { %v2827_v42 = vadd.f32 %v2824_v43, %v2809_v10 }
 0x54c   :  { %v2852_v31 = vpop.permute.xlu2 %2851 }
 0x54d   :  { %v2845_v9 = vadd.f32 %v2842_v45, %v2827_v42  ;;  %v2859_v37 = vmul.f32 %v2852_v31, %v6382_v6  ;;  %v6389_v31 = vld [vmem:[#allocation53_spill] sm:$0xff] }
 0x550   :  { %v2800_v23 = vpop.permute.xlu0 %2799 }
 0x551   :  { %v2812_v26 = vpop.permute.xlu1 %2811  ;;  %v2808_v19 = vmul.f32 %v2800_v23, %v6380_v46  ;;  %v6386_v23 = vmax.f32 %v6385_v5, 0.0  ;;  %v6398_v5 = vmax.f32 %v5918_v54, 0.0 }
 0x553   :  { %v2826_v30 = vadd.f32 %v2823_v4, %v2808_v19  ;;  %v2807_v50 = vmul.f32 %v2795_v25, %v6386_v23  ;;  %v6390_v19 = vmax.f32 %v6389_v31, 0.0 }
 0x555   :  { %v2870_v1 = vpop.permute.xlu2 %2869 }
 0x556   :  { %v2877_v40 = vmul.f32 %v2870_v1, %v6383_v14 }
 0x559   :  { %v2830_v52 = vpop.permute.xlu0 %2829 }
 0x55a   :  { %v2834_v18 = vpop.permute.xlu1 %2833 }
 0x55b   :  { %v2841_v43 = vmul.f32 %v2834_v18, %v6381_v3  ;;  %v6388_v18 = vmax.f32 %v6387_v63, 0.0  ;;  %v2840_v3 = vmul.f32 %v2830_v52, %v6390_v19 }
 0x55d   :  { %v2844_v10 = vadd.f32 %v2841_v43, %v2826_v30  ;;  %v2822_v4 = vmul.f32 %v2812_v26, %v6388_v18 }
 0x55e   :  { %v2884_v32 = vpop.permute.xlu2 %2883 }
 0x55f   :  { %v2862_v22 = vadd.f32 %v2859_v37, %v2844_v10  ;;  %v2825_v30 = vadd.f32 %v2822_v4, %v2807_v50 }
 0x561   :  { %v2880_v46 = vadd.f32 %v2877_v40, %v2862_v22  ;;  %v2843_v22 = vadd.f32 %v2840_v3, %v2825_v30 }
 0x562   :  { %v2856_v29 = vpop.permute.xlu0 %2855 }
 0x563   :  { %v2848_v8 = vpop.permute.xlu1 %2847 }
 0x564   :  { %v2858_v1 = vmul.f32 %v2848_v8, %v6391_v49  ;;  %v2860_v8 = vmul.f32 %v2856_v29, %v6393_v12 }
 0x566   :  { %v2861_v37 = vadd.f32 %v2858_v1, %v2843_v22 }
 0x567   :  { %v2902_v61 = vpop.permute.xlu2 %2901 }
 0x56b   :  { %v2888_v42 = vpop.permute.xlu0 %2887 }
 0x56c   :  { %v2866_v13 = vpop.permute.xlu1 %2865  ;;  %v2895_v7 = vmul.f32 %v2888_v42, %v6384_v0  ;;  %v2863_v42 = vadd.f32 %v2860_v8, %v2845_v9 }
 0x56e   :  { %v2898_v43 = vadd.f32 %v2895_v7, %v2880_v46  ;;  %v6397_v7 = vmax.f32 %v5816_v33, 0.0  ;;  %v6402_v46 = vmax.f32 %v6018_v44, 0.0 }
 0x56f   :  { %v2910_v60 = vpop.permute.xlu2 %2909 }
 0x570   :  { %v2914_v34 = vmul.f32 %v2910_v60, %v2774_v39 }
 0x574   :  { %v2874_v59 = vpop.permute.xlu1 %2873 }
 0x578   :  { %v2928_v11 = vpop.permute.xlu2 %2927 }
 0x57d   :  { %v2892_v56 = vpop.permute.xlu1 %2891 }
 0x57e   :  { %v2896_v35 = vmul.f32 %v2892_v56, %v6397_v7  ;;  %v6400_v56 = vmax.f32 %v5931_v15, 0.0 }
 0x581   :  { %v2942_v47 = vpop.permute.xlu2 %2941 }
 0x582   :  { %v2949_v25 = vmul.f32 %v2942_v47, %v2766_v16 }
 0x586   :  { %v2906_v45 = vpop.permute.xlu1 %2905 }
 0x587   :  { %v2913_v17 = vmul.f32 %v2906_v45, %v2764_v57  ;;  %v2876_v57 = vmul.f32 %v2866_v13, %v6392_v38  ;;  %v6394_v45 = vmax.f32 %v5695_v28, 0.0  ;;  %v2920_v13 = vpop.permute.xlu0 %2919 }
 0x588   :  { %v2930_v28 = vmul.f32 %v2920_v13, %v2755_v51 }
 0x589   :  { %v2916_v6 = vadd.f32 %v2913_v17, %v2898_v43  ;;  %v2894_v58 = vmul.f32 %v2884_v32, %v6394_v45  ;;  %v2879_v16 = vadd.f32 %v2876_v57, %v2861_v37 }
 0x58a   :  { %v2960_v14 = vpop.permute.xlu2 %2959 }
 0x58b   :  { %v2967_v52 = vmul.f32 %v2960_v14, %v2767_v20  ;;  %v2897_v0 = vadd.f32 %v2894_v58, %v2879_v16  ;;  %v2912_v20 = vmul.f32 %v2902_v61, %v6396_v55  ;;  %v2932_v61 = vmul.f32 %v2928_v11, %v6399_v62 }
 0x58d   :  { %v2915_v32 = vadd.f32 %v2912_v20, %v2897_v0 }
 0x58f   :  { %v2924_v24 = vpop.permute.xlu1 %2923  ;;  %v2933_v9 = vadd.f32 %v2930_v28, %v2915_v32  ;;  %v2946_v2 = vpop.permute.xlu0 %2945 }
 0x590   :  { %v2931_v40 = vmul.f32 %v2924_v24, %v2765_v36  ;;  %v2878_v36 = vmul.f32 %v2874_v59, %v6395_v48  ;;  %v2950_v39 = vmul.f32 %v2946_v2, %v6401_v41 }
 0x592   :  { %v2934_v26 = vadd.f32 %v2931_v40, %v2916_v6  ;;  %v2881_v29 = vadd.f32 %v2878_v36, %v2863_v42 }
 0x594   :  { %v2952_v10 = vadd.f32 %v2949_v25, %v2934_v26  ;;  %v2899_v59 = vadd.f32 %v2896_v35, %v2881_v29 }
 0x596   :  { %v2970_v47 = vadd.f32 %v2967_v52, %v2952_v10  ;;  %v2917_v63 = vadd.f32 %v2914_v34, %v2899_v59 }
 0x598   :  { %2973 = vst [vmem:[#allocation5 + $0x8] sm:$0xff] %v2970_v47  ;;  %v2938_v53 = vpop.permute.xlu1 %2937  ;;  %v2935_v4 = vadd.f32 %v2932_v61, %v2917_v63 }
 0x599   :  { %v2948_v23 = vmul.f32 %v2938_v53, %v6398_v5 }
 0x59a   :  { %v2953_v54 = vadd.f32 %v2950_v39, %v2935_v4 }
 0x59b   :  { %v2951_v33 = vadd.f32 %v2948_v23, %v2933_v9 }
 0x5a1   :  { %v2956_v50 = vpop.permute.xlu1 %2955 }
 0x5a2   :  { %v2966_v18 = vmul.f32 %v2956_v50, %v6400_v56 }
 0x5a4   :  { %v2969_v51 = vadd.f32 %v2966_v18, %v2951_v33 }
 0x5a6   :  { %2972 = vst [vmem:[#allocation5] sm:$0xff] %v2969_v51 }
 0x5a9   :  { %v2964_v60 = vpop.permute.xlu1 %2963 }
 0x5aa   :  { %v2968_v17 = vmul.f32 %v2964_v60, %v6402_v46 }
 0x5ac   :  { %v2971_v31 = vadd.f32 %v2968_v17, %v2953_v54 }
 0x5ae   :  { %2974 = vst [vmem:[#allocation5 + $0x10] sm:$0xff] %v2971_v31 }
 0x5af LB: > { %s2983_s21 = sld [smem:[#allocation10 + %s3988_s18]]  ;;  %s2986_s7 = scalar_lea.vmem [#allocation5], %s3988_s18  ;;  %s3988_s18 = sphi %s3986_s18, %s2982_s18  }
 0x5b0   : > { %s2982_s18 = sadd.s32 1, %s3988_s18  }
 0x5b1   : > { %p2979_p5 = scmp.ge.s32.totalorder %s2982_s18, 20  }
 0x5b2   :  { %v3011_v21 = vld [vmem:[#allocation31 + $0x78] sm:$0xff] (%p2979_p5)  ;;  %v3010_v44 = vld [vmem:[#allocation31 + $0x70] sm:$0xff] (%p2979_p5)  ;;  %v6403_v19 = vmov (%p2979_p5), 0   ;;  %s6404_s12 = sld [smem:[#allocation68_spill]] (%p2979_p5)  ;;  %vm3076_vm5 = vcmask (%p2979_p5), 7168   ;;  %v3009_v30 = vld [vmem:[#allocation31 + $0x68] sm:$0xff] (%p2979_p5) }
 0x5b3   :  { %3519 = vset.pattern.permute.xlu1 (%p2979_p5), %v6403_v19  ;;  %3530 = vset.pattern.permute.xlu0 (%p2979_p5), %v6403_v19  ;;  %v6405_v24 = vmov (%p2979_p5), 0.0   ;;  %v3008_v25 = vld [vmem:[#allocation31 + $0x60] sm:$0xff] (%p2979_p5)  ;;  %v3007_v57 = vld [vmem:[#allocation31 + $0x58] sm:$0xff] (%p2979_p5)  ;;  %v3006_v26 = vld [vmem:[#allocation31 + $0x50] sm:$0xff] (%p2979_p5)  ;;  %s6407_s5 = sld [smem:[#allocation76_spill]] (%p2979_p5)  ;;  %s4023_s9 = smov (%p2979_p5), 1.0  }
 0x5b4   :  { %3012 = vmatpush.msra.mxu2 (%p2979_p5), %v3011_v21  ;;  %v3005_v12 = vld [vmem:[#allocation31 + $0x48] sm:$0xff] (%p2979_p5)  ;;  %v3004_v45 = vld [vmem:[#allocation31 + $0x40] sm:$0xff] (%p2979_p5)  ;;  %v3003_v58 = vld [vmem:[#allocation31 + $0x38] sm:$0xff] (%p2979_p5)  ;;  %s4024_s23 = smov (%p2979_p5), [#allocation33]   ;;  %s6409_s11 = sld [smem:[#allocation77_spill]] (%p2979_p5) }
 0x5b5   : > { %v2987_v15 = vld [vmem:[%s2986_s7] sm:$0x1]  ;;  %s2984_s25 = scalar_lea.vmem [#allocation3], %s2983_s21  ;;  %2981 = sbr.rel (!%p2979_p5) target bundleno = 1455 (0x5af), region = 319  ;;  %v3001_v48 = vld [vmem:[#allocation31 + $0x28] sm:$0xff] (%p2979_p5)  ;;  %v3000_v36 = vld [vmem:[#allocation31 + $0x20] sm:$0xff] (%p2979_p5) }
 0x5b6   : > { %v2985_v27 = vld [vmem:[%s2984_s25] sm:$0x1]  ;;  %3013 = vmatpush.msra.mxu2 (%p2979_p5), %v3010_v44  ;;  %v2999_v53 = vld [vmem:[#allocation31 + $0x18] sm:$0xff] (%p2979_p5)  ;;  %v2997_v42 = vld [vmem:[#allocation31 + $0x8] sm:$0xff] (%p2979_p5)  ;;  %s3167_s14 = sshll.u32 (%p2979_p5), %s4024_s23, 4  ;;  %s3168_s14 = int_to_ptr.vmem [resolvable:$true] %s3167_s14 }
 0x5b7   : > { %v2988_v11 = vadd.f32 %v2987_v15, %v2985_v27  ;;  %v3002_v47 = vld [vmem:[#allocation31 + $0x30] sm:$0xff] (%p2979_p5)  ;;  %v2996_v0 = vld [vmem:[#allocation31] sm:$0xff] (%p2979_p5) }
 0x5b8   :  { %v3049_v3 = vld [vmem:[%s6404_s12] sm:$0xff] (%p2979_p5)  ;;  %v3050_v43 = vld [vmem:[%s6404_s12 + $0x8] sm:$0xff] (%p2979_p5)  ;;  %3014 = vmatpush.msra.mxu2 (%p2979_p5), %v3009_v30  ;;  %v6406_v56 = vld [vmem:[#allocation54_spill] sm:$0xff] (%p2979_p5) }
 0x5b9   : > { %2989 = vst [vmem:[%s2984_s25] sm:$0x1] %v2988_v11  ;;  %vm3051_vm6 = vcmp.eq.s32.totalorder (%p2979_p5), %v3049_v3, 1  ;;  %vm3052_vm7 = vcmp.eq.s32.totalorder (%p2979_p5), %v3050_v43, 1  ;;  %vm3107_vm8 = vcmp.eq.s32.totalorder (%p2979_p5), %v3049_v3, 2  ;;  %vm3108_vm9 = vcmp.eq.s32.totalorder (%p2979_p5), %v3050_v43, 2  ;;  %v2998_v13 = vld [vmem:[#allocation31 + $0x10] sm:$0xff] (%p2979_p5) }
 0x5ba   :  { %v3341_v14 = vsel %vm3051_vm6, 1.0, %v6405_v24  ;;  %v3342_v49 = vsel %vm3052_vm7, 1.0, %v6405_v24  ;;  %v3343_v22 = vsel %vm3107_vm8, 1.0, %v6405_v24  ;;  %v3344_v38 = vsel %vm3108_vm9, 1.0, %v6405_v24  ;;  %3015 = vmatpush.msra.mxu2 %v3008_v25  ;;  %v2990_v55 = vld [vmem:[#allocation2] sm:$0xff]  ;;  %v2991_v20 = vld [vmem:[#allocation2 + $0x8] sm:$0xff] }
 0x5bb   :  { %v3077_v1 = vsel %vm3076_vm5, %v3341_v14, 0.0  ;;  %v3078_v6 = vsel %vm3076_vm5, %v3342_v49, 0.0  ;;  %v3132_v52 = vsel %vm3076_vm5, %v3343_v22, 0.0  ;;  %v3133_v37 = vsel %vm3076_vm5, %v3344_v38, 0.0  ;;  %v3531_v2 = vld [vmem:[%s6407_s5] ss:$0 sm:$0xff] }
 0x5bc   :  { %v3079_v40 = vadd.f32 %v3078_v6, %v3077_v1  ;;  %v3520_v10 = vpack.i.bf16 %v3342_v49, %v3341_v14  ;;  %3016 = vmatpush.msra.mxu2 %v3007_v57  ;;  %v3134_v8 = vadd.f32 %v3133_v37, %v3132_v52  ;;  %v3525_v16 = vpack.i.bf16 %v3344_v38, %v3343_v22  ;;  %v6408_v46 = vld [vmem:[#allocation56_spill] sm:$0xff]  ;;  %s3169_s27 = sshll.u32 %s6409_s11, 4  ;;  %s3170_s27 = int_to_ptr.hbm [resolvable:$true] %s3169_s27 }
 0x5be   :  { %3080 = vadd.xlane.f32.xlu0 %v3079_v40  ;;  %3521 = vperm.xlu1 %3519, %v3520_v10  }
 0x5bf   :  { %3017 = vmatpush.msra.mxu2 %v3006_v26 }
 0x5c0   :  { %v2992_v33 = vld [vmem:[#allocation3] sm:$0xff]  ;;  %v2993_v39 = vld [vmem:[#allocation3 + $0x8] sm:$0xff] }
 0x5c1   :  { %3018 = vmatpush.msra.mxu2 %v3005_v12  ;;  %v2994_v18 = vmul.f32 %v2992_v33, %v6406_v56  ;;  %v2995_v17 = vmul.f32 %v2993_v39, %v6408_v46 }
 0x5c3   :  { %3019 = vmatpush.msra.mxu2 %v3004_v45 }
 0x5c5   :  { %3020 = vmatpush.msra.mxu2 %v3003_v58 }
 0x5c6   :  { %3135 = vadd.xlane.f32.xlu0 %v3134_v8  ;;  %3526 = vperm.xlu1 %3519, %v3525_v16  }
 0x5c7   :  { %3021 = vmatpush.msra.mxu2 %v3002_v47 }
 0x5c9   :  { %3022 = vmatpush.msra.mxu2 %v3001_v48 }
 0x5cb   :  { %3023 = vmatpush.msra.mxu2 %v3000_v36 }
 0x5cd   :  { %3024 = vmatpush.msra.mxu2 %v2999_v53 }
 0x5cf   :  { %3025 = vmatpush.msra.mxu2 %v2998_v13 }
 0x5d1   :  { %3026 = vmatpush.msra.mxu2 %v2997_v42 }
 0x5d3   :  { %3027 = vmatpush.msra.mxu2 %v2996_v0 }
 0x5d4   :  { %3028 = vmatmul.f32.vlgmr.msra.gmra.mxu2 %v2990_v55 }
 0x5dc   :  { %3031 = vmatmul.f32.gmra.mxu2 %v2991_v20 }
 0x630   :  { %v3522_v41 = vpop.permute.xlu1 %3521 }
 0x631   :  { %v3081_v7 = vpop.xlane.xlu0 %3080  ;;  %v3523_v27 = vunpack.i.l.bf16 %v3522_v41  ;;  %v3524_v21 = vunpack.i.h.bf16 %v3522_v41 }
 0x632   :  { %v3082_v35 = vrot.slane %v3081_v7, 4 }
 0x634   :  { %v3083_v29 = vadd.f32 %v3082_v35, %v3081_v7 }
 0x636   :  { %v3084_v28 = vrot.slane %v3083_v29, 2 }
 0x638   :  { %v3085_v32 = vadd.f32 %v3084_v28, %v3083_v29  ;;  %v3527_v44 = vpop.permute.xlu1 %3526 }
 0x639   :  { %v3136_v34 = vpop.xlane.xlu0 %3135  ;;  %v3529_v43 = vunpack.i.h.bf16 %v3527_v44  ;;  %v3528_v30 = vunpack.i.l.bf16 %v3527_v44 }
 0x63a   :  { %v3137_v59 = vrot.slane %v3136_v34, 4  ;;  %v3086_v5 = vrot.slane %v3085_v32, 1 }
 0x63c   :  { %v3138_v23 = vadd.f32 %v3137_v59, %v3136_v34  ;;  %v3087_v9 = vadd.f32 %v3086_v5, %v3085_v32 }
 0x63e   :  { %v3139_v50 = vrot.slane %v3138_v23, 2  ;;  %3361 = vpush %v3087_v9 }
 0x640   :  { %v3140_v63 = vadd.f32 %v3139_v50, %v3138_v23 }
 0x642   :  { %v3141_v62 = vrot.slane %v3140_v63, 1 }
 0x644   :  { %v3142_v61 = vadd.f32 %v3141_v62, %v3140_v63 }
 0x646   :  { %3363 = vpush %v3142_v61 }
 0x657   :  { %v3029_v51 = vpop.f32.mrf.mxu2 }
 0x658   :  { %v3035_v4 = vadd.f32 %v3029_v51, %v2994_v18 }
 0x65a   :  { %v3041_v60 = vadd.f32 %v3531_v2, %v3035_v4 }
 0x65c   :  { %v3043_v54 = vmax.f32 %v3041_v60, 0.0 }
 0x65e   :  { %3045 = vst [vmem:[#allocation2] sm:$0xff] %v3043_v54  ;;  %v3067_v3 = vmul.f32 %v3523_v27, %v3043_v54  ;;  %v3123_v49 = vmul.f32 %v3528_v30, %v3043_v54 }
 0x65f   :  { %v3032_v31 = vpop.f32.mrf.mxu2 }
 0x660   :  { %v3036_v15 = vadd.f32 %v3032_v31, %v2995_v17 }
 0x662   :  { %v3042_v11 = vadd.f32 %v3531_v2, %v3036_v15 }
 0x664   :  { %v3044_v19 = vmax.f32 %v3042_v11, 0.0 }
 0x666   :  { %3046 = vst [vmem:[#allocation2 + $0x8] sm:$0xff] %v3044_v19  ;;  %v3068_v24 = vmul.f32 %v3524_v21, %v3044_v19  ;;  %v3124_v1 = vmul.f32 %v3529_v43, %v3044_v19 }
 0x668   :  { %v3069_v14 = vadd.f32 %v3068_v24, %v3067_v3  ;;  %v3125_v25 = vadd.f32 %v3124_v1, %v3123_v49 }
 0x66a   :  { %v3070_v6 = vrot.slane %v3069_v14, 4  ;;  %v3126_v38 = vrot.slane %v3125_v25, 4 }
 0x66c   :  { %v3071_v40 = vadd.f32 %v3070_v6, %v3069_v14  ;;  %v3127_v52 = vadd.f32 %v3126_v38, %v3125_v25 }
 0x66e   :  { %v3072_v57 = vrot.slane %v3071_v40, 2  ;;  %v3128_v45 = vrot.slane %v3127_v52, 2 }
 0x66f   :  { %s3362_s19 = spop %3361 }
 0x670   :  { %s3089_s3 = smax.f32 %s4023_s9, %s3362_s19  ;;  %v3073_v12 = vadd.f32 %v3072_v57, %v3071_v40  ;;  %v3129_v42 = vadd.f32 %v3128_v45, %v3127_v52 }
 0x671   :  { %v3090_v22 = vstv %s3089_s3 }
 0x672   :  { %3532 = vrcp.f32 %v3090_v22  ;;  %v3102_v58 = vand.u32 2147483648, %v3090_v22  ;;  %v3100_v47 = vand.u32 2147483647, %v3090_v22  ;;  %v3074_v48 = vrot.slane %v3073_v12, 1 }
 0x673   :  { %vm3096_vm11 = vweird.f32 %v3090_v22  ;;  %v3130_v59 = vrot.slane %v3129_v42, 1 }
 0x674   :  { %v3103_v13 = vor.u32 1.1754944e-38, %v3102_v58  ;;  %v3075_v55 = vadd.f32 %v3074_v48, %v3073_v12  ;;  %vm3101_vm13 = vcmp.eq.f32.partialorder %v3100_v47, 8.507059e+37 }
 0x675   :  { %v3131_v9 = vadd.f32 %v3130_v59, %v3129_v42 }
 0x677   :  { %s3364_s10 = spop %3363 }
 0x678   :  { %v3533_v26 = vpop.eup %3532  ;;  %s3144_s30 = smax.f32 %s4023_s9, %s3364_s10 }
 0x679   :  { %v3092_v37 = vmul.f32 %v3533_v26, %v3090_v22  ;;  %v3145_v10 = vstv %s3144_s30  ;;  %vm3097_vm10 = vweird.f32 %v3533_v26 }
 0x67a   :  { %3534 = vrcp.f32 %v3145_v10  ;;  %vm3098_vm12 = vmor %vm3096_vm11, %vm3097_vm10  ;;  %v3157_v28 = vand.u32 2147483648, %v3145_v10  ;;  %v3155_v34 = vand.u32 2147483647, %v3145_v10  ;;  %vm3151_vm15 = vweird.f32 %v3145_v10 }
 0x67b   :  { %v3093_v8 = vsub.f32 1.0, %v3092_v37 }
 0x67c   :  { %v3158_v23 = vor.u32 1.1754944e-38, %v3157_v28  ;;  %vm3156_vm1 = vcmp.eq.f32.partialorder %v3155_v34, 8.507059e+37 }
 0x67d   :  { %v3094_v16 = vmul.f32 %v3533_v26, %v3093_v8 }
 0x67f   :  { %v3095_v36 = vadd.f32 %v3533_v26, %v3094_v16 }
 0x680   :  { %v3535_v53 = vpop.eup %3534 }
 0x681   :  { %v3147_v0 = vmul.f32 %v3535_v53, %v3145_v10  ;;  %v3099_v20 = vsel %vm3098_vm12, %v3533_v26, %v3095_v36  ;;  %vm3152_vm14 = vweird.f32 %v3535_v53 }
 0x682   :  { %v3104_v7 = vsel %vm3101_vm13, %v3103_v13, %v3099_v20  ;;  %vm3153_vm0 = vmor %vm3151_vm15, %vm3152_vm14 }
 0x683   :  { %v3148_v35 = vsub.f32 1.0, %v3147_v0  ;;  %v3105_v29 = vmul.f32 %v3104_v7, %v3075_v55 }
 0x685   :  { %v3149_v32 = vmul.f32 %v3535_v53, %v3148_v35  ;;  %3106 = vst [vmem:[#allocation33] sm:$0x1] %v3105_v29 }
 0x687   :  { %v3150_v5 = vadd.f32 %v3535_v53, %v3149_v32 }
 0x689   :  { %v3154_v50 = vsel %vm3153_vm0, %v3535_v53, %v3150_v5 }
 0x68a   :  { %v3159_v63 = vsel %vm3156_vm1, %v3158_v23, %v3154_v50 }
 0x68b   :  { %v3160_v62 = vmul.f32 %v3159_v63, %v3131_v9 }
 0x68d   :  { %3161 = vst [vmem:[#allocation33 + $0x1] sm:$0x1] %v3160_v62 }
 0x68e   :  { %3172 = dma.vmem_to_hbm [thread:$0]  %s3168_s14, 32, %s3170_s27, [#allocation8]  }
 0x68f   :  { %3964 = dma.done.wait [#allocation8], 32  }
 0x690   :  { %3965 = vsyncadd [#allocation8], 4294967264 }
 0x691   :  { %3177 = vsyncpa [#allocation7], 1 }
 0x692   :  { %3178 = vsyncpa [#allocation14], 1 }
 0x693   :  { %3179 = vsyncpa [#allocation17], 1 }
 0x694   :  { %3180 = vsyncpa [#allocation20], 1 }
 0x695   :  { %3181 = vsyncpa [#allocation23], 1 }
 0x696   :  { %3182 = vsyncpa [#allocation26], 1 }
 0x697   :  { %3183 = vsyncpa [#allocation29], 1 }
 0x698   :  { %3184 = vsyncpa [#allocation32], 1 }
 0x699   :  { %3185 = vsyncpa [#allocation8], 1 }
 0x69a   :  { %3186 = vsyncpa [#allocation9], 1 }
 0x69b   :  { %3187 = vsyncpa [#allocation11], 1 }

</bundles_post_ra>
